<compile_context>
chip_gen: v7x
topology: tpu7x:2x2x1
jax: 0.10.0
libtpu: 0.0.40
codegen_flags: <defaults>
</compile_context>

<pallas_src>
import functools

import numpy as np
import jax
import jax.numpy as jnp
from jax import lax
from jax.experimental import pallas as pl
from jax.experimental.pallas import tpu as pltpu


# Architecture constants for this trial.
_KH = _KW = 3        # both conv kernels are 3x3
_C0 = 16             # conv_0 filters
_C1 = 32             # conv_1 filters
_HP1 = _WP1 = 5      # spatial size after conv_1 + pool_1 (28 -> 26 -> 13 -> 11 -> 5)
_LANE = 128          # padded lane width of every per-group column block


# ----------------------------------------------------------------------------
# The single fused Pallas kernel
# ----------------------------------------------------------------------------
def _cnn_fused_kernel(n_batch,
                      pt0_ref, w0_ref, b0_ref, sc0_ref, sh0_ref,
                      w1_ref, b1_ref,
                      wd0_ref, bd0_ref, wd1_ref, bd1_ref, wd2_ref, bd2_ref,
                      o_ref):
    L = _LANE
    npos = _HP1 * _WP1                                  # 25 positions per image

    # ---- conv_0 -> bias -> ReLU -> BN affine -> 2x2 max-pool (single MXU push) ----
    # pt0 columns are ordered (pool-phase ph0 in 0..3, overlap-group g=r*4+s in 0..15,
    # padded m in 0..127 with m = n*25 + i1*5 + j1 real for m < n_batch*25).
    z0 = jnp.dot(w0_ref[...], pt0_ref[...],
                 preferred_element_type=jnp.float32)    # (16, 4*16*L) = (16, 8192)
    a0 = jnp.maximum(z0 + b0_ref[...], 0.0) * sc0_ref[...]
    gl = 16 * L                                         # lanes per pool phase
    y0 = jnp.maximum(jnp.maximum(a0[:, 0 * gl:1 * gl], a0[:, 1 * gl:2 * gl]),
                     jnp.maximum(a0[:, 2 * gl:3 * gl], a0[:, 3 * gl:4 * gl]))
    y0 = y0 + sh0_ref[...]                              # shift hoisted out of the max
    # y0: (16, 16*L); group g = r*4+s holds pooled conv_0 output at (2*i1+r, 2*j1+s).

    # ---- conv_1 taps: lane-aligned gather of the 16 overlap groups, all in VMEM ----
    phase_mats = []
    for a1 in range(2):
        for b1 in range(2):
            taps = []
            for di in range(_KH):
                for dj in range(_KW):
                    g = (a1 + di) * 4 + (b1 + dj)
                    taps.append(y0[:, g * L:(g + 1) * L])       # (16, L), 128-aligned
            phase_mats.append(jnp.concatenate(taps, axis=0))    # (144, L)
    t1 = jnp.concatenate(phase_mats, axis=1)                    # (144, 4*L)

    # ---- conv_1 -> bias -> ReLU (eval Dropout = identity) -> 2x2 max-pool ----
    z1 = jnp.dot(w1_ref[...], t1,
                 preferred_element_type=jnp.float32)            # (32, 512)
    r1 = jnp.maximum(z1 + b1_ref[...], 0.0)
    y1 = jnp.maximum(jnp.maximum(r1[:, 0 * L:1 * L], r1[:, 1 * L:2 * L]),
                     jnp.maximum(r1[:, 2 * L:3 * L], r1[:, 3 * L:4 * L]))   # (32, L)

    # ---- flatten to PyTorch NCHW .view(N,-1) order, entirely in VMEM ----
    # x_flat[n, c*25 + p] = y1[c, n*25 + p]; padded lanes (m >= n_batch*25) never read.
    rows = []
    for n in range(n_batch):
        pieces = [y1[c:c + 1, n * npos:(n + 1) * npos] for c in range(_C1)]
        rows.append(jnp.concatenate(pieces, axis=1))            # (1, 800)
    x_flat = jnp.concatenate(rows, axis=0)                      # (N, 800)

    # ---- dense chain 800 -> 64 -> 32 -> 10 ----
    h = jnp.dot(x_flat, wd0_ref[...], preferred_element_type=jnp.float32) + bd0_ref[...]
    h = jnp.maximum(h, 0.0)
    h = jnp.dot(h, wd1_ref[...], preferred_element_type=jnp.float32) + bd1_ref[...]
    h = jnp.maximum(h, 0.0)
    o = jnp.dot(h, wd2_ref[...], preferred_element_type=jnp.float32) + bd2_ref[...]
    o_ref[...] = o.astype(o_ref.dtype)


def _full(shape):
    """Whole-array BlockSpec (single block)."""
    nd = len(shape)
    return pl.BlockSpec(shape, lambda i: (0,) * nd)


# ----------------------------------------------------------------------------
# Wrapper-side tap matrix for conv_0 (one tiny gather on the 6 KB input image)
# ----------------------------------------------------------------------------
def _conv0_tap_matrix(xs):
    """xs: (N, 28, 28) -> (9, 4*16*_LANE).

    PT0[di*3+dj, (a0*2+b0)*16*L + (r*4+s)*L + (n*25 + i1*5 + j1)]
        = xs[n, 4*i1 + 2*r + a0 + di, 4*j1 + 2*s + b0 + dj]
    """
    n = xs.shape[0]
    m_real = n * _HP1 * _WP1
    assert m_real <= _LANE, "batch too large for single-lane-block layout"
    di = np.arange(_KH)
    a = np.arange(2)
    r = np.arange(4)
    i1 = np.arange(_HP1)
    off = (4 * i1[None, None, None, :] + 2 * r[None, None, :, None]
           + a[None, :, None, None] + di[:, None, None, None])          # (3,2,4,5)
    ridx = off[:, :, :, :, None, None, None, None]
    cidx = off[None, None, None, None, :, :, :, :]
    pt = xs[:, ridx, cidx]                      # (N, 3,2,4,5, 3,2,4,5) -- one gather
    # -> (di, dj, a0, b0, r, s, n, i1, j1)
    pt = jnp.transpose(pt, (1, 5, 2, 6, 3, 7, 0, 4, 8))
    pt = pt.reshape(_KH * _KW, 4, 16, m_real)
    pt = jnp.pad(pt, ((0, 0), (0, 0), (0, 0), (0, _LANE - m_real)))
    return pt.reshape(_KH * _KW, 4 * 16 * _LANE)


# ----------------------------------------------------------------------------
# Forward pass: ONE pallas_call for the whole network
# ----------------------------------------------------------------------------
def cnn_forward(x_nchw, p):
    n, cin, h, w = x_nchw.shape
    assert (cin, h, w) == (1, 28, 28)
    pt0 = _conv0_tap_matrix(x_nchw[:, 0])                                   # (9, 8192)
    w0m = jnp.transpose(p['w0'], (3, 0, 1, 2)).reshape(_C0, _KH * _KW)      # (16, 9)
    w1m = jnp.transpose(p['w1'], (3, 0, 1, 2)).reshape(_C1, _KH * _KW * _C0)  # (32, 144)
    args = (pt0, w0m,
            p['b0'].reshape(-1, 1), p['scale0'].reshape(-1, 1), p['shift0'].reshape(-1, 1),
            w1m, p['b1'].reshape(-1, 1),
            p['wd0'], p['bd0'].reshape(1, -1),
            p['wd1'], p['bd1'].reshape(1, -1),
            p['wd2'], p['bd2'].reshape(1, -1))
    kernel = functools.partial(_cnn_fused_kernel, n)
    return pl.pallas_call(
        kernel,
        out_shape=jax.ShapeDtypeStruct((n, 10), jnp.float32),
        grid=(1,),
        in_specs=[_full(a.shape) for a in args],
        out_specs=_full((n, 10)),
        compiler_params=pltpu.CompilerParams(dimension_semantics=("arbitrary",)),
    )(*args)


# ----------------------------------------------------------------------------
# Parameters (deterministic, PyTorch-default-style uniform init)
# ----------------------------------------------------------------------------
def init_params(key):
    ks = jax.random.split(key, 10)

    def dense_init(k, fan_in, fan_out):
        kw, kb = jax.random.split(k)
        bound = 1.0 / float(np.sqrt(fan_in))
        w = jax.random.uniform(kw, (fan_in, fan_out), jnp.float32, -bound, bound)
        b = jax.random.uniform(kb, (fan_out,), jnp.float32, -bound, bound)
        return w, b

    def conv_init(k, kh, kw_, cin, cout):
        kk, kb = jax.random.split(k)
        bound = 1.0 / float(np.sqrt(cin * kh * kw_))
        w = jax.random.uniform(kk, (kh, kw_, cin, cout), jnp.float32, -bound, bound)
        b = jax.random.uniform(kb, (cout,), jnp.float32, -bound, bound)
        return w, b

    p = {}
    # conv_0: 1 -> 16, 3x3, + eval-mode BatchNorm folded into scale/shift
    p['w0'], p['b0'] = conv_init(ks[0], 3, 3, 1, 16)
    gamma = 1.0 + 0.1 * jax.random.normal(ks[1], (16,), jnp.float32)
    beta = 0.1 * jax.random.normal(ks[2], (16,), jnp.float32)
    rmean = 0.1 * jax.random.normal(ks[3], (16,), jnp.float32)
    rvar = jnp.abs(1.0 + 0.1 * jax.random.normal(ks[4], (16,), jnp.float32))
    eps = 1e-5
    p['scale0'] = gamma / jnp.sqrt(rvar + eps)
    p['shift0'] = beta - rmean * p['scale0']
    # conv_1: 16 -> 32, 3x3 (no BN; dropout is identity in eval)
    p['w1'], p['b1'] = conv_init(ks[5], 3, 3, 16, 32)
    # dense: 800 -> 64 -> 32 -> 10
    p['wd0'], p['bd0'] = dense_init(ks[6], 800, 64)
    p['wd1'], p['bd1'] = dense_init(ks[7], 64, 32)
    p['wd2'], p['bd2'] = dense_init(ks[8], 32, 10)
    return p


# ----------------------------------------------------------------------------
# Pure-JAX (XLA) reference with identical semantics
# ----------------------------------------------------------------------------
def reference_forward(x_nchw, p):
    dn = ('NHWC', 'HWIO', 'NHWC')
    x = jnp.transpose(x_nchw, (0, 2, 3, 1))
    y = lax.conv_general_dilated(x, p['w0'], (1, 1), 'VALID', dimension_numbers=dn)
    y = jnp.maximum(y + p['b0'], 0.0) * p['scale0'] + p['shift0']
    y = lax.reduce_window(y, -jnp.inf, lax.max, (1, 2, 2, 1), (1, 2, 2, 1), 'VALID')
    y = lax.conv_general_dilated(y, p['w1'], (1, 1), 'VALID', dimension_numbers=dn)
    y = jnp.maximum(y + p['b1'], 0.0)
    y = lax.reduce_window(y, -jnp.inf, lax.max, (1, 2, 2, 1), (1, 2, 2, 1), 'VALID')
    flat = jnp.transpose(y, (0, 3, 1, 2)).reshape(y.shape[0], -1)
    h = jnp.maximum(flat @ p['wd0'] + p['bd0'], 0.0)
    h = jnp.maximum(h @ p['wd1'] + p['bd1'], 0.0)
    return h @ p['wd2'] + p['bd2']


# ----------------------------------------------------------------------------
if __name__ == "__main__":
    key = jax.random.PRNGKey(0)
    kx, kp = jax.random.split(key)
    # input shape implied by the module: (batch, 1, 28, 28); small batch = 2
    x = jax.random.normal(kx, (2, 1, 28, 28), jnp.float32)
    params = init_params(kp)

    fwd = jax.jit(cnn_forward)
    out = jax.block_until_ready(fwd(x, params))

    ref = jax.block_until_ready(reference_forward(x, params))
    assert out.shape == (2, 10), out.shape
    np.testing.assert_allclose(np.asarray(out), np.asarray(ref),
                               rtol=2e-2, atol=2e-2)
    print("KERNEL_OK")
</pallas_src>

<mosaic_0001>
module attributes {stable_mosaic.version = 11 : i64} {
  func.func @_cnn_fused_kernel(%arg0: i32, %arg1: memref<9x8192xf32, #tpu.memory_space<vmem>>, %arg2: memref<16x9xf32, #tpu.memory_space<vmem>>, %arg3: memref<16x1xf32, #tpu.memory_space<vmem>>, %arg4: memref<16x1xf32, #tpu.memory_space<vmem>>, %arg5: memref<16x1xf32, #tpu.memory_space<vmem>>, %arg6: memref<32x144xf32, #tpu.memory_space<vmem>>, %arg7: memref<32x1xf32, #tpu.memory_space<vmem>>, %arg8: memref<800x64xf32, #tpu.memory_space<vmem>>, %arg9: memref<1x64xf32, #tpu.memory_space<vmem>>, %arg10: memref<64x32xf32, #tpu.memory_space<vmem>>, %arg11: memref<1x32xf32, #tpu.memory_space<vmem>>, %arg12: memref<32x10xf32, #tpu.memory_space<vmem>>, %arg13: memref<1x10xf32, #tpu.memory_space<vmem>>, %arg14: memref<2x10xf32, #tpu.memory_space<vmem>>) attributes {dimension_semantics = [#tpu.dimension_semantics<arbitrary>], iteration_bounds = array<i64: 1>, scalar_prefetch = 0 : i64, scratch_operands = 0 : i64, tpu.core_type = #tpu.core_type<tc>, window_params = [{pipeline_mode = #tpu.pipeline_mode<synchronous>, transform_indices = @transform_0, window_bounds = array<i64: 9, 8192>}, {pipeline_mode = #tpu.pipeline_mode<synchronous>, transform_indices = @transform_1, window_bounds = array<i64: 16, 9>}, {pipeline_mode = #tpu.pipeline_mode<synchronous>, transform_indices = @transform_2, window_bounds = array<i64: 16, 1>}, {pipeline_mode = #tpu.pipeline_mode<synchronous>, transform_indices = @transform_3, window_bounds = array<i64: 16, 1>}, {pipeline_mode = #tpu.pipeline_mode<synchronous>, transform_indices = @transform_4, window_bounds = array<i64: 16, 1>}, {pipeline_mode = #tpu.pipeline_mode<synchronous>, transform_indices = @transform_5, window_bounds = array<i64: 32, 144>}, {pipeline_mode = #tpu.pipeline_mode<synchronous>, transform_indices = @transform_6, window_bounds = array<i64: 32, 1>}, {pipeline_mode = #tpu.pipeline_mode<synchronous>, transform_indices = @transform_7, window_bounds = array<i64: 800, 64>}, {pipeline_mode = #tpu.pipeline_mode<synchronous>, transform_indices = @transform_8, window_bounds = array<i64: 1, 64>}, {pipeline_mode = #tpu.pipeline_mode<synchronous>, transform_indices = @transform_9, window_bounds = array<i64: 64, 32>}, {pipeline_mode = #tpu.pipeline_mode<synchronous>, transform_indices = @transform_10, window_bounds = array<i64: 1, 32>}, {pipeline_mode = #tpu.pipeline_mode<synchronous>, transform_indices = @transform_11, window_bounds = array<i64: 32, 10>}, {pipeline_mode = #tpu.pipeline_mode<synchronous>, transform_indices = @transform_12, window_bounds = array<i64: 1, 10>}, {pipeline_mode = #tpu.pipeline_mode<synchronous>, transform_indices = @transform_13, window_bounds = array<i64: 2, 10>}]} {
    %c0 = arith.constant 0 : index
    %c0_0 = arith.constant 0 : index
    %0 = vector.load %arg2[%c0, %c0_0] : memref<16x9xf32, #tpu.memory_space<vmem>>, vector<16x9xf32>
    %c0_1 = arith.constant 0 : index
    %c0_2 = arith.constant 0 : index
    %1 = vector.load %arg1[%c0_1, %c0_2] : memref<9x8192xf32, #tpu.memory_space<vmem>>, vector<9x8192xf32>
    %cst = arith.constant dense<0.000000e+00> : vector<16x8192xf32>
    %2 = tpu.matmul %0, %1, %cst {dimension_numbers = #tpu.dot_dimension_numbers<[1], [0], [0], [1], [0, 0, 1, 1], [], []>} : vector<16x9xf32>, vector<9x8192xf32>, vector<16x8192xf32> -> vector<16x8192xf32>
    %c0_3 = arith.constant 0 : index
    %c0_4 = arith.constant 0 : index
    %3 = vector.load %arg3[%c0_3, %c0_4] : memref<16x1xf32, #tpu.memory_space<vmem>>, vector<16x1xf32>
    %4 = vector.broadcast %3 : vector<16x1xf32> to vector<16x8192xf32>
    %5 = arith.addf %2, %4 : vector<16x8192xf32>
    %cst_5 = arith.constant 0.000000e+00 : f32
    %6 = vector.broadcast %cst_5 : f32 to vector<16x8192xf32>
    %7 = arith.maximumf %5, %6 : vector<16x8192xf32>
    %c0_6 = arith.constant 0 : index
    %c0_7 = arith.constant 0 : index
    %8 = vector.load %arg4[%c0_6, %c0_7] : memref<16x1xf32, #tpu.memory_space<vmem>>, vector<16x1xf32>
    %9 = vector.broadcast %8 : vector<16x1xf32> to vector<16x8192xf32>
    %10 = arith.mulf %7, %9 : vector<16x8192xf32>
    %11 = vector.extract_strided_slice %10 {offsets = [0, 0], sizes = [16, 2048], strides = [1, 1]} : vector<16x8192xf32> to vector<16x2048xf32>
    %12 = vector.extract_strided_slice %10 {offsets = [0, 2048], sizes = [16, 2048], strides = [1, 1]} : vector<16x8192xf32> to vector<16x2048xf32>
    %13 = arith.maximumf %11, %12 : vector<16x2048xf32>
    %14 = vector.extract_strided_slice %10 {offsets = [0, 4096], sizes = [16, 2048], strides = [1, 1]} : vector<16x8192xf32> to vector<16x2048xf32>
    %15 = vector.extract_strided_slice %10 {offsets = [0, 6144], sizes = [16, 2048], strides = [1, 1]} : vector<16x8192xf32> to vector<16x2048xf32>
    %16 = arith.maximumf %14, %15 : vector<16x2048xf32>
    %17 = arith.maximumf %13, %16 : vector<16x2048xf32>
    %c0_8 = arith.constant 0 : index
    %c0_9 = arith.constant 0 : index
    %18 = vector.load %arg5[%c0_8, %c0_9] : memref<16x1xf32, #tpu.memory_space<vmem>>, vector<16x1xf32>
    %19 = vector.broadcast %18 : vector<16x1xf32> to vector<16x2048xf32>
    %20 = arith.addf %17, %19 : vector<16x2048xf32>
    %21 = vector.extract_strided_slice %20 {offsets = [0, 0], sizes = [16, 128], strides = [1, 1]} : vector<16x2048xf32> to vector<16x128xf32>
    %22 = vector.extract_strided_slice %20 {offsets = [0, 128], sizes = [16, 128], strides = [1, 1]} : vector<16x2048xf32> to vector<16x128xf32>
    %23 = vector.extract_strided_slice %20 {offsets = [0, 256], sizes = [16, 128], strides = [1, 1]} : vector<16x2048xf32> to vector<16x128xf32>
    %24 = vector.extract_strided_slice %20 {offsets = [0, 512], sizes = [16, 128], strides = [1, 1]} : vector<16x2048xf32> to vector<16x128xf32>
    %25 = vector.extract_strided_slice %20 {offsets = [0, 640], sizes = [16, 128], strides = [1, 1]} : vector<16x2048xf32> to vector<16x128xf32>
    %26 = vector.extract_strided_slice %20 {offsets = [0, 768], sizes = [16, 128], strides = [1, 1]} : vector<16x2048xf32> to vector<16x128xf32>
    %27 = vector.extract_strided_slice %20 {offsets = [0, 1024], sizes = [16, 128], strides = [1, 1]} : vector<16x2048xf32> to vector<16x128xf32>
    %28 = vector.extract_strided_slice %20 {offsets = [0, 1152], sizes = [16, 128], strides = [1, 1]} : vector<16x2048xf32> to vector<16x128xf32>
    %29 = vector.extract_strided_slice %20 {offsets = [0, 1280], sizes = [16, 128], strides = [1, 1]} : vector<16x2048xf32> to vector<16x128xf32>
    %30 = tpu.concatenate %21, %22, %23, %24, %25, %26, %27, %28, %29 in 0 : vector<16x128xf32>, vector<16x128xf32>, vector<16x128xf32>, vector<16x128xf32>, vector<16x128xf32>, vector<16x128xf32>, vector<16x128xf32>, vector<16x128xf32>, vector<16x128xf32> -> vector<144x128xf32>
    %31 = vector.extract_strided_slice %20 {offsets = [0, 128], sizes = [16, 128], strides = [1, 1]} : vector<16x2048xf32> to vector<16x128xf32>
    %32 = vector.extract_strided_slice %20 {offsets = [0, 256], sizes = [16, 128], strides = [1, 1]} : vector<16x2048xf32> to vector<16x128xf32>
    %33 = vector.extract_strided_slice %20 {offsets = [0, 384], sizes = [16, 128], strides = [1, 1]} : vector<16x2048xf32> to vector<16x128xf32>
    %34 = vector.extract_strided_slice %20 {offsets = [0, 640], sizes = [16, 128], strides = [1, 1]} : vector<16x2048xf32> to vector<16x128xf32>
    %35 = vector.extract_strided_slice %20 {offsets = [0, 768], sizes = [16, 128], strides = [1, 1]} : vector<16x2048xf32> to vector<16x128xf32>
    %36 = vector.extract_strided_slice %20 {offsets = [0, 896], sizes = [16, 128], strides = [1, 1]} : vector<16x2048xf32> to vector<16x128xf32>
    %37 = vector.extract_strided_slice %20 {offsets = [0, 1152], sizes = [16, 128], strides = [1, 1]} : vector<16x2048xf32> to vector<16x128xf32>
    %38 = vector.extract_strided_slice %20 {offsets = [0, 1280], sizes = [16, 128], strides = [1, 1]} : vector<16x2048xf32> to vector<16x128xf32>
    %39 = vector.extract_strided_slice %20 {offsets = [0, 1408], sizes = [16, 128], strides = [1, 1]} : vector<16x2048xf32> to vector<16x128xf32>
    %40 = tpu.concatenate %31, %32, %33, %34, %35, %36, %37, %38, %39 in 0 : vector<16x128xf32>, vector<16x128xf32>, vector<16x128xf32>, vector<16x128xf32>, vector<16x128xf32>, vector<16x128xf32>, vector<16x128xf32>, vector<16x128xf32>, vector<16x128xf32> -> vector<144x128xf32>
    %41 = vector.extract_strided_slice %20 {offsets = [0, 512], sizes = [16, 128], strides = [1, 1]} : vector<16x2048xf32> to vector<16x128xf32>
    %42 = vector.extract_strided_slice %20 {offsets = [0, 640], sizes = [16, 128], strides = [1, 1]} : vector<16x2048xf32> to vector<16x128xf32>
    %43 = vector.extract_strided_slice %20 {offsets = [0, 768], sizes = [16, 128], strides = [1, 1]} : vector<16x2048xf32> to vector<16x128xf32>
    %44 = vector.extract_strided_slice %20 {offsets = [0, 1024], sizes = [16, 128], strides = [1, 1]} : vector<16x2048xf32> to vector<16x128xf32>
    %45 = vector.extract_strided_slice %20 {offsets = [0, 1152], sizes = [16, 128], strides = [1, 1]} : vector<16x2048xf32> to vector<16x128xf32>
    %46 = vector.extract_strided_slice %20 {offsets = [0, 1280], sizes = [16, 128], strides = [1, 1]} : vector<16x2048xf32> to vector<16x128xf32>
    %47 = vector.extract_strided_slice %20 {offsets = [0, 1536], sizes = [16, 128], strides = [1, 1]} : vector<16x2048xf32> to vector<16x128xf32>
    %48 = vector.extract_strided_slice %20 {offsets = [0, 1664], sizes = [16, 128], strides = [1, 1]} : vector<16x2048xf32> to vector<16x128xf32>
    %49 = vector.extract_strided_slice %20 {offsets = [0, 1792], sizes = [16, 128], strides = [1, 1]} : vector<16x2048xf32> to vector<16x128xf32>
    %50 = tpu.concatenate %41, %42, %43, %44, %45, %46, %47, %48, %49 in 0 : vector<16x128xf32>, vector<16x128xf32>, vector<16x128xf32>, vector<16x128xf32>, vector<16x128xf32>, vector<16x128xf32>, vector<16x128xf32>, vector<16x128xf32>, vector<16x128xf32> -> vector<144x128xf32>
    %51 = vector.extract_strided_slice %20 {offsets = [0, 640], sizes = [16, 128], strides = [1, 1]} : vector<16x2048xf32> to vector<16x128xf32>
    %52 = vector.extract_strided_slice %20 {offsets = [0, 768], sizes = [16, 128], strides = [1, 1]} : vector<16x2048xf32> to vector<16x128xf32>
    %53 = vector.extract_strided_slice %20 {offsets = [0, 896], sizes = [16, 128], strides = [1, 1]} : vector<16x2048xf32> to vector<16x128xf32>
    %54 = vector.extract_strided_slice %20 {offsets = [0, 1152], sizes = [16, 128], strides = [1, 1]} : vector<16x2048xf32> to vector<16x128xf32>
    %55 = vector.extract_strided_slice %20 {offsets = [0, 1280], sizes = [16, 128], strides = [1, 1]} : vector<16x2048xf32> to vector<16x128xf32>
    %56 = vector.extract_strided_slice %20 {offsets = [0, 1408], sizes = [16, 128], strides = [1, 1]} : vector<16x2048xf32> to vector<16x128xf32>
    %57 = vector.extract_strided_slice %20 {offsets = [0, 1664], sizes = [16, 128], strides = [1, 1]} : vector<16x2048xf32> to vector<16x128xf32>
    %58 = vector.extract_strided_slice %20 {offsets = [0, 1792], sizes = [16, 128], strides = [1, 1]} : vector<16x2048xf32> to vector<16x128xf32>
    %59 = vector.extract_strided_slice %20 {offsets = [0, 1920], sizes = [16, 128], strides = [1, 1]} : vector<16x2048xf32> to vector<16x128xf32>
    %60 = tpu.concatenate %51, %52, %53, %54, %55, %56, %57, %58, %59 in 0 : vector<16x128xf32>, vector<16x128xf32>, vector<16x128xf32>, vector<16x128xf32>, vector<16x128xf32>, vector<16x128xf32>, vector<16x128xf32>, vector<16x128xf32>, vector<16x128xf32> -> vector<144x128xf32>
    %61 = tpu.concatenate %30, %40, %50, %60 in 1 : vector<144x128xf32>, vector<144x128xf32>, vector<144x128xf32>, vector<144x128xf32> -> vector<144x512xf32>
    %c0_10 = arith.constant 0 : index
    %c0_11 = arith.constant 0 : index
    %62 = vector.load %arg6[%c0_10, %c0_11] : memref<32x144xf32, #tpu.memory_space<vmem>>, vector<32x144xf32>
    %cst_12 = arith.constant dense<0.000000e+00> : vector<32x512xf32>
    %63 = tpu.matmul %62, %61, %cst_12 {dimension_numbers = #tpu.dot_dimension_numbers<[1], [0], [0], [1], [0, 0, 1, 1], [], []>} : vector<32x144xf32>, vector<144x512xf32>, vector<32x512xf32> -> vector<32x512xf32>
    %c0_13 = arith.constant 0 : index
    %c0_14 = arith.constant 0 : index
    %64 = vector.load %arg7[%c0_13, %c0_14] : memref<32x1xf32, #tpu.memory_space<vmem>>, vector<32x1xf32>
    %65 = vector.broadcast %64 : vector<32x1xf32> to vector<32x512xf32>
    %66 = arith.addf %63, %65 : vector<32x512xf32>
    %cst_15 = arith.constant 0.000000e+00 : f32
    %67 = vector.broadcast %cst_15 : f32 to vector<32x512xf32>
    %68 = arith.maximumf %66, %67 : vector<32x512xf32>
    %69 = vector.extract_strided_slice %68 {offsets = [0, 0], sizes = [32, 128], strides = [1, 1]} : vector<32x512xf32> to vector<32x128xf32>
    %70 = vector.extract_strided_slice %68 {offsets = [0, 128], sizes = [32, 128], strides = [1, 1]} : vector<32x512xf32> to vector<32x128xf32>
    %71 = arith.maximumf %69, %70 : vector<32x128xf32>
    %72 = vector.extract_strided_slice %68 {offsets = [0, 256], sizes = [32, 128], strides = [1, 1]} : vector<32x512xf32> to vector<32x128xf32>
    %73 = vector.extract_strided_slice %68 {offsets = [0, 384], sizes = [32, 128], strides = [1, 1]} : vector<32x512xf32> to vector<32x128xf32>
    %74 = arith.maximumf %72, %73 : vector<32x128xf32>
    %75 = arith.maximumf %71, %74 : vector<32x128xf32>
    %76 = vector.extract_strided_slice %75 {offsets = [0, 0], sizes = [1, 25], strides = [1, 1]} : vector<32x128xf32> to vector<1x25xf32>
    %77 = vector.extract_strided_slice %75 {offsets = [1, 0], sizes = [1, 25], strides = [1, 1]} : vector<32x128xf32> to vector<1x25xf32>
    %78 = vector.extract_strided_slice %75 {offsets = [2, 0], sizes = [1, 25], strides = [1, 1]} : vector<32x128xf32> to vector<1x25xf32>
    %79 = vector.extract_strided_slice %75 {offsets = [3, 0], sizes = [1, 25], strides = [1, 1]} : vector<32x128xf32> to vector<1x25xf32>
    %80 = vector.extract_strided_slice %75 {offsets = [4, 0], sizes = [1, 25], strides = [1, 1]} : vector<32x128xf32> to vector<1x25xf32>
    %81 = vector.extract_strided_slice %75 {offsets = [5, 0], sizes = [1, 25], strides = [1, 1]} : vector<32x128xf32> to vector<1x25xf32>
    %82 = vector.extract_strided_slice %75 {offsets = [6, 0], sizes = [1, 25], strides = [1, 1]} : vector<32x128xf32> to vector<1x25xf32>
    %83 = vector.extract_strided_slice %75 {offsets = [7, 0], sizes = [1, 25], strides = [1, 1]} : vector<32x128xf32> to vector<1x25xf32>
    %84 = vector.extract_strided_slice %75 {offsets = [8, 0], sizes = [1, 25], strides = [1, 1]} : vector<32x128xf32> to vector<1x25xf32>
    %85 = vector.extract_strided_slice %75 {offsets = [9, 0], sizes = [1, 25], strides = [1, 1]} : vector<32x128xf32> to vector<1x25xf32>
    %86 = vector.extract_strided_slice %75 {offsets = [10, 0], sizes = [1, 25], strides = [1, 1]} : vector<32x128xf32> to vector<1x25xf32>
    %87 = vector.extract_strided_slice %75 {offsets = [11, 0], sizes = [1, 25], strides = [1, 1]} : vector<32x128xf32> to vector<1x25xf32>
    %88 = vector.extract_strided_slice %75 {offsets = [12, 0], sizes = [1, 25], strides = [1, 1]} : vector<32x128xf32> to vector<1x25xf32>
    %89 = vector.extract_strided_slice %75 {offsets = [13, 0], sizes = [1, 25], strides = [1, 1]} : vector<32x128xf32> to vector<1x25xf32>
    %90 = vector.extract_strided_slice %75 {offsets = [14, 0], sizes = [1, 25], strides = [1, 1]} : vector<32x128xf32> to vector<1x25xf32>
    %91 = vector.extract_strided_slice %75 {offsets = [15, 0], sizes = [1, 25], strides = [1, 1]} : vector<32x128xf32> to vector<1x25xf32>
    %92 = vector.extract_strided_slice %75 {offsets = [16, 0], sizes = [1, 25], strides = [1, 1]} : vector<32x128xf32> to vector<1x25xf32>
    %93 = vector.extract_strided_slice %75 {offsets = [17, 0], sizes = [1, 25], strides = [1, 1]} : vector<32x128xf32> to vector<1x25xf32>
    %94 = vector.extract_strided_slice %75 {offsets = [18, 0], sizes = [1, 25], strides = [1, 1]} : vector<32x128xf32> to vector<1x25xf32>
    %95 = vector.extract_strided_slice %75 {offsets = [19, 0], sizes = [1, 25], strides = [1, 1]} : vector<32x128xf32> to vector<1x25xf32>
    %96 = vector.extract_strided_slice %75 {offsets = [20, 0], sizes = [1, 25], strides = [1, 1]} : vector<32x128xf32> to vector<1x25xf32>
    %97 = vector.extract_strided_slice %75 {offsets = [21, 0], sizes = [1, 25], strides = [1, 1]} : vector<32x128xf32> to vector<1x25xf32>
    %98 = vector.extract_strided_slice %75 {offsets = [22, 0], sizes = [1, 25], strides = [1, 1]} : vector<32x128xf32> to vector<1x25xf32>
    %99 = vector.extract_strided_slice %75 {offsets = [23, 0], sizes = [1, 25], strides = [1, 1]} : vector<32x128xf32> to vector<1x25xf32>
    %100 = vector.extract_strided_slice %75 {offsets = [24, 0], sizes = [1, 25], strides = [1, 1]} : vector<32x128xf32> to vector<1x25xf32>
    %101 = vector.extract_strided_slice %75 {offsets = [25, 0], sizes = [1, 25], strides = [1, 1]} : vector<32x128xf32> to vector<1x25xf32>
    %102 = vector.extract_strided_slice %75 {offsets = [26, 0], sizes = [1, 25], strides = [1, 1]} : vector<32x128xf32> to vector<1x25xf32>
    %103 = vector.extract_strided_slice %75 {offsets = [27, 0], sizes = [1, 25], strides = [1, 1]} : vector<32x128xf32> to vector<1x25xf32>
    %104 = vector.extract_strided_slice %75 {offsets = [28, 0], sizes = [1, 25], strides = [1, 1]} : vector<32x128xf32> to vector<1x25xf32>
    %105 = vector.extract_strided_slice %75 {offsets = [29, 0], sizes = [1, 25], strides = [1, 1]} : vector<32x128xf32> to vector<1x25xf32>
    %106 = vector.extract_strided_slice %75 {offsets = [30, 0], sizes = [1, 25], strides = [1, 1]} : vector<32x128xf32> to vector<1x25xf32>
    %107 = vector.extract_strided_slice %75 {offsets = [31, 0], sizes = [1, 25], strides = [1, 1]} : vector<32x128xf32> to vector<1x25xf32>
    %108 = tpu.concatenate %76, %77, %78, %79, %80, %81, %82, %83, %84, %85, %86, %87, %88, %89, %90, %91 in 1 : vector<1x25xf32>, vector<1x25xf32>, vector<1x25xf32>, vector<1x25xf32>, vector<1x25xf32>, vector<1x25xf32>, vector<1x25xf32>, vector<1x25xf32>, vector<1x25xf32>, vector<1x25xf32>, vector<1x25xf32>, vector<1x25xf32>, vector<1x25xf32>, vector<1x25xf32>, vector<1x25xf32>, vector<1x25xf32> -> vector<1x400xf32>
    %109 = tpu.concatenate %92, %93, %94, %95, %96, %97, %98, %99, %100, %101, %102, %103, %104, %105, %106, %107 in 1 : vector<1x25xf32>, vector<1x25xf32>, vector<1x25xf32>, vector<1x25xf32>, vector<1x25xf32>, vector<1x25xf32>, vector<1x25xf32>, vector<1x25xf32>, vector<1x25xf32>, vector<1x25xf32>, vector<1x25xf32>, vector<1x25xf32>, vector<1x25xf32>, vector<1x25xf32>, vector<1x25xf32>, vector<1x25xf32> -> vector<1x400xf32>
    %110 = tpu.concatenate %108, %109 in 1 : vector<1x400xf32>, vector<1x400xf32> -> vector<1x800xf32>
    %111 = vector.extract_strided_slice %75 {offsets = [0, 25], sizes = [1, 25], strides = [1, 1]} : vector<32x128xf32> to vector<1x25xf32>
    %112 = vector.extract_strided_slice %75 {offsets = [1, 25], sizes = [1, 25], strides = [1, 1]} : vector<32x128xf32> to vector<1x25xf32>
    %113 = vector.extract_strided_slice %75 {offsets = [2, 25], sizes = [1, 25], strides = [1, 1]} : vector<32x128xf32> to vector<1x25xf32>
    %114 = vector.extract_strided_slice %75 {offsets = [3, 25], sizes = [1, 25], strides = [1, 1]} : vector<32x128xf32> to vector<1x25xf32>
    %115 = vector.extract_strided_slice %75 {offsets = [4, 25], sizes = [1, 25], strides = [1, 1]} : vector<32x128xf32> to vector<1x25xf32>
    %116 = vector.extract_strided_slice %75 {offsets = [5, 25], sizes = [1, 25], strides = [1, 1]} : vector<32x128xf32> to vector<1x25xf32>
    %117 = vector.extract_strided_slice %75 {offsets = [6, 25], sizes = [1, 25], strides = [1, 1]} : vector<32x128xf32> to vector<1x25xf32>
    %118 = vector.extract_strided_slice %75 {offsets = [7, 25], sizes = [1, 25], strides = [1, 1]} : vector<32x128xf32> to vector<1x25xf32>
    %119 = vector.extract_strided_slice %75 {offsets = [8, 25], sizes = [1, 25], strides = [1, 1]} : vector<32x128xf32> to vector<1x25xf32>
    %120 = vector.extract_strided_slice %75 {offsets = [9, 25], sizes = [1, 25], strides = [1, 1]} : vector<32x128xf32> to vector<1x25xf32>
    %121 = vector.extract_strided_slice %75 {offsets = [10, 25], sizes = [1, 25], strides = [1, 1]} : vector<32x128xf32> to vector<1x25xf32>
    %122 = vector.extract_strided_slice %75 {offsets = [11, 25], sizes = [1, 25], strides = [1, 1]} : vector<32x128xf32> to vector<1x25xf32>
    %123 = vector.extract_strided_slice %75 {offsets = [12, 25], sizes = [1, 25], strides = [1, 1]} : vector<32x128xf32> to vector<1x25xf32>
    %124 = vector.extract_strided_slice %75 {offsets = [13, 25], sizes = [1, 25], strides = [1, 1]} : vector<32x128xf32> to vector<1x25xf32>
    %125 = vector.extract_strided_slice %75 {offsets = [14, 25], sizes = [1, 25], strides = [1, 1]} : vector<32x128xf32> to vector<1x25xf32>
    %126 = vector.extract_strided_slice %75 {offsets = [15, 25], sizes = [1, 25], strides = [1, 1]} : vector<32x128xf32> to vector<1x25xf32>
    %127 = vector.extract_strided_slice %75 {offsets = [16, 25], sizes = [1, 25], strides = [1, 1]} : vector<32x128xf32> to vector<1x25xf32>
    %128 = vector.extract_strided_slice %75 {offsets = [17, 25], sizes = [1, 25], strides = [1, 1]} : vector<32x128xf32> to vector<1x25xf32>
    %129 = vector.extract_strided_slice %75 {offsets = [18, 25], sizes = [1, 25], strides = [1, 1]} : vector<32x128xf32> to vector<1x25xf32>
    %130 = vector.extract_strided_slice %75 {offsets = [19, 25], sizes = [1, 25], strides = [1, 1]} : vector<32x128xf32> to vector<1x25xf32>
    %131 = vector.extract_strided_slice %75 {offsets = [20, 25], sizes = [1, 25], strides = [1, 1]} : vector<32x128xf32> to vector<1x25xf32>
    %132 = vector.extract_strided_slice %75 {offsets = [21, 25], sizes = [1, 25], strides = [1, 1]} : vector<32x128xf32> to vector<1x25xf32>
    %133 = vector.extract_strided_slice %75 {offsets = [22, 25], sizes = [1, 25], strides = [1, 1]} : vector<32x128xf32> to vector<1x25xf32>
    %134 = vector.extract_strided_slice %75 {offsets = [23, 25], sizes = [1, 25], strides = [1, 1]} : vector<32x128xf32> to vector<1x25xf32>
    %135 = vector.extract_strided_slice %75 {offsets = [24, 25], sizes = [1, 25], strides = [1, 1]} : vector<32x128xf32> to vector<1x25xf32>
    %136 = vector.extract_strided_slice %75 {offsets = [25, 25], sizes = [1, 25], strides = [1, 1]} : vector<32x128xf32> to vector<1x25xf32>
    %137 = vector.extract_strided_slice %75 {offsets = [26, 25], sizes = [1, 25], strides = [1, 1]} : vector<32x128xf32> to vector<1x25xf32>
    %138 = vector.extract_strided_slice %75 {offsets = [27, 25], sizes = [1, 25], strides = [1, 1]} : vector<32x128xf32> to vector<1x25xf32>
    %139 = vector.extract_strided_slice %75 {offsets = [28, 25], sizes = [1, 25], strides = [1, 1]} : vector<32x128xf32> to vector<1x25xf32>
    %140 = vector.extract_strided_slice %75 {offsets = [29, 25], sizes = [1, 25], strides = [1, 1]} : vector<32x128xf32> to vector<1x25xf32>
    %141 = vector.extract_strided_slice %75 {offsets = [30, 25], sizes = [1, 25], strides = [1, 1]} : vector<32x128xf32> to vector<1x25xf32>
    %142 = vector.extract_strided_slice %75 {offsets = [31, 25], sizes = [1, 25], strides = [1, 1]} : vector<32x128xf32> to vector<1x25xf32>
    %143 = tpu.concatenate %111, %112, %113, %114, %115, %116, %117, %118, %119, %120, %121, %122, %123, %124, %125, %126 in 1 : vector<1x25xf32>, vector<1x25xf32>, vector<1x25xf32>, vector<1x25xf32>, vector<1x25xf32>, vector<1x25xf32>, vector<1x25xf32>, vector<1x25xf32>, vector<1x25xf32>, vector<1x25xf32>, vector<1x25xf32>, vector<1x25xf32>, vector<1x25xf32>, vector<1x25xf32>, vector<1x25xf32>, vector<1x25xf32> -> vector<1x400xf32>
    %144 = tpu.concatenate %127, %128, %129, %130, %131, %132, %133, %134, %135, %136, %137, %138, %139, %140, %141, %142 in 1 : vector<1x25xf32>, vector<1x25xf32>, vector<1x25xf32>, vector<1x25xf32>, vector<1x25xf32>, vector<1x25xf32>, vector<1x25xf32>, vector<1x25xf32>, vector<1x25xf32>, vector<1x25xf32>, vector<1x25xf32>, vector<1x25xf32>, vector<1x25xf32>, vector<1x25xf32>, vector<1x25xf32>, vector<1x25xf32> -> vector<1x400xf32>
    %145 = tpu.concatenate %143, %144 in 1 : vector<1x400xf32>, vector<1x400xf32> -> vector<1x800xf32>
    %146 = tpu.concatenate %110, %145 in 0 : vector<1x800xf32>, vector<1x800xf32> -> vector<2x800xf32>
    %c0_16 = arith.constant 0 : index
    %c0_17 = arith.constant 0 : index
    %147 = vector.load %arg8[%c0_16, %c0_17] : memref<800x64xf32, #tpu.memory_space<vmem>>, vector<800x64xf32>
    %cst_18 = arith.constant dense<0.000000e+00> : vector<2x64xf32>
    %148 = tpu.matmul %146, %147, %cst_18 {dimension_numbers = #tpu.dot_dimension_numbers<[1], [0], [0], [1], [0, 0, 1, 1], [], []>} : vector<2x800xf32>, vector<800x64xf32>, vector<2x64xf32> -> vector<2x64xf32>
    %c0_19 = arith.constant 0 : index
    %c0_20 = arith.constant 0 : index
    %149 = vector.load %arg9[%c0_19, %c0_20] : memref<1x64xf32, #tpu.memory_space<vmem>>, vector<1x64xf32>
    %150 = vector.broadcast %149 : vector<1x64xf32> to vector<2x64xf32>
    %151 = arith.addf %148, %150 : vector<2x64xf32>
    %cst_21 = arith.constant 0.000000e+00 : f32
    %152 = vector.broadcast %cst_21 : f32 to vector<2x64xf32>
    %153 = arith.maximumf %151, %152 : vector<2x64xf32>
    %c0_22 = arith.constant 0 : index
    %c0_23 = arith.constant 0 : index
    %154 = vector.load %arg10[%c0_22, %c0_23] : memref<64x32xf32, #tpu.memory_space<vmem>>, vector<64x32xf32>
    %cst_24 = arith.constant dense<0.000000e+00> : vector<2x32xf32>
    %155 = tpu.matmul %153, %154, %cst_24 {dimension_numbers = #tpu.dot_dimension_numbers<[1], [0], [0], [1], [0, 0, 1, 1], [], []>} : vector<2x64xf32>, vector<64x32xf32>, vector<2x32xf32> -> vector<2x32xf32>
    %c0_25 = arith.constant 0 : index
    %c0_26 = arith.constant 0 : index
    %156 = vector.load %arg11[%c0_25, %c0_26] : memref<1x32xf32, #tpu.memory_space<vmem>>, vector<1x32xf32>
    %157 = vector.broadcast %156 : vector<1x32xf32> to vector<2x32xf32>
    %158 = arith.addf %155, %157 : vector<2x32xf32>
    %cst_27 = arith.constant 0.000000e+00 : f32
    %159 = vector.broadcast %cst_27 : f32 to vector<2x32xf32>
    %160 = arith.maximumf %158, %159 : vector<2x32xf32>
    %c0_28 = arith.constant 0 : index
    %c0_29 = arith.constant 0 : index
    %161 = vector.load %arg12[%c0_28, %c0_29] : memref<32x10xf32, #tpu.memory_space<vmem>>, vector<32x10xf32>
    %cst_30 = arith.constant dense<0.000000e+00> : vector<2x10xf32>
    %162 = tpu.matmul %160, %161, %cst_30 {dimension_numbers = #tpu.dot_dimension_numbers<[1], [0], [0], [1], [0, 0, 1, 1], [], []>} : vector<2x32xf32>, vector<32x10xf32>, vector<2x10xf32> -> vector<2x10xf32>
    %c0_31 = arith.constant 0 : index
    %c0_32 = arith.constant 0 : index
    %163 = vector.load %arg13[%c0_31, %c0_32] : memref<1x10xf32, #tpu.memory_space<vmem>>, vector<1x10xf32>
    %164 = vector.broadcast %163 : vector<1x10xf32> to vector<2x10xf32>
    %165 = arith.addf %162, %164 : vector<2x10xf32>
    %c0_33 = arith.constant 0 : index
    %c0_34 = arith.constant 0 : index
    %166 = vector.load %arg14[%c0_33, %c0_34] : memref<2x10xf32, #tpu.memory_space<vmem>>, vector<2x10xf32>
    tpu.vector_store %arg14[%c0_33, %c0_34], %165 {strides = array<i32>} : memref<2x10xf32, #tpu.memory_space<vmem>>, vector<2x10xf32>,
    return
  }
  func.func @transform_0(%arg0: i32) -> (i32, i32) {
    %c0_i32 = arith.constant 0 : i32
    %c0_i32_0 = arith.constant 0 : i32
    %c0_i32_1 = arith.constant 0 : i32
    return %c0_i32, %c0_i32_0 : i32, i32
  }
  func.func @transform_1(%arg0: i32) -> (i32, i32) {
    %c0_i32 = arith.constant 0 : i32
    %c0_i32_0 = arith.constant 0 : i32
    %c0_i32_1 = arith.constant 0 : i32
    return %c0_i32, %c0_i32_0 : i32, i32
  }
  func.func @transform_2(%arg0: i32) -> (i32, i32) {
    %c0_i32 = arith.constant 0 : i32
    %c0_i32_0 = arith.constant 0 : i32
    %c0_i32_1 = arith.constant 0 : i32
    return %c0_i32, %c0_i32_0 : i32, i32
  }
  func.func @transform_3(%arg0: i32) -> (i32, i32) {
    %c0_i32 = arith.constant 0 : i32
    %c0_i32_0 = arith.constant 0 : i32
    %c0_i32_1 = arith.constant 0 : i32
    return %c0_i32, %c0_i32_0 : i32, i32
  }
  func.func @transform_4(%arg0: i32) -> (i32, i32) {
    %c0_i32 = arith.constant 0 : i32
    %c0_i32_0 = arith.constant 0 : i32
    %c0_i32_1 = arith.constant 0 : i32
    return %c0_i32, %c0_i32_0 : i32, i32
  }
  func.func @transform_5(%arg0: i32) -> (i32, i32) {
    %c0_i32 = arith.constant 0 : i32
    %c0_i32_0 = arith.constant 0 : i32
    %c0_i32_1 = arith.constant 0 : i32
    return %c0_i32, %c0_i32_0 : i32, i32
  }
  func.func @transform_6(%arg0: i32) -> (i32, i32) {
    %c0_i32 = arith.constant 0 : i32
    %c0_i32_0 = arith.constant 0 : i32
    %c0_i32_1 = arith.constant 0 : i32
    return %c0_i32, %c0_i32_0 : i32, i32
  }
  func.func @transform_7(%arg0: i32) -> (i32, i32) {
    %c0_i32 = arith.constant 0 : i32
    %c0_i32_0 = arith.constant 0 : i32
    %c0_i32_1 = arith.constant 0 : i32
    return %c0_i32, %c0_i32_0 : i32, i32
  }
  func.func @transform_8(%arg0: i32) -> (i32, i32) {
    %c0_i32 = arith.constant 0 : i32
    %c0_i32_0 = arith.constant 0 : i32
    %c0_i32_1 = arith.constant 0 : i32
    return %c0_i32, %c0_i32_0 : i32, i32
  }
  func.func @transform_9(%arg0: i32) -> (i32, i32) {
    %c0_i32 = arith.constant 0 : i32
    %c0_i32_0 = arith.constant 0 : i32
    %c0_i32_1 = arith.constant 0 : i32
    return %c0_i32, %c0_i32_0 : i32, i32
  }
  func.func @transform_10(%arg0: i32) -> (i32, i32) {
    %c0_i32 = arith.constant 0 : i32
    %c0_i32_0 = arith.constant 0 : i32
    %c0_i32_1 = arith.constant 0 : i32
    return %c0_i32, %c0_i32_0 : i32, i32
  }
  func.func @transform_11(%arg0: i32) -> (i32, i32) {
    %c0_i32 = arith.constant 0 : i32
    %c0_i32_0 = arith.constant 0 : i32
    %c0_i32_1 = arith.constant 0 : i32
    return %c0_i32, %c0_i32_0 : i32, i32
  }
  func.func @transform_12(%arg0: i32) -> (i32, i32) {
    %c0_i32 = arith.constant 0 : i32
    %c0_i32_0 = arith.constant 0 : i32
    %c0_i32_1 = arith.constant 0 : i32
    return %c0_i32, %c0_i32_0 : i32, i32
  }
  func.func @transform_13(%arg0: i32) -> (i32, i32) {
    %c0_i32 = arith.constant 0 : i32
    %c0_i32_0 = arith.constant 0 : i32
    %c0_i32_1 = arith.constant 0 : i32
    return %c0_i32, %c0_i32_0 : i32, i32
  }
}

</mosaic_0001>

<bundles_post_ra>
// kernel: cnn_forward.1
= control target key start
LH: loop header
LB: loop body
LE: loop exit
PB: predicated region body
PF: predicated region fallthrough
CT: control target
= control target key end

     0   :  { %vm194_vm0 = vcmask 1040384   ;;  %vm5301_vm1 = vmmov 1   ;;  %v7520_v11 = vmov 0.0   ;;  %v5303_v16 = vmov 0   ;;  %s7506_s0 = inlined_call_operand.vmem [shape: f32[9,8192], index: 0, kind: input, shape index: {}]   ;;  %s7507_s1 = inlined_call_operand.vmem [shape: f32[16,9], index: 1, kind: input, shape index: {}]   ;;  %s7508_s2 = inlined_call_operand.vmem [shape: f32[16,1], index: 2, kind: input, shape index: {}]   ;;  %s7509_s3 = inlined_call_operand.vmem [shape: f32[16,1], index: 3, kind: input, shape index: {}]   ;;  %s7510_s4 = inlined_call_operand.vmem [shape: f32[16,1], index: 4, kind: input, shape index: {}]   ;;  %s7511_s5 = inlined_call_operand.vmem [shape: f32[32,144], index: 5, kind: input, shape index: {}]   ;;  %s7512_s6 = inlined_call_operand.vmem [shape: f32[32,1], index: 6, kind: input, shape index: {}]   ;;  %s7513_s7 = inlined_call_operand.vmem [shape: f32[800,64], index: 7, kind: input, shape index: {}]   ;;  %s7514_s8 = inlined_call_operand.vmem [shape: f32[1,64], index: 8, kind: input, shape index: {}]   ;;  %s7515_s9 = inlined_call_operand.vmem [shape: f32[64,32], index: 9, kind: input, shape index: {}]   ;;  %s7516_s10 = inlined_call_operand.vmem [shape: f32[1,32], index: 10, kind: input, shape index: {}]   ;;  %s7517_s11 = inlined_call_operand.vmem [shape: f32[32,10], index: 11, kind: input, shape index: {}]   ;;  %s7518_s12 = inlined_call_operand.vmem [shape: f32[1,10], index: 12, kind: input, shape index: {}]   ;;  %s7519_s13 = inlined_call_operand.hbm [shape: f32[2,10], index: 13, kind: output, shape index: {}]  }
   0x1   :  { %v48_v0 = vld [vmem:[%s7506_s0 + $0x8] sm:$0xff]  ;;  %v50_v2 = vld [vmem:[%s7506_s0 + $0x18] sm:$0xff]  ;;  %vm5404_vm2 = vmpackc.low %vm194_vm0, %vm5301_vm1  ;;  %451 = vmatprep.mubr.f32.mxu0 %v7520_v11  ;;  %528 = vmatprep.mubr.f32.mxu1 %v7520_v11  ;;  %vm187_vm3 = vcmask 72704  }
   0x2   :  { %v112_v1 = vld [vmem:[%s7506_s0 + $0x208] sm:$0x1]  ;;  %v114_v5 = vld [vmem:[%s7506_s0 + $0x218] sm:$0x1]  ;;  %v47_v6 = vld [vmem:[%s7506_s0] sm:$0xff]  ;;  %5155 = vset.pattern.permute.xlu0 %v5303_v16  ;;  %5156 = vset.pattern.permute.xlu1 %v5303_v16 }
   0x3   :  { %v4748_v3 = vpack.c.bf16 %v112_v1, %v48_v0  ;;  %v4754_v7 = vpack.c.bf16 %v114_v5, %v50_v2  ;;  %v111_v8 = vld [vmem:[%s7506_s0 + $0x200] sm:$0x1]  ;;  %v49_v9 = vld [vmem:[%s7506_s0 + $0x10] sm:$0xff]  ;;  %v52_v14 = vld [vmem:[%s7506_s0 + $0x28] sm:$0xff] }
   0x4   :  { %v113_v10 = vld [vmem:[%s7506_s0 + $0x210] sm:$0x1]  ;;  %v4751_v12 = vpack.c.bf16 %v111_v8, %v47_v6  ;;  %v116_v15 = vld [vmem:[%s7506_s0 + $0x228] sm:$0x1]  ;;  %v5438_v17 = vld [vmem:[%s7507_s1] sm:$0xff] }
   0x5   :  { %4750 = vmatprep.subr.msk.bf16.mxu0 %vm5404_vm2, %v4748_v3  ;;  %v4757_v13 = vpack.c.bf16 %v113_v10, %v49_v9  ;;  %4756 = vmatprep.subr.msk.bf16.mxu1 %vm5404_vm2, %v4754_v7  ;;  %v4760_v18 = vpack.c.bf16 %v116_v15, %v52_v14  ;;  %v51_v19 = vld [vmem:[%s7506_s0 + $0x20] sm:$0xff]  ;;  %v54_v22 = vld [vmem:[%s7506_s0 + $0x38] sm:$0xff]  ;;  %v53_v24 = vld [vmem:[%s7506_s0 + $0x30] sm:$0xff] }
   0x6   :  { %v115_v20 = vld [vmem:[%s7506_s0 + $0x220] sm:$0x1]  ;;  %4753 = vmatpush1.bf16.msk.msra.mxu0 %vm5404_vm2, %v4751_v12  ;;  %v118_v23 = vld [vmem:[%s7506_s0 + $0x238] sm:$0x1]  ;;  %v117_v26 = vld [vmem:[%s7506_s0 + $0x230] sm:$0x1] }
   0x7   :  { %4759 = vmatpush1.bf16.msk.msra.mxu1 %vm5404_vm2, %v4757_v13  ;;  %v4763_v21 = vpack.c.bf16 %v115_v20, %v51_v19  ;;  %4762 = vmatprep.subr.msk.bf16.mxu0 %vm5404_vm2, %v4760_v18  ;;  %v4766_v25 = vpack.c.bf16 %v118_v23, %v54_v22  ;;  %v56_v27 = vld [vmem:[%s7506_s0 + $0x48] sm:$0xff]  ;;  %v4769_v29 = vpack.c.bf16 %v117_v26, %v53_v24  ;;  %v58_v31 = vld [vmem:[%s7506_s0 + $0x58] sm:$0xff]  ;;  %v55_v34 = vld [vmem:[%s7506_s0 + $0x40] sm:$0xff] }
   0x8   :  { %v120_v28 = vld [vmem:[%s7506_s0 + $0x248] sm:$0x1]  ;;  %v122_v32 = vld [vmem:[%s7506_s0 + $0x258] sm:$0x1]  ;;  %v119_v35 = vld [vmem:[%s7506_s0 + $0x240] sm:$0x1] }
   0x9   :  { %v4772_v30 = vpack.c.bf16 %v120_v28, %v56_v27  ;;  %4443 = vmatmul.mubr.msk.f32.vlgmr.msra.gmra.mrb[0].mxu0 %vm187_vm3, %v5438_v17  ;;  %v5486_v33 = vld [vmem:[%s7507_s1 + $0x8] sm:$0xff]  ;;  %4768 = vmatprep.subr.msk.bf16.mxu1 %vm5404_vm2, %v4766_v25  ;;  %v4778_v36 = vpack.c.bf16 %v122_v32, %v58_v31  ;;  %v57_v37 = vld [vmem:[%s7506_s0 + $0x50] sm:$0xff]  ;;  %v62_v41 = vld [vmem:[%s7506_s0 + $0x78] sm:$0xff]  ;;  %v4775_v43 = vpack.c.bf16 %v119_v35, %v55_v34 }
   0xa   :  { %4447 = vmatmul.mubr.msk.f32.vlgmr.msra.gmra.mrb[0].mxu1 %vm187_vm3, %v5438_v17  ;;  %4765 = vmatpush1.bf16.msk.msra.mxu0 %vm5404_vm2, %v4763_v21  ;;  %v121_v38 = vld [vmem:[%s7506_s0 + $0x250] sm:$0x1]  ;;  %v60_v39 = vld [vmem:[%s7506_s0 + $0x68] sm:$0xff]  ;;  %v126_v42 = vld [vmem:[%s7506_s0 + $0x278] sm:$0x1] }
   0xb   :  { %457 = vmatprep.mubr.f32.mxu0 %v7520_v11  ;;  %534 = vmatprep.mubr.f32.mxu1 %v7520_v11  ;;  %v124_v40 = vld [vmem:[%s7506_s0 + $0x268] sm:$0x1]  ;;  %v4781_v44 = vpack.c.bf16 %v121_v38, %v57_v37  ;;  %v4790_v46 = vpack.c.bf16 %v126_v42, %v62_v41  ;;  %v59_v47 = vld [vmem:[%s7506_s0 + $0x60] sm:$0xff]  ;;  %v61_v49 = vld [vmem:[%s7506_s0 + $0x70] sm:$0xff] }
   0xc   :  { %4771 = vmatpush1.bf16.msk.msra.mxu1 %vm5404_vm2, %v4769_v29  ;;  %4774 = vmatprep.subr.msk.bf16.mxu0 %vm5404_vm2, %v4772_v30  ;;  %v4784_v45 = vpack.c.bf16 %v124_v40, %v60_v39  ;;  %v123_v48 = vld [vmem:[%s7506_s0 + $0x260] sm:$0x1]  ;;  %v125_v50 = vld [vmem:[%s7506_s0 + $0x270] sm:$0x1]  ;;  %v64_v51 = vld [vmem:[%s7506_s0 + $0x88] sm:$0xff] }
   0xd   :  { %4444 = vmatmul.mubr.msk.f32.gmra.mrb[2].mxu0 %vm187_vm3, %v5486_v33  ;;  %4780 = vmatprep.subr.msk.bf16.mxu1 %vm5404_vm2, %v4778_v36  ;;  %v128_v52 = vld [vmem:[%s7506_s0 + $0x288] sm:$0x1]  ;;  %v66_v53 = vld [vmem:[%s7506_s0 + $0x98] sm:$0xff]  ;;  %v4787_v55 = vpack.c.bf16 %v123_v48, %v59_v47  ;;  %v4793_v56 = vpack.c.bf16 %v125_v50, %v61_v49  ;;  %v63_v59 = vld [vmem:[%s7506_s0 + $0x80] sm:$0xff] }
   0xe   :  { %4448 = vmatmul.mubr.msk.f32.gmra.mrb[2].mxu1 %vm187_vm3, %v5486_v33  ;;  %605 = vmatprep.mubr.f32.mxu0 %v7520_v11  ;;  %v130_v54 = vld [vmem:[%s7506_s0 + $0x298] sm:$0x1]  ;;  %v4796_v57 = vpack.c.bf16 %v128_v52, %v64_v51  ;;  %v127_v60 = vld [vmem:[%s7506_s0 + $0x280] sm:$0x1]  ;;  %v65_v61 = vld [vmem:[%s7506_s0 + $0x90] sm:$0xff] }
   0xf   :  { %682 = vmatprep.mubr.f32.mxu1 %v7520_v11  ;;  %v4802_v58 = vpack.c.bf16 %v130_v54, %v66_v53  ;;  %v129_v62 = vld [vmem:[%s7506_s0 + $0x290] sm:$0x1]  ;;  %v68_v63 = vld [vmem:[%s7506_s0 + $0xa8] sm:$0xff]  ;;  %v70_v1 = vld [vmem:[%s7506_s0 + $0xb8] sm:$0xff]  ;;  %v4799_v3 = vpack.c.bf16 %v127_v60, %v63_v59 }
  0x10   :  { %v132_v0 = vld [vmem:[%s7506_s0 + $0x2a8] sm:$0x1]  ;;  %v134_v2 = vld [vmem:[%s7506_s0 + $0x2b8] sm:$0x1]  ;;  %v4805_v5 = vpack.c.bf16 %v129_v62, %v65_v61  ;;  %v67_v8 = vld [vmem:[%s7506_s0 + $0xa0] sm:$0xff] }
  0x11   :  { %4451 = vmatmul.mubr.msk.f32.vlgmr.msra.gmra.mrb[4].mxu0 %vm187_vm3, %v5438_v17  ;;  %v4808_v6 = vpack.c.bf16 %v132_v0, %v68_v63  ;;  %v4814_v7 = vpack.c.bf16 %v134_v2, %v70_v1  ;;  %v131_v9 = vld [vmem:[%s7506_s0 + $0x2a0] sm:$0x1]  ;;  %v69_v10 = vld [vmem:[%s7506_s0 + $0xb0] sm:$0xff]  ;;  %v72_v13 = vld [vmem:[%s7506_s0 + $0xc8] sm:$0xff] }
  0x12   :  { %4455 = vmatmul.mubr.msk.f32.vlgmr.msra.gmra.mrb[4].mxu1 %vm187_vm3, %v5438_v17  ;;  %4777 = vmatpush1.bf16.msk.msra.mxu0 %vm5404_vm2, %v4775_v43  ;;  %v133_v12 = vld [vmem:[%s7506_s0 + $0x2b0] sm:$0x1]  ;;  %v175_v14 = vld [vmem:[%s7508_s2] sm:$0xff]  ;;  %v136_v16 = vld [vmem:[%s7506_s0 + $0x2c8] sm:$0x1]  ;;  %v4811_v20 = vpack.c.bf16 %v131_v9, %v67_v8 }
  0x13   :  { %611 = vmatprep.mubr.f32.mxu0 %v7520_v11  ;;  %688 = vmatprep.mubr.f32.mxu1 %v7520_v11  ;;  %v2979_v15 = vld [vmem:[%s7509_s3] sm:$0xff]  ;;  %v74_v18 = vld [vmem:[%s7506_s0 + $0xd8] sm:$0xff]  ;;  %v4817_v21 = vpack.c.bf16 %v133_v12, %v69_v10  ;;  %v4820_v22 = vpack.c.bf16 %v136_v16, %v72_v13  ;;  %v73_v26 = vld [vmem:[%s7506_s0 + $0xd0] sm:$0xff] }
  0x14   :  { %4783 = vmatpush1.bf16.msk.msra.mxu1 %vm5404_vm2, %v4781_v44  ;;  %4786 = vmatprep.subr.msk.bf16.mxu0 %vm5404_vm2, %v4784_v45  ;;  %v138_v19 = vld [vmem:[%s7506_s0 + $0x2d8] sm:$0x1]  ;;  %v71_v24 = vld [vmem:[%s7506_s0 + $0xc0] sm:$0xff]  ;;  %v137_v27 = vld [vmem:[%s7506_s0 + $0x2d0] sm:$0x1] }
  0x15   :  { %4792 = vmatprep.subr.msk.bf16.mxu1 %vm5404_vm2, %v4790_v46  ;;  %4452 = vmatmul.mubr.msk.f32.gmra.mrb[6].mxu0 %vm187_vm3, %v5486_v33  ;;  %v4826_v23 = vpack.c.bf16 %v138_v19, %v74_v18  ;;  %v135_v25 = vld [vmem:[%s7506_s0 + $0x2c0] sm:$0x1]  ;;  %v76_v28 = vld [vmem:[%s7506_s0 + $0xe8] sm:$0xff]  ;;  %v78_v32 = vld [vmem:[%s7506_s0 + $0xf8] sm:$0xff]  ;;  %v4829_v36 = vpack.c.bf16 %v137_v27, %v73_v26 }
  0x16   :  { %4456 = vmatmul.mubr.msk.f32.gmra.mrb[6].mxu1 %vm187_vm3, %v5486_v33  ;;  %759 = vmatprep.mubr.f32.mxu0 %v7520_v11  ;;  %v176_v29 = vld [vmem:[%s7508_s2 + $0x8] sm:$0xff]  ;;  %v142_v34 = vld [vmem:[%s7506_s0 + $0x2f8] sm:$0x1]  ;;  %v4823_v35 = vpack.c.bf16 %v135_v25, %v71_v24 }
  0x17   :  { %836 = vmatprep.mubr.f32.mxu1 %v7520_v11  ;;  %179 = vperm.xlu0 %5155, %v175_v14   ;;  %v2980_v30 = vld [vmem:[%s7509_s3 + $0x8] sm:$0xff]  ;;  %v4838_v38 = vpack.c.bf16 %v142_v34, %v78_v32 }
  0x18   :  { %2983 = vperm.xlu1 %5156, %v2979_v15   ;;  %v140_v31 = vld [vmem:[%s7506_s0 + $0x2e8] sm:$0x1] }
  0x19   :  { %4459 = vmatmul.mubr.msk.f32.vlgmr.msra.gmra.mrb[8].mxu0 %vm187_vm3, %v5438_v17  ;;  %v4832_v37 = vpack.c.bf16 %v140_v31, %v76_v28 }
  0x1a   :  { %4463 = vmatmul.mubr.msk.f32.vlgmr.msra.gmra.mrb[8].mxu1 %vm187_vm3, %v5438_v17  ;;  %4789 = vmatpush1.bf16.msk.msra.mxu0 %vm5404_vm2, %v4787_v55 }
  0x1b   :  { %765 = vmatprep.mubr.f32.mxu0 %v7520_v11  ;;  %842 = vmatprep.mubr.f32.mxu1 %v7520_v11 }
  0x1c   :  { %4795 = vmatpush1.bf16.msk.msra.mxu1 %vm5404_vm2, %v4793_v56  ;;  %4798 = vmatprep.subr.msk.bf16.mxu0 %vm5404_vm2, %v4796_v57 }
  0x1d   :  { %4804 = vmatprep.subr.msk.bf16.mxu1 %vm5404_vm2, %v4802_v58  ;;  %4460 = vmatmul.mubr.msk.f32.gmra.mrb[10].mxu0 %vm187_vm3, %v5486_v33 }
  0x1e   :  { %4464 = vmatmul.mubr.msk.f32.gmra.mrb[10].mxu1 %vm187_vm3, %v5486_v33  ;;  %913 = vmatprep.mubr.f32.mxu0 %v7520_v11 }
  0x1f   :  { %990 = vmatprep.mubr.f32.mxu1 %v7520_v11  ;;  %184 = vperm.xlu0 %5155, %v176_v29  }
  0x20   :  { %2988 = vperm.xlu1 %5156, %v2980_v30  }
  0x21   :  { %4467 = vmatmul.mubr.msk.f32.vlgmr.msra.gmra.mrb[12].mxu0 %vm187_vm3, %v5438_v17 }
  0x22   :  { %4471 = vmatmul.mubr.msk.f32.vlgmr.msra.gmra.mrb[12].mxu1 %vm187_vm3, %v5438_v17  ;;  %4801 = vmatpush1.bf16.msk.msra.mxu0 %vm5404_vm2, %v4799_v3 }
  0x23   :  { %919 = vmatprep.mubr.f32.mxu0 %v7520_v11  ;;  %996 = vmatprep.mubr.f32.mxu1 %v7520_v11 }
  0x24   :  { %4807 = vmatpush1.bf16.msk.msra.mxu1 %vm5404_vm2, %v4805_v5  ;;  %4810 = vmatprep.subr.msk.bf16.mxu0 %vm5404_vm2, %v4808_v6 }
  0x25   :  { %4816 = vmatprep.subr.msk.bf16.mxu1 %vm5404_vm2, %v4814_v7  ;;  %4468 = vmatmul.mubr.msk.f32.gmra.mrb[14].mxu0 %vm187_vm3, %v5486_v33 }
  0x26   :  { %4472 = vmatmul.mubr.msk.f32.gmra.mrb[14].mxu1 %vm187_vm3, %v5486_v33  ;;  %1067 = vmatprep.mubr.f32.mxu0 %v7520_v11 }
  0x27   :  { %1144 = vmatprep.mubr.f32.mxu1 %v7520_v11 }
  0x29   :  { %4475 = vmatmul.mubr.msk.f32.vlgmr.msra.gmra.mrb[16].mxu0 %vm187_vm3, %v5438_v17 }
  0x2a   :  { %4479 = vmatmul.mubr.msk.f32.vlgmr.msra.gmra.mrb[16].mxu1 %vm187_vm3, %v5438_v17  ;;  %4813 = vmatpush1.bf16.msk.msra.mxu0 %vm5404_vm2, %v4811_v20 }
  0x2b   :  { %1073 = vmatprep.mubr.f32.mxu0 %v7520_v11  ;;  %1150 = vmatprep.mubr.f32.mxu1 %v7520_v11 }
  0x2c   :  { %4819 = vmatpush1.bf16.msk.msra.mxu1 %vm5404_vm2, %v4817_v21  ;;  %4822 = vmatprep.subr.msk.bf16.mxu0 %vm5404_vm2, %v4820_v22 }
  0x2d   :  { %4828 = vmatprep.subr.msk.bf16.mxu1 %vm5404_vm2, %v4826_v23  ;;  %4476 = vmatmul.mubr.msk.f32.gmra.mrb[18].mxu0 %vm187_vm3, %v5486_v33 }
  0x2e   :  { %4480 = vmatmul.mubr.msk.f32.gmra.mrb[18].mxu1 %vm187_vm3, %v5486_v33  ;;  %1221 = vmatprep.mubr.f32.mxu0 %v7520_v11 }
  0x2f   :  { %1298 = vmatprep.mubr.f32.mxu1 %v7520_v11 }
  0x30   :  { %18 = vsyncpa [#allocation3], 0  ;;  %v75_v39 = vld [vmem:[%s7506_s0 + $0xe0] sm:$0xff]  ;;  %v77_v41 = vld [vmem:[%s7506_s0 + $0xf0] sm:$0xff]  ;;  %vm7565_vm4 = vcmask 130048   ;;  %s5305_s24 = smov 25  }
  0x31   :  { %4483 = vmatmul.mubr.msk.f32.vlgmr.msra.gmra.mrb[20].mxu0 %vm187_vm3, %v5438_v17  ;;  %v139_v40 = vld [vmem:[%s7506_s0 + $0x2e0] sm:$0x1]  ;;  %v141_v42 = vld [vmem:[%s7506_s0 + $0x2f0] sm:$0x1]  ;;  %v80_v43 = vld [vmem:[%s7506_s0 + $0x108] sm:$0xff]  ;;  %s5306_s25 = smov 50  }
  0x32   :  { %4487 = vmatmul.mubr.msk.f32.vlgmr.msra.gmra.mrb[20].mxu1 %vm187_vm3, %v5438_v17  ;;  %4825 = vmatpush1.bf16.msk.msra.mxu0 %vm5404_vm2, %v4823_v35  ;;  %v3215_v44 = vld [vmem:[%s7510_s4] sm:$0xff]  ;;  %v3216_v45 = vld [vmem:[%s7510_s4 + $0x8] sm:$0xff]  ;;  %v82_v47 = vld [vmem:[%s7506_s0 + $0x118] sm:$0xff]  ;;  %v4835_v49 = vpack.c.bf16 %v139_v40, %v75_v39  ;;  %v4841_v50 = vpack.c.bf16 %v141_v42, %v77_v41  ;;  %s5307_s26 = smov 100   ;;  %s5308_s27 = smov 125   ;;  %vm3571_vm5 = vcmask 203776  }
  0x33   :  { %1227 = vmatprep.mubr.f32.mxu0 %v7520_v11  ;;  %1304 = vmatprep.mubr.f32.mxu1 %v7520_v11  ;;  %v144_v46 = vld [vmem:[%s7506_s0 + $0x308] sm:$0x1]  ;;  %v146_v48 = vld [vmem:[%s7506_s0 + $0x318] sm:$0x1]  ;;  %v79_v53 = vld [vmem:[%s7506_s0 + $0x100] sm:$0xff]  ;;  %s5309_s28 = smov 75  }
  0x34   :  { %4831 = vmatpush1.bf16.msk.msra.mxu1 %vm5404_vm2, %v4829_v36  ;;  %4834 = vmatprep.subr.msk.bf16.mxu0 %vm5404_vm2, %v4832_v37  ;;  %v4844_v51 = vpack.c.bf16 %v144_v46, %v80_v43  ;;  %v4850_v52 = vpack.c.bf16 %v146_v48, %v82_v47  ;;  %v143_v54 = vld [vmem:[%s7506_s0 + $0x300] sm:$0x1]  ;;  %v81_v55 = vld [vmem:[%s7506_s0 + $0x110] sm:$0xff]  ;;  %v84_v57 = vld [vmem:[%s7506_s0 + $0x128] sm:$0xff]  ;;  %s5310_s29 = smov 22   ;;  %s5311_s30 = smov 97  }
  0x35   :  { %4840 = vmatprep.subr.msk.bf16.mxu1 %vm5404_vm2, %v4838_v38  ;;  %4484 = vmatmul.mubr.msk.f32.gmra.mrb[22].mxu0 %vm187_vm3, %v5486_v33  ;;  %v145_v56 = vld [vmem:[%s7506_s0 + $0x310] sm:$0x1]  ;;  %v3270_v59 = vld [vmem:[%s7512_s6 + $0x18] sm:$0xff]  ;;  %v148_v60 = vld [vmem:[%s7506_s0 + $0x328] sm:$0x1]  ;;  %v4847_v63 = vpack.c.bf16 %v143_v54, %v79_v53  ;;  %s5314_s14 = smov 122  }
  0x36   :  { %4488 = vmatmul.mubr.msk.f32.gmra.mrb[22].mxu1 %vm187_vm3, %v5486_v33  ;;  %1375 = vmatprep.mubr.f32.mxu0 %v7520_v11  ;;  %v3269_v58 = vld [vmem:[%s7512_s6 + $0x10] sm:$0xff]  ;;  %v86_v61 = vld [vmem:[%s7506_s0 + $0x138] sm:$0xff]  ;;  %v4853_v0 = vpack.c.bf16 %v145_v56, %v81_v55  ;;  %v4856_v1 = vpack.c.bf16 %v148_v60, %v84_v57  ;;  %v83_v3 = vld [vmem:[%s7506_s0 + $0x120] sm:$0xff]  ;;  %s5315_s16 = smov 44   ;;  %s5316_s15 = smov 72   ;;  %vm3573_vm6 = vcmask 408576  }
  0x37   :  { %1452 = vmatprep.mubr.f32.mxu1 %v7520_v11  ;;  %3219 = vperm.xlu0 %5155, %v3215_v44   ;;  %v150_v62 = vld [vmem:[%s7506_s0 + $0x338] sm:$0x1]  ;;  %v147_v5 = vld [vmem:[%s7506_s0 + $0x320] sm:$0x1]  ;;  %v85_v6 = vld [vmem:[%s7506_s0 + $0x130] sm:$0xff]  ;;  %s5317_s21 = smov 69  }
  0x38   :  { %3224 = vperm.xlu1 %5156, %v3216_v45   ;;  %v4862_v2 = vpack.c.bf16 %v150_v62, %v86_v61  ;;  %v149_v7 = vld [vmem:[%s7506_s0 + $0x330] sm:$0x1]  ;;  %v88_v8 = vld [vmem:[%s7506_s0 + $0x148] sm:$0xff]  ;;  %v3267_v9 = vld [vmem:[%s7512_s6] sm:$0xff]  ;;  %v4859_v15 = vpack.c.bf16 %v147_v5, %v83_v3  ;;  %s5318_s2 = smov 94   ;;  %s5319_s17 = smov 119  }
  0x39   :  { %4491 = vmatmul.mubr.msk.f32.vlgmr.msra.gmra.mrb[24].mxu0 %vm187_vm3, %v5438_v17  ;;  %v3268_v10 = vld [vmem:[%s7512_s6 + $0x8] sm:$0xff]  ;;  %v90_v13 = vld [vmem:[%s7506_s0 + $0x158] sm:$0xff]  ;;  %v4865_v16 = vpack.c.bf16 %v149_v7, %v85_v6  ;;  %v87_v20 = vld [vmem:[%s7506_s0 + $0x140] sm:$0xff]  ;;  %s5313_s6 = smov 19   ;;  %vm3575_vm7 = vcmask 613376   ;;  %vm3577_vm8 = vcmask 818176  }
  0x3a   :  { %4495 = vmatmul.mubr.msk.f32.vlgmr.msra.gmra.mrb[24].mxu1 %vm187_vm3, %v5438_v17  ;;  %4837 = vmatpush1.bf16.msk.msra.mxu0 %vm5404_vm2, %v4835_v49  ;;  %v152_v12 = vld [vmem:[%s7506_s0 + $0x348] sm:$0x1]  ;;  %v154_v14 = vld [vmem:[%s7506_s0 + $0x358] sm:$0x1]  ;;  %v151_v21 = vld [vmem:[%s7506_s0 + $0x340] sm:$0x1] }
  0x3b   :  { %1381 = vmatprep.mubr.f32.mxu0 %v7520_v11  ;;  %1458 = vmatprep.mubr.f32.mxu1 %v7520_v11  ;;  %v4868_v18 = vpack.c.bf16 %v152_v12, %v88_v8  ;;  %v4874_v19 = vpack.c.bf16 %v154_v14, %v90_v13  ;;  %v89_v22 = vld [vmem:[%s7506_s0 + $0x150] sm:$0xff]  ;;  %v92_v24 = vld [vmem:[%s7506_s0 + $0x168] sm:$0xff]  ;;  %v94_v26 = vld [vmem:[%s7506_s0 + $0x178] sm:$0xff]  ;;  %v4871_v28 = vpack.c.bf16 %v151_v21, %v87_v20  ;;  %vm3579_vm9 = vcmask 1022976  }
  0x3c   :  { %4843 = vmatpush1.bf16.msk.msra.mxu1 %vm5404_vm2, %v4841_v50  ;;  %4846 = vmatprep.subr.msk.bf16.mxu0 %vm5404_vm2, %v4844_v51  ;;  %v153_v23 = vld [vmem:[%s7506_s0 + $0x350] sm:$0x1]  ;;  %v156_v25 = vld [vmem:[%s7506_s0 + $0x368] sm:$0x1]  ;;  %v158_v27 = vld [vmem:[%s7506_s0 + $0x378] sm:$0x1] }
  0x3d   :  { %4852 = vmatprep.subr.msk.bf16.mxu1 %vm5404_vm2, %v4850_v52  ;;  %4492 = vmatmul.mubr.msk.f32.gmra.mrb[26].mxu0 %vm187_vm3, %v5486_v33  ;;  %v4877_v29 = vpack.c.bf16 %v153_v23, %v89_v22  ;;  %v4880_v30 = vpack.c.bf16 %v156_v25, %v92_v24  ;;  %v4886_v31 = vpack.c.bf16 %v158_v27, %v94_v26  ;;  %v91_v32 = vld [vmem:[%s7506_s0 + $0x160] sm:$0xff]  ;;  %v93_v35 = vld [vmem:[%s7506_s0 + $0x170] sm:$0xff]  ;;  %v96_v37 = vld [vmem:[%s7506_s0 + $0x188] sm:$0xff]  ;;  %vm3591_vm10 = vcmask 154624  }
  0x3e   :  { %4496 = vmatmul.mubr.msk.f32.gmra.mrb[26].mxu1 %vm187_vm3, %v5486_v33  ;;  %1529 = vmatprep.mubr.f32.mxu0 %v7520_v11  ;;  %v155_v34 = vld [vmem:[%s7506_s0 + $0x360] sm:$0x1]  ;;  %v157_v36 = vld [vmem:[%s7506_s0 + $0x370] sm:$0x1]  ;;  %v160_v38 = vld [vmem:[%s7506_s0 + $0x388] sm:$0x1] }
  0x3f   :  { %1606 = vmatprep.mubr.f32.mxu1 %v7520_v11  ;;  %3283 = vperm.xlu0 %5155, %v3269_v58   ;;  %v98_v39 = vld [vmem:[%s7506_s0 + $0x198] sm:$0xff]  ;;  %v4883_v41 = vpack.c.bf16 %v155_v34, %v91_v32  ;;  %v4889_v42 = vpack.c.bf16 %v157_v36, %v93_v35  ;;  %v4892_v43 = vpack.c.bf16 %v160_v38, %v96_v37  ;;  %v95_v45 = vld [vmem:[%s7506_s0 + $0x180] sm:$0xff]  ;;  %v97_v47 = vld [vmem:[%s7506_s0 + $0x190] sm:$0xff]  ;;  %vm3581_vm11 = vcmask 179200  }
  0x40   :  { %3288 = vperm.xlu1 %5156, %v3270_v59   ;;  %v162_v40 = vld [vmem:[%s7506_s0 + $0x398] sm:$0x1]  ;;  %v159_v46 = vld [vmem:[%s7506_s0 + $0x380] sm:$0x1]  ;;  %v161_v48 = vld [vmem:[%s7506_s0 + $0x390] sm:$0x1] }
  0x41   :  { %4499 = vmatmul.mubr.msk.f32.vlgmr.msra.gmra.mrb[28].mxu0 %vm187_vm3, %v5438_v17  ;;  %v4898_v44 = vpack.c.bf16 %v162_v40, %v98_v39  ;;  %v100_v49 = vld [vmem:[%s7506_s0 + $0x1a8] sm:$0xff]  ;;  %v102_v51 = vld [vmem:[%s7506_s0 + $0x1b8] sm:$0xff]  ;;  %v4895_v53 = vpack.c.bf16 %v159_v46, %v95_v45  ;;  %v4901_v54 = vpack.c.bf16 %v161_v48, %v97_v47  ;;  %v99_v57 = vld [vmem:[%s7506_s0 + $0x1a0] sm:$0xff]  ;;  %vm3583_vm12 = vcmask 384000  }
  0x42   :  { %4503 = vmatmul.mubr.msk.f32.vlgmr.msra.gmra.mrb[28].mxu1 %vm187_vm3, %v5438_v17  ;;  %4849 = vmatpush1.bf16.msk.msra.mxu0 %vm5404_vm2, %v4847_v63  ;;  %v164_v50 = vld [vmem:[%s7506_s0 + $0x3a8] sm:$0x1]  ;;  %v166_v52 = vld [vmem:[%s7506_s0 + $0x3b8] sm:$0x1]  ;;  %v163_v58 = vld [vmem:[%s7506_s0 + $0x3a0] sm:$0x1] }
  0x43   :  { %1535 = vmatprep.mubr.f32.mxu0 %v7520_v11  ;;  %1612 = vmatprep.mubr.f32.mxu1 %v7520_v11  ;;  %v4904_v55 = vpack.c.bf16 %v164_v50, %v100_v49  ;;  %v4910_v56 = vpack.c.bf16 %v166_v52, %v102_v51  ;;  %v101_v59 = vld [vmem:[%s7506_s0 + $0x1b0] sm:$0xff]  ;;  %v104_v61 = vld [vmem:[%s7506_s0 + $0x1c8] sm:$0xff]  ;;  %v106_v63 = vld [vmem:[%s7506_s0 + $0x1d8] sm:$0xff]  ;;  %vm3585_vm13 = vcmask 588800   ;;  %vm3593_vm14 = vcmask 359424  }
  0x44   :  { %4855 = vmatpush1.bf16.msk.msra.mxu1 %vm5404_vm2, %v4853_v0  ;;  %4858 = vmatprep.subr.msk.bf16.mxu0 %vm5404_vm2, %v4856_v1  ;;  %v165_v60 = vld [vmem:[%s7506_s0 + $0x3b0] sm:$0x1]  ;;  %v168_v62 = vld [vmem:[%s7506_s0 + $0x3c8] sm:$0x1]  ;;  %v170_v0 = vld [vmem:[%s7506_s0 + $0x3d8] sm:$0x1]  ;;  %v4907_v1 = vpack.c.bf16 %v163_v58, %v99_v57 }
  0x45   :  { %4864 = vmatprep.subr.msk.bf16.mxu1 %vm5404_vm2, %v4862_v2  ;;  %4500 = vmatmul.mubr.msk.f32.gmra.mrb[30].mxu0 %vm187_vm3, %v5486_v33  ;;  %v4913_v2 = vpack.c.bf16 %v165_v60, %v101_v59  ;;  %v4916_v3 = vpack.c.bf16 %v168_v62, %v104_v61  ;;  %v4922_v5 = vpack.c.bf16 %v170_v0, %v106_v63  ;;  %v103_v6 = vld [vmem:[%s7506_s0 + $0x1c0] sm:$0xff]  ;;  %v105_v8 = vld [vmem:[%s7506_s0 + $0x1d0] sm:$0xff]  ;;  %v172_v12 = vld [vmem:[%s7506_s0 + $0x3e8] sm:$0x1]  ;;  %vm3595_vm15 = vcmask 564224  }
  0x46   :  { %4504 = vmatmul.mubr.msk.f32.gmra.mrb[30].mxu1 %vm187_vm3, %v5486_v33  ;;  %1683 = vmatprep.mubr.f32.mxu0 %v7520_v11  ;;  %v167_v7 = vld [vmem:[%s7506_s0 + $0x3c0] sm:$0x1]  ;;  %v110_v13 = vld [vmem:[%s7506_s0 + $0x1f8] sm:$0xff]  ;;  %v109_v22 = vld [vmem:[%s7506_s0 + $0x1f0] sm:$0xff]  ;;  %vm3597_vm1 = vcmask 769024  }
  0x47   :  { %1760 = vmatprep.mubr.f32.mxu1 %v7520_v11  ;;  %3273 = vperm.xlu0 %5155, %v3267_v9   ;;  %v169_v9 = vld [vmem:[%s7506_s0 + $0x3d0] sm:$0x1]  ;;  %v174_v14 = vld [vmem:[%s7506_s0 + $0x3f8] sm:$0x1]  ;;  %v107_v20 = vld [vmem:[%s7506_s0 + $0x1e0] sm:$0xff] }
  0x48   :  { %3278 = vperm.xlu1 %5156, %v3268_v10   ;;  %v108_v10 = vld [vmem:[%s7506_s0 + $0x1e8] sm:$0xff]  ;;  %v171_v21 = vld [vmem:[%s7506_s0 + $0x3e0] sm:$0x1]  ;;  %v173_v23 = vld [vmem:[%s7506_s0 + $0x3f0] sm:$0x1]  ;;  %s5312_s0 = smov 47  }
  0x49   :  { %4507 = vmatmul.mubr.msk.f32.vlgmr.msra.gmra.mrb[32].mxu0 %vm187_vm3, %v5438_v17  ;;  %v4931_v24 = vpack.c.bf16 %v171_v21, %v107_v20  ;;  %v4937_v25 = vpack.c.bf16 %v173_v23, %v109_v22 }
  0x4a   :  { %4511 = vmatmul.mubr.msk.f32.vlgmr.msra.gmra.mrb[32].mxu1 %vm187_vm3, %v5438_v17  ;;  %4861 = vmatpush1.bf16.msk.msra.mxu0 %vm5404_vm2, %v4859_v15  ;;  %v4919_v15 = vpack.c.bf16 %v167_v7, %v103_v6 }
  0x4b   :  { %1689 = vmatprep.mubr.f32.mxu0 %v7520_v11  ;;  %1766 = vmatprep.mubr.f32.mxu1 %v7520_v11 }
  0x4c   :  { %4867 = vmatpush1.bf16.msk.msra.mxu1 %vm5404_vm2, %v4865_v16  ;;  %4870 = vmatprep.subr.msk.bf16.mxu0 %vm5404_vm2, %v4868_v18  ;;  %v4925_v16 = vpack.c.bf16 %v169_v9, %v105_v8  ;;  %v4928_v18 = vpack.c.bf16 %v172_v12, %v108_v10 }
  0x4d   :  { %4876 = vmatprep.subr.msk.bf16.mxu1 %vm5404_vm2, %v4874_v19  ;;  %4508 = vmatmul.mubr.msk.f32.gmra.mrb[34].mxu0 %vm187_vm3, %v5486_v33  ;;  %v4934_v19 = vpack.c.bf16 %v174_v14, %v110_v13 }
  0x4e   :  { %4512 = vmatmul.mubr.msk.f32.gmra.mrb[34].mxu1 %vm187_vm3, %v5486_v33  ;;  %1837 = vmatprep.mubr.f32.mxu0 %v7520_v11 }
  0x4f   :  { %1914 = vmatprep.mubr.f32.mxu1 %v7520_v11 }
  0x51   :  { %4515 = vmatmul.mubr.msk.f32.vlgmr.msra.gmra.mrb[36].mxu0 %vm187_vm3, %v5438_v17 }
  0x52   :  { %4519 = vmatmul.mubr.msk.f32.vlgmr.msra.gmra.mrb[36].mxu1 %vm187_vm3, %v5438_v17  ;;  %4873 = vmatpush1.bf16.msk.msra.mxu0 %vm5404_vm2, %v4871_v28 }
  0x53   :  { %1843 = vmatprep.mubr.f32.mxu0 %v7520_v11  ;;  %1920 = vmatprep.mubr.f32.mxu1 %v7520_v11 }
  0x54   :  { %4879 = vmatpush1.bf16.msk.msra.mxu1 %vm5404_vm2, %v4877_v29  ;;  %4882 = vmatprep.subr.msk.bf16.mxu0 %vm5404_vm2, %v4880_v30 }
  0x55   :  { %4888 = vmatprep.subr.msk.bf16.mxu1 %vm5404_vm2, %v4886_v31  ;;  %4516 = vmatmul.mubr.msk.f32.gmra.mrb[38].mxu0 %vm187_vm3, %v5486_v33 }
  0x56   :  { %4520 = vmatmul.mubr.msk.f32.gmra.mrb[38].mxu1 %vm187_vm3, %v5486_v33  ;;  %1991 = vmatprep.mubr.f32.mxu0 %v7520_v11 }
  0x57   :  { %2068 = vmatprep.mubr.f32.mxu1 %v7520_v11 }
  0x59   :  { %4523 = vmatmul.mubr.msk.f32.vlgmr.msra.gmra.mrb[40].mxu0 %vm187_vm3, %v5438_v17 }
  0x5a   :  { %4527 = vmatmul.mubr.msk.f32.vlgmr.msra.gmra.mrb[40].mxu1 %vm187_vm3, %v5438_v17  ;;  %4885 = vmatpush1.bf16.msk.msra.mxu0 %vm5404_vm2, %v4883_v41 }
  0x5b   :  { %1997 = vmatprep.mubr.f32.mxu0 %v7520_v11  ;;  %2074 = vmatprep.mubr.f32.mxu1 %v7520_v11 }
  0x5c   :  { %4891 = vmatpush1.bf16.msk.msra.mxu1 %vm5404_vm2, %v4889_v42  ;;  %4894 = vmatprep.subr.msk.bf16.mxu0 %vm5404_vm2, %v4892_v43 }
  0x5d   :  { %4900 = vmatprep.subr.msk.bf16.mxu1 %vm5404_vm2, %v4898_v44  ;;  %4524 = vmatmul.mubr.msk.f32.gmra.mrb[42].mxu0 %vm187_vm3, %v5486_v33 }
  0x5e   :  { %4528 = vmatmul.mubr.msk.f32.gmra.mrb[42].mxu1 %vm187_vm3, %v5486_v33  ;;  %2145 = vmatprep.mubr.f32.mxu0 %v7520_v11 }
  0x5f   :  { %2222 = vmatprep.mubr.f32.mxu1 %v7520_v11 }
  0x61   :  { %4531 = vmatmul.mubr.msk.f32.vlgmr.msra.gmra.mrb[44].mxu0 %vm187_vm3, %v5438_v17 }
  0x62   :  { %4535 = vmatmul.mubr.msk.f32.vlgmr.msra.gmra.mrb[44].mxu1 %vm187_vm3, %v5438_v17  ;;  %4897 = vmatpush1.bf16.msk.msra.mxu0 %vm5404_vm2, %v4895_v53 }
  0x63   :  { %2151 = vmatprep.mubr.f32.mxu0 %v7520_v11  ;;  %2228 = vmatprep.mubr.f32.mxu1 %v7520_v11 }
  0x64   :  { %4903 = vmatpush1.bf16.msk.msra.mxu1 %vm5404_vm2, %v4901_v54  ;;  %4906 = vmatprep.subr.msk.bf16.mxu0 %vm5404_vm2, %v4904_v55 }
  0x65   :  { %4912 = vmatprep.subr.msk.bf16.mxu1 %vm5404_vm2, %v4910_v56  ;;  %4532 = vmatmul.mubr.msk.f32.gmra.mrb[46].mxu0 %vm187_vm3, %v5486_v33 }
  0x66   :  { %4536 = vmatmul.mubr.msk.f32.gmra.mrb[46].mxu1 %vm187_vm3, %v5486_v33  ;;  %2299 = vmatprep.mubr.f32.mxu0 %v7520_v11 }
  0x67   :  { %2376 = vmatprep.mubr.f32.mxu1 %v7520_v11 }
  0x69   :  { %4539 = vmatmul.mubr.msk.f32.vlgmr.msra.gmra.mrb[48].mxu0 %vm187_vm3, %v5438_v17 }
  0x6a   :  { %4543 = vmatmul.mubr.msk.f32.vlgmr.msra.gmra.mrb[48].mxu1 %vm187_vm3, %v5438_v17  ;;  %4909 = vmatpush1.bf16.msk.msra.mxu0 %vm5404_vm2, %v4907_v1 }
  0x6b   :  { %2305 = vmatprep.mubr.f32.mxu0 %v7520_v11  ;;  %2382 = vmatprep.mubr.f32.mxu1 %v7520_v11 }
  0x6c   :  { %4915 = vmatpush1.bf16.msk.msra.mxu1 %vm5404_vm2, %v4913_v2  ;;  %4918 = vmatprep.subr.msk.bf16.mxu0 %vm5404_vm2, %v4916_v3 }
  0x6d   :  { %4924 = vmatprep.subr.msk.bf16.mxu1 %vm5404_vm2, %v4922_v5  ;;  %4540 = vmatmul.mubr.msk.f32.gmra.mrb[50].mxu0 %vm187_vm3, %v5486_v33 }
  0x6e   :  { %4544 = vmatmul.mubr.msk.f32.gmra.mrb[50].mxu1 %vm187_vm3, %v5486_v33  ;;  %2453 = vmatprep.mubr.f32.mxu0 %v7520_v11 }
  0x6f   :  { %2530 = vmatprep.mubr.f32.mxu1 %v7520_v11 }
  0x71   :  { %4547 = vmatmul.mubr.msk.f32.vlgmr.msra.gmra.mrb[52].mxu0 %vm187_vm3, %v5438_v17 }
  0x72   :  { %4551 = vmatmul.mubr.msk.f32.vlgmr.msra.gmra.mrb[52].mxu1 %vm187_vm3, %v5438_v17  ;;  %2459 = vmatprep.mubr.f32.mxu0 %v7520_v11 }
  0x73   :  { %2536 = vmatprep.mubr.f32.mxu1 %v7520_v11  ;;  %4921 = vmatpush1.bf16.msk.msra.mxu0 %vm5404_vm2, %v4919_v15 }
  0x74   :  { %4927 = vmatpush1.bf16.msk.msra.mxu1 %vm5404_vm2, %v4925_v16  ;;  %4930 = vmatprep.subr.msk.bf16.mxu0 %vm5404_vm2, %v4928_v18 }
  0x75   :  { %4936 = vmatprep.subr.msk.bf16.mxu1 %vm5404_vm2, %v4934_v19  ;;  %4548 = vmatmul.mubr.msk.f32.gmra.mrb[54].mxu0 %vm187_vm3, %v5486_v33 }
  0x76   :  { %4552 = vmatmul.mubr.msk.f32.gmra.mrb[54].mxu1 %vm187_vm3, %v5486_v33  ;;  %2607 = vmatprep.mubr.f32.mxu0 %v7520_v11 }
  0x77   :  { %2684 = vmatprep.mubr.f32.mxu1 %v7520_v11 }
  0x79   :  { %4555 = vmatmul.mubr.msk.f32.vlgmr.msra.gmra.mrb[56].mxu0 %vm187_vm3, %v5438_v17 }
  0x7a   :  { %4559 = vmatmul.mubr.msk.f32.vlgmr.msra.gmra.mrb[56].mxu1 %vm187_vm3, %v5438_v17  ;;  %2613 = vmatprep.mubr.f32.mxu0 %v7520_v11 }
  0x7b   :  { %2690 = vmatprep.mubr.f32.mxu1 %v7520_v11  ;;  %4933 = vmatpush1.bf16.msk.msra.mxu0 %vm5404_vm2, %v4931_v24 }
  0x7c   :  { %4939 = vmatpush1.bf16.msk.msra.mxu1 %vm5404_vm2, %v4937_v25  ;;  %vm3587_vm2 = vcmask 793600  }
  0x7d   :  { %4556 = vmatmul.mubr.msk.f32.gmra.mrb[58].mxu0 %vm187_vm3, %v5486_v33 }
  0x7e   :  { %4560 = vmatmul.mubr.msk.f32.gmra.mrb[58].mxu1 %vm187_vm3, %v5486_v33  ;;  %2761 = vmatprep.mubr.f32.mxu0 %v7520_v11 }
  0x7f   :  { %2838 = vmatprep.mubr.f32.mxu1 %v7520_v11 }
  0x81   :  { %4563 = vmatmul.mubr.msk.f32.vlgmr.msra.gmra.mrb[60].mxu0 %vm187_vm3, %v5438_v17 }
  0x82   :  { %4567 = vmatmul.mubr.msk.f32.vlgmr.msra.gmra.mrb[60].mxu1 %vm187_vm3, %v5438_v17  ;;  %2767 = vmatprep.mubr.f32.mxu0 %v7520_v11 }
  0x83   :  { %2844 = vmatprep.mubr.f32.mxu1 %v7520_v11 }
  0x85   :  { %4564 = vmatmul.mubr.msk.f32.gmra.mrb[62].mxu0 %vm187_vm3, %v5486_v33 }
  0x86   :  { %4568 = vmatmul.mubr.msk.f32.gmra.mrb[62].mxu1 %vm187_vm3, %v5486_v33  ;;  %vm3599_vm3 = vcmask 973824  }
  0x96   :  { %v6143_v4 = vpop.permute.xlu0 %179 }
  0x97   :  { %v6145_v34 = vpop.permute.xlu1 %2983 }
  0x9e   :  { %v6147_v35 = vpop.permute.xlu0 %184 }
  0x9f   :  { %v6161_v59 = vpop.permute.xlu1 %2988 }
  0xdc   :  { %v453_v26 = vpop.f32.mrb[0].mxu0 }
  0xdd   :  { %v530_v27 = vpop.f32.mrb[0].mxu1  ;;  %v455_v28 = vpop.f32.mrb[1].mxu0  ;;  %v454_v40 = vadd.f32 %v453_v26, %v6143_v4 }
  0xde   :  { %v532_v29 = vpop.f32.mrb[1].mxu1  ;;  %v531_v38 = vadd.f32 %v530_v27, %v6143_v4  ;;  %v456_v41 = vadd.f32 %v455_v28, %v6143_v4 }
  0xdf   :  { %v533_v42 = vadd.f32 %v532_v29, %v6143_v4  ;;  %v2851_v54 = vmax.f32 %v454_v40, 0.0 }
  0xe0   :  { %v459_v30 = vpop.f32.mrb[2].mxu0  ;;  %v2853_v49 = vmax.f32 %v531_v38, 0.0  ;;  %v2852_v55 = vmax.f32 %v456_v41, 0.0 }
  0xe1   :  { %v536_v31 = vpop.f32.mrb[2].mxu1  ;;  %v461_v32 = vpop.f32.mrb[3].mxu0  ;;  %v460_v44 = vadd.f32 %v459_v30, %v6147_v35  ;;  %v2854_v56 = vmax.f32 %v533_v42, 0.0  ;;  %v6167_v8 = vmul.f32 %v6145_v34, %v2851_v54 }
  0xe2   :  { %v538_v17 = vpop.f32.mrb[3].mxu1  ;;  %v537_v43 = vadd.f32 %v536_v31, %v6147_v35  ;;  %v462_v45 = vadd.f32 %v461_v32, %v6147_v35  ;;  %v6164_v2 = vmul.f32 %v6145_v34, %v2853_v49  ;;  %v6173_v13 = vmul.f32 %v6145_v34, %v2852_v55 }
  0xe3   :  { %v539_v46 = vadd.f32 %v538_v17, %v6147_v35  ;;  %v2915_v61 = vmax.f32 %v460_v44, 0.0  ;;  %v6170_v9 = vmul.f32 %v6145_v34, %v2854_v56 }
  0xe4   :  { %v607_v36 = vpop.f32.mrb[4].mxu0  ;;  %v2917_v60 = vmax.f32 %v537_v43, 0.0  ;;  %v2916_v62 = vmax.f32 %v462_v45, 0.0 }
  0xe5   :  { %v684_v37 = vpop.f32.mrb[4].mxu1  ;;  %v609_v39 = vpop.f32.mrb[5].mxu0  ;;  %v608_v50 = vadd.f32 %v607_v36, %v6143_v4  ;;  %v2918_v63 = vmax.f32 %v539_v46, 0.0  ;;  %v6181_v18 = vmul.f32 %v6161_v59, %v2915_v61 }
  0xe6   :  { %v686_v33 = vpop.f32.mrb[5].mxu1  ;;  %v685_v52 = vadd.f32 %v684_v37, %v6143_v4  ;;  %v610_v57 = vadd.f32 %v609_v39, %v6143_v4  ;;  %v6176_v14 = vmul.f32 %v6161_v59, %v2917_v60  ;;  %v6189_v24 = vmul.f32 %v6161_v59, %v2916_v62 }
  0xe7   :  { %v687_v58 = vadd.f32 %v686_v33, %v6143_v4  ;;  %v2855_v3 = vmax.f32 %v608_v50, 0.0  ;;  %v6184_v19 = vmul.f32 %v6161_v59, %v2918_v63 }
  0xe8   :  { %v613_v47 = vpop.f32.mrb[6].mxu0  ;;  %v2857_v5 = vmax.f32 %v685_v52, 0.0  ;;  %v2856_v10 = vmax.f32 %v610_v57, 0.0 }
  0xe9   :  { %v690_v48 = vpop.f32.mrb[6].mxu1  ;;  %v615_v51 = vpop.f32.mrb[7].mxu0  ;;  %v2858_v12 = vmax.f32 %v687_v58, 0.0  ;;  %v614_v15 = vadd.f32 %v613_v47, %v6147_v35  ;;  %v6192_v25 = vmul.f32 %v6145_v34, %v2855_v3 }
  0xea   :  { %v692_v53 = vpop.f32.mrb[7].mxu1  ;;  %v691_v16 = vadd.f32 %v690_v48, %v6147_v35  ;;  %v616_v20 = vadd.f32 %v615_v51, %v6147_v35  ;;  %v6195_v26 = vmul.f32 %v6145_v34, %v2857_v5  ;;  %v6200_v31 = vmul.f32 %v6145_v34, %v2856_v10 }
  0xeb   :  { %v693_v21 = vadd.f32 %v692_v53, %v6147_v35  ;;  %v6203_v32 = vmul.f32 %v6145_v34, %v2858_v12  ;;  %v2919_v37 = vmax.f32 %v614_v15, 0.0 }
  0xec   :  { %v761_v0 = vpop.f32.mrb[8].mxu0  ;;  %v2921_v38 = vmax.f32 %v691_v16, 0.0  ;;  %v2920_v40 = vmax.f32 %v616_v20, 0.0 }
  0xed   :  { %v838_v1 = vpop.f32.mrb[8].mxu1  ;;  %v763_v6 = vpop.f32.mrb[9].mxu0  ;;  %v762_v27 = vadd.f32 %v761_v0, %v6143_v4  ;;  %7568 = vst [vmem:[#allocation5_spill] sm:$0xff] %v6203_v32  ;;  %v2922_v41 = vmax.f32 %v693_v21, 0.0  ;;  %v6216_v56 = vmul.f32 %v6161_v59, %v2919_v37 }
  0xee   :  { %v840_v7 = vpop.f32.mrb[9].mxu1  ;;  %v839_v29 = vadd.f32 %v838_v1, %v6143_v4  ;;  %v764_v17 = vadd.f32 %v763_v6, %v6143_v4  ;;  %v6219_v57 = vmul.f32 %v6161_v59, %v2921_v38  ;;  %v6222_v61 = vmul.f32 %v6161_v59, %v2920_v40 }
  0xef   :  { %v841_v36 = vadd.f32 %v840_v7, %v6143_v4  ;;  %v2859_v46 = vmax.f32 %v762_v27, 0.0  ;;  %7569 = vst [vmem:[#allocation6_spill] sm:$0xff] %v6216_v56  ;;  %v6225_v62 = vmul.f32 %v6161_v59, %v2922_v41 }
  0xf0   :  { %v767_v22 = vpop.f32.mrb[10].mxu0  ;;  %v2861_v47 = vmax.f32 %v839_v29, 0.0  ;;  %v2860_v52 = vmax.f32 %v764_v17, 0.0  ;;  %7570 = vst [vmem:[#allocation7_spill] sm:$0xff] %v6219_v57  ;;  %7571 = vst [vmem:[#allocation8_spill] sm:$0xff] %v6222_v61 }
  0xf1   :  { %v844_v23 = vpop.f32.mrb[10].mxu1  ;;  %v769_v28 = vpop.f32.mrb[11].mxu0  ;;  %v768_v39 = vadd.f32 %v767_v22, %v6147_v35  ;;  %v2862_v53 = vmax.f32 %v841_v36, 0.0  ;;  %7572 = vst [vmem:[#allocation9_spill] sm:$0xff] %v6225_v62  ;;  %v6228_v5 = vmul.f32 %v6145_v34, %v2859_v46 }
  0xf2   :  { %v846_v30 = vpop.f32.mrb[11].mxu1  ;;  %v845_v33 = vadd.f32 %v844_v23, %v6147_v35  ;;  %v770_v42 = vadd.f32 %v769_v28, %v6147_v35  ;;  %v6231_v6 = vmul.f32 %v6145_v34, %v2861_v47  ;;  %v6234_v16 = vmul.f32 %v6145_v34, %v2860_v52 }
  0xf3   :  { %v847_v44 = vadd.f32 %v846_v30, %v6147_v35  ;;  %v2923_v58 = vmax.f32 %v768_v39, 0.0  ;;  %7573 = vst [vmem:[#allocation10_spill] sm:$0xff] %v6228_v5  ;;  %v6237_v20 = vmul.f32 %v6145_v34, %v2862_v53 }
  0xf4   :  { %v915_v43 = vpop.f32.mrb[12].mxu0  ;;  %v2925_v60 = vmax.f32 %v845_v33, 0.0  ;;  %v2924_v63 = vmax.f32 %v770_v42, 0.0  ;;  %7574 = vst [vmem:[#allocation11_spill] sm:$0xff] %v6231_v6  ;;  %7575 = vst [vmem:[#allocation12_spill] sm:$0xff] %v6234_v16 }
  0xf5   :  { %v992_v45 = vpop.f32.mrb[12].mxu1  ;;  %v916_v48 = vadd.f32 %v915_v43, %v6143_v4  ;;  %v917_v49 = vpop.f32.mrb[13].mxu0  ;;  %v2926_v0 = vmax.f32 %v847_v44, 0.0  ;;  %7576 = vst [vmem:[#allocation13_spill] sm:$0xff] %v6237_v20  ;;  %v6240_v23 = vmul.f32 %v6161_v59, %v2923_v58 }
  0xf6   :  { %v993_v50 = vadd.f32 %v992_v45, %v6143_v4  ;;  %v994_v51 = vpop.f32.mrb[13].mxu1  ;;  %v918_v54 = vadd.f32 %v917_v49, %v6143_v4  ;;  %v6243_v27 = vmul.f32 %v6161_v59, %v2925_v60  ;;  %v6252_v30 = vmul.f32 %v6161_v59, %v2924_v63 }
  0xf7   :  { %v995_v55 = vadd.f32 %v994_v51, %v6143_v4  ;;  %v2863_v7 = vmax.f32 %v916_v48, 0.0  ;;  %7577 = vst [vmem:[#allocation14_spill] sm:$0xff] %v6240_v23  ;;  %v6255_v17 = vmul.f32 %v6161_v59, %v2926_v0 }
  0xf8   :  { %v921_v1 = vpop.f32.mrb[14].mxu0  ;;  %v2865_v10 = vmax.f32 %v993_v50, 0.0  ;;  %v2864_v21 = vmax.f32 %v918_v54, 0.0  ;;  %7578 = vst [vmem:[#allocation15_spill] sm:$0xff] %v6243_v27  ;;  %7579 = vst [vmem:[#allocation16_spill] sm:$0xff] %v6252_v30 }
  0xf9   :  { %v998_v3 = vpop.f32.mrb[14].mxu1  ;;  %v923_v12 = vpop.f32.mrb[15].mxu0  ;;  %v2866_v22 = vmax.f32 %v995_v55, 0.0  ;;  %v6246_v28 = vadd.f32 %v921_v1, %v6147_v35  ;;  %7580 = vst [vmem:[#allocation17_spill] sm:$0xff] %v6255_v17  ;;  %v6264_v33 = vmul.f32 %v6145_v34, %v2863_v7 }
  0xfa   :  { %v1000_v15 = vpop.f32.mrb[15].mxu1  ;;  %v6249_v29 = vadd.f32 %v998_v3, %v6147_v35  ;;  %v6258_v36 = vadd.f32 %v923_v12, %v6147_v35  ;;  %v6267_v40 = vmul.f32 %v6145_v34, %v2865_v10  ;;  %v6272_v45 = vmul.f32 %v6145_v34, %v2864_v21 }
  0xfb   :  { %v6261_v37 = vadd.f32 %v1000_v15, %v6147_v35  ;;  %7581 = vst [vmem:[#allocation18_spill] sm:$0xff] %v6264_v33  ;;  %v6275_v46 = vmul.f32 %v6145_v34, %v2866_v22 }
  0xfc   :  { %v1069_v38 = vpop.f32.mrb[16].mxu0  ;;  %7582 = vst [vmem:[#allocation19_spill] sm:$0xff] %v6267_v40  ;;  %7583 = vst [vmem:[#allocation20_spill] sm:$0xff] %v6272_v45 }
  0xfd   :  { %v1146_v39 = vpop.f32.mrb[16].mxu1  ;;  %v1070_v41 = vadd.f32 %v1069_v38, %v6143_v4  ;;  %v1071_v43 = vpop.f32.mrb[17].mxu0  ;;  %7584 = vst [vmem:[#allocation21_spill] sm:$0xff] %v6275_v46 }
  0xfe   :  { %v1147_v42 = vadd.f32 %v1146_v39, %v6143_v4  ;;  %v1148_v44 = vpop.f32.mrb[17].mxu1  ;;  %v1072_v47 = vadd.f32 %v1071_v43, %v6143_v4 }
  0xff   :  { %v1149_v48 = vadd.f32 %v1148_v44, %v6143_v4  ;;  %v2867_v51 = vmax.f32 %v1070_v41, 0.0 }
 0x100   :  { %v2869_v52 = vmax.f32 %v1147_v42, 0.0  ;;  %v2868_v55 = vmax.f32 %v1072_v47, 0.0  ;;  %v1075_v60 = vpop.f32.mrb[18].mxu0 }
 0x101   :  { %v2870_v58 = vmax.f32 %v1149_v48, 0.0  ;;  %v1152_v63 = vpop.f32.mrb[18].mxu1  ;;  %v6284_v0 = vmul.f32 %v6145_v34, %v2867_v51  ;;  %v1076_v3 = vadd.f32 %v1075_v60, %v6147_v35  ;;  %v1077_v10 = vpop.f32.mrb[19].mxu0 }
 0x102   :  { %v6287_v1 = vmul.f32 %v6145_v34, %v2869_v52  ;;  %v1153_v7 = vadd.f32 %v1152_v63, %v6147_v35  ;;  %v1154_v12 = vpop.f32.mrb[19].mxu1  ;;  %v6292_v15 = vmul.f32 %v6145_v34, %v2868_v55  ;;  %v1078_v22 = vadd.f32 %v1077_v10, %v6147_v35 }
 0x103   :  { %v6295_v21 = vmul.f32 %v6145_v34, %v2870_v58  ;;  %v1155_v38 = vadd.f32 %v1154_v12, %v6147_v35  ;;  %v2931_v42 = vmax.f32 %v1076_v3, 0.0 }
 0x104   :  { %v2933_v43 = vmax.f32 %v1153_v7, 0.0  ;;  %v2932_v48 = vmax.f32 %v1078_v22, 0.0  ;;  %v1223_v52 = vpop.f32.mrb[20].mxu0 }
 0x105   :  { %v2934_v51 = vmax.f32 %v1155_v38, 0.0  ;;  %v1300_v55 = vpop.f32.mrb[20].mxu1  ;;  %v6308_v58 = vmul.f32 %v6161_v59, %v2931_v42  ;;  %v1224_v63 = vadd.f32 %v1223_v52, %v6143_v4  ;;  %v1225_v7 = vpop.f32.mrb[21].mxu0 }
 0x106   :  { %v6311_v60 = vmul.f32 %v6161_v59, %v2933_v43  ;;  %v1301_v3 = vadd.f32 %v1300_v55, %v6143_v4  ;;  %v1302_v10 = vpop.f32.mrb[21].mxu1  ;;  %v6316_v12 = vmul.f32 %v6161_v59, %v2932_v48  ;;  %v1226_v38 = vadd.f32 %v1225_v7, %v6143_v4 }
 0x107   :  { %v6319_v22 = vmul.f32 %v6161_v59, %v2934_v51  ;;  %v1303_v42 = vadd.f32 %v1302_v10, %v6143_v4  ;;  %v2871_v11 = vmax.f32 %v1224_v63, 0.0 }
 0x108   :  { %v2873_v55 = vmax.f32 %v1301_v3, 0.0  ;;  %v2872_v51 = vmax.f32 %v1226_v38, 0.0  ;;  %v1229_v41 = vpop.f32.mrb[22].mxu0 }
 0x109   :  { %v2874_v44 = vmax.f32 %v1303_v42, 0.0  ;;  %v1306_v7 = vpop.f32.mrb[22].mxu1  ;;  %v6332_v10 = vmul.f32 %v6145_v34, %v2871_v11  ;;  %v1230_v52 = vadd.f32 %v1229_v41, %v6147_v35  ;;  %v1231_v3 = vpop.f32.mrb[23].mxu0 }
 0x10a   :  { %v6335_v43 = vmul.f32 %v6145_v34, %v2873_v55  ;;  %v1307_v63 = vadd.f32 %v1306_v7, %v6147_v35  ;;  %v1308_v39 = vpop.f32.mrb[23].mxu1  ;;  %v6340_v47 = vmul.f32 %v6145_v34, %v2872_v51  ;;  %v1232_v42 = vadd.f32 %v1231_v3, %v6147_v35 }
 0x10b   :  { %v6343_v38 = vmul.f32 %v6145_v34, %v2874_v44  ;;  %v1309_v11 = vadd.f32 %v1308_v39, %v6147_v35  ;;  %v2935_v48 = vmax.f32 %v1230_v52, 0.0 }
 0x10c   :  { %7585 = vst [vmem:[#allocation22_spill] sm:$0xff] %v6340_v47  ;;  %v2937_v7 = vmax.f32 %v1307_v63, 0.0  ;;  %v2936_v44 = vmax.f32 %v1232_v42, 0.0  ;;  %v1377_v50 = vpop.f32.mrb[24].mxu0 }
 0x10d   :  { %7586 = vst [vmem:[#allocation23_spill] sm:$0xff] %v6343_v38  ;;  %v2938_v53 = vmax.f32 %v1309_v11, 0.0  ;;  %v1454_v3 = vpop.f32.mrb[24].mxu1  ;;  %v6356_v39 = vmul.f32 %v6161_v59, %v2935_v48  ;;  %v1378_v41 = vadd.f32 %v1377_v50, %v6143_v4  ;;  %v1379_v63 = vpop.f32.mrb[25].mxu0 }
 0x10e   :  { %v6359_v55 = vmul.f32 %v6161_v59, %v2937_v7  ;;  %v1455_v52 = vadd.f32 %v1454_v3, %v6143_v4  ;;  %v1456_v49 = vpop.f32.mrb[25].mxu1  ;;  %v6364_v54 = vmul.f32 %v6161_v59, %v2936_v44  ;;  %v1380_v11 = vadd.f32 %v1379_v63, %v6143_v4 }
 0x10f   :  { %7587 = vst [vmem:[#allocation24_spill] sm:$0xff] %v6356_v39  ;;  %v6367_v42 = vmul.f32 %v6161_v59, %v2938_v53  ;;  %v1457_v48 = vadd.f32 %v1456_v49, %v6143_v4  ;;  %v2875_v51 = vmax.f32 %v1378_v41, 0.0 }
 0x110   :  { %7588 = vst [vmem:[#allocation25_spill] sm:$0xff] %v6359_v55  ;;  %7589 = vst [vmem:[#allocation26_spill] sm:$0xff] %v6364_v54  ;;  %v2877_v3 = vmax.f32 %v1455_v52, 0.0  ;;  %v2876_v53 = vmax.f32 %v1380_v11, 0.0  ;;  %v1383_v47 = vpop.f32.mrb[26].mxu0 }
 0x111   :  { %7590 = vst [vmem:[#allocation27_spill] sm:$0xff] %v6367_v42  ;;  %v2878_v32 = vmax.f32 %v1457_v48, 0.0  ;;  %v1460_v63 = vpop.f32.mrb[26].mxu1  ;;  %v6380_v49 = vmul.f32 %v6145_v34, %v2875_v51  ;;  %v1384_v50 = vadd.f32 %v1383_v47, %v6147_v35  ;;  %v1385_v52 = vpop.f32.mrb[27].mxu0 }
 0x112   :  { %v6383_v7 = vmul.f32 %v6145_v34, %v2877_v3  ;;  %v1461_v41 = vadd.f32 %v1460_v63, %v6147_v35  ;;  %v1462_v55 = vpop.f32.mrb[27].mxu1  ;;  %v6388_v38 = vmul.f32 %v6145_v34, %v2876_v53  ;;  %v1386_v48 = vadd.f32 %v1385_v52, %v6147_v35 }
 0x113   :  { %7591 = vst [vmem:[#allocation28_spill] sm:$0xff] %v6380_v49  ;;  %v6391_v11 = vmul.f32 %v6145_v34, %v2878_v32  ;;  %v1463_v51 = vadd.f32 %v1462_v55, %v6147_v35  ;;  %v2939_v44 = vmax.f32 %v1384_v50, 0.0 }
 0x114   :  { %7592 = vst [vmem:[#allocation29_spill] sm:$0xff] %v6383_v7  ;;  %7593 = vst [vmem:[#allocation30_spill] sm:$0xff] %v6388_v38  ;;  %v2941_v63 = vmax.f32 %v1461_v41, 0.0  ;;  %v2940_v32 = vmax.f32 %v1386_v48, 0.0  ;;  %v1531_v54 = vpop.f32.mrb[28].mxu0 }
 0x115   :  { %7594 = vst [vmem:[#allocation31_spill] sm:$0xff] %v6391_v11  ;;  %v2942_v62 = vmax.f32 %v1463_v51, 0.0  ;;  %v1608_v52 = vpop.f32.mrb[28].mxu1  ;;  %v6404_v55 = vmul.f32 %v6161_v59, %v2939_v44  ;;  %v1532_v47 = vadd.f32 %v1531_v54, %v6143_v4  ;;  %v1533_v41 = vpop.f32.mrb[29].mxu0 }
 0x116   :  { %v6407_v3 = vmul.f32 %v6161_v59, %v2941_v63  ;;  %v1609_v50 = vadd.f32 %v1608_v52, %v6143_v4  ;;  %v1610_v7 = vpop.f32.mrb[29].mxu1  ;;  %v6412_v42 = vmul.f32 %v6161_v59, %v2940_v32  ;;  %v1534_v51 = vadd.f32 %v1533_v41, %v6143_v4 }
 0x117   :  { %7595 = vst [vmem:[#allocation32_spill] sm:$0xff] %v6404_v55  ;;  %v6415_v48 = vmul.f32 %v6161_v59, %v2942_v62  ;;  %v1611_v44 = vadd.f32 %v1610_v7, %v6143_v4  ;;  %v2879_v53 = vmax.f32 %v1532_v47, 0.0 }
 0x118   :  { %7596 = vst [vmem:[#allocation33_spill] sm:$0xff] %v6407_v3  ;;  %7597 = vst [vmem:[#allocation34_spill] sm:$0xff] %v6412_v42  ;;  %v2881_v52 = vmax.f32 %v1609_v50, 0.0  ;;  %v2880_v62 = vmax.f32 %v1534_v51, 0.0  ;;  %v1537_v38 = vpop.f32.mrb[30].mxu0 }
 0x119   :  { %7598 = vst [vmem:[#allocation35_spill] sm:$0xff] %v6415_v48  ;;  %v2882_v20 = vmax.f32 %v1611_v44, 0.0  ;;  %v1614_v41 = vpop.f32.mrb[30].mxu1  ;;  %v6428_v7 = vmul.f32 %v6145_v34, %v2879_v53  ;;  %v1538_v54 = vadd.f32 %v1537_v38, %v6147_v35  ;;  %v1539_v50 = vpop.f32.mrb[31].mxu0 }
 0x11a   :  { %v6431_v63 = vmul.f32 %v6145_v34, %v2881_v52  ;;  %v1615_v47 = vadd.f32 %v1614_v41, %v6147_v35  ;;  %v1616_v3 = vpop.f32.mrb[31].mxu1  ;;  %v6436_v11 = vmul.f32 %v6145_v34, %v2880_v62  ;;  %v1540_v44 = vadd.f32 %v1539_v50, %v6147_v35 }
 0x11b   :  { %7599 = vst [vmem:[#allocation36_spill] sm:$0xff] %v6428_v7  ;;  %v6439_v51 = vmul.f32 %v6145_v34, %v2882_v20  ;;  %v1617_v53 = vadd.f32 %v1616_v3, %v6147_v35  ;;  %v2943_v32 = vmax.f32 %v1538_v54, 0.0  ;;  %v7603_v3 = vmax.f32 %v6246_v28, 0.0 }
 0x11c   :  { %7600 = vst [vmem:[#allocation37_spill] sm:$0xff] %v6431_v63  ;;  %7601 = vst [vmem:[#allocation38_spill] sm:$0xff] %v6436_v11  ;;  %v2945_v41 = vmax.f32 %v1615_v47, 0.0  ;;  %v2944_v20 = vmax.f32 %v1540_v44, 0.0  ;;  %v1685_v42 = vpop.f32.mrb[32].mxu0  ;;  %v7605_v52 = vmax.f32 %v6249_v29, 0.0 }
 0x11d   :  { %7602 = vst [vmem:[#allocation39_spill] sm:$0xff] %v6439_v51  ;;  %v2946_v17 = vmax.f32 %v1617_v53, 0.0  ;;  %v1762_v50 = vpop.f32.mrb[32].mxu1  ;;  %v6454_v30 = vmul.f32 %v6161_v59, %v7603_v3  ;;  %v6462_v47 = vmul.f32 %v6161_v59, %v2943_v32  ;;  %v1687_v44 = vpop.f32.mrb[33].mxu0  ;;  %v7609_v62 = vmax.f32 %v6258_v36, 0.0 }
 0x11e   :  { %v6459_v54 = vmul.f32 %v6161_v59, %v7605_v52  ;;  %v6465_v48 = vmul.f32 %v6161_v59, %v2945_v41  ;;  %v1764_v53 = vpop.f32.mrb[33].mxu1  ;;  %v7611_v3 = vmax.f32 %v6261_v37, 0.0  ;;  %v6478_v52 = vmul.f32 %v6161_v59, %v2944_v20 }
 0x11f   :  { %7604 = vst [vmem:[#allocation40_spill] sm:$0xff] %v6454_v30  ;;  %7607 = vst [vmem:[#allocation42_spill] sm:$0xff] %v6462_v47  ;;  %v6470_v28 = vmul.f32 %v6161_v59, %v7609_v62  ;;  %v6481_v32 = vmul.f32 %v6161_v59, %v2946_v17  ;;  %v3260_v17 = vld [vmem:[%s7511_s5 + $0x8] sm:$0xff]  ;;  %v1686_v46 = vadd.f32 %v1685_v42, %v6143_v4 }
 0x120   :  { %7606 = vst [vmem:[#allocation41_spill] sm:$0xff] %v6459_v54  ;;  %7608 = vst [vmem:[#allocation43_spill] sm:$0xff] %v6465_v48  ;;  %v6475_v29 = vmul.f32 %v6161_v59, %v7611_v3  ;;  %v1691_v3 = vpop.f32.mrb[34].mxu0  ;;  %v1688_v41 = vadd.f32 %v1687_v44, %v6143_v4  ;;  %v1763_v36 = vadd.f32 %v1762_v50, %v6143_v4  ;;  %4569 = vmatprep.mubr.msk.f32.mxu0 %vm7565_vm4, %v3260_v17 }
 0x121   :  { %7610 = vst [vmem:[#allocation44_spill] sm:$0xff] %v6470_v28  ;;  %7613 = vst [vmem:[#allocation46_spill] sm:$0xff] %v6478_v52  ;;  %v1768_v38 = vpop.f32.mrb[34].mxu1  ;;  %v1693_v51 = vpop.f32.mrb[35].mxu0  ;;  %4573 = vmatprep.mubr.msk.f32.mxu1 %vm7565_vm4, %v3260_v17  ;;  %v2883_v52 = vmax.f32 %v1686_v46, 0.0  ;;  %v1692_v28 = vadd.f32 %v1691_v3, %v6147_v35 }
 0x122   :  { %7612 = vst [vmem:[#allocation45_spill] sm:$0xff] %v6475_v29  ;;  %7614 = vst [vmem:[#allocation47_spill] sm:$0xff] %v6481_v32  ;;  %v1770_v20 = vpop.f32.mrb[35].mxu1  ;;  %v1765_v29 = vadd.f32 %v1764_v53, %v6143_v4  ;;  %v1769_v42 = vadd.f32 %v1768_v38, %v6147_v35  ;;  %v2884_v54 = vmax.f32 %v1688_v41, 0.0  ;;  %v1694_v44 = vadd.f32 %v1693_v51, %v6147_v35 }
 0x123   :  { %v2885_v47 = vmax.f32 %v1763_v36, 0.0  ;;  %v1771_v50 = vadd.f32 %v1770_v20, %v6147_v35  ;;  %v6509_v38 = vmul.f32 %v6145_v34, %v2883_v52  ;;  %v2947_v51 = vmax.f32 %v1692_v28, 0.0 }
 0x124   :  { %v1839_v48 = vpop.f32.mrb[36].mxu0  ;;  %v2886_v53 = vmax.f32 %v1765_v29, 0.0  ;;  %v2949_v41 = vmax.f32 %v1769_v42, 0.0  ;;  %v6512_v36 = vmul.f32 %v6145_v34, %v2884_v54  ;;  %v2948_v20 = vmax.f32 %v1694_v44, 0.0 }
 0x125   :  { %v1916_v62 = vpop.f32.mrb[36].mxu1  ;;  %v1841_v37 = vpop.f32.mrb[37].mxu0  ;;  %v1840_v45 = vadd.f32 %v1839_v48, %v6143_v4  ;;  %v6515_v48 = vmul.f32 %v6145_v34, %v2885_v47  ;;  %v2950_v7 = vmax.f32 %v1771_v50, 0.0  ;;  %v6524_v47 = vmul.f32 %v6161_v59, %v2947_v51 }
 0x126   :  { %v1918_v32 = vpop.f32.mrb[37].mxu1  ;;  %v1917_v63 = vadd.f32 %v1916_v62, %v6143_v4  ;;  %v1842_v46 = vadd.f32 %v1841_v37, %v6143_v4  ;;  %v6520_v28 = vmul.f32 %v6145_v34, %v2886_v53  ;;  %v6527_v50 = vmul.f32 %v6161_v59, %v2949_v41 }
 0x127   :  { %v1919_v3 = vadd.f32 %v1918_v32, %v6143_v4  ;;  %v2887_v29 = vmax.f32 %v1840_v45, 0.0 }
 0x128   :  { %v1845_v30 = vpop.f32.mrb[38].mxu0  ;;  %v2889_v27 = vmax.f32 %v1917_v63, 0.0  ;;  %v2888_v54 = vmax.f32 %v1842_v46, 0.0  ;;  %v6535_v63 = vmul.f32 %v6161_v59, %v2950_v7 }
 0x129   :  { %v1922_v11 = vpop.f32.mrb[38].mxu1  ;;  %v1847_v17 = vpop.f32.mrb[39].mxu0  ;;  %v1846_v37 = vadd.f32 %v1845_v30, %v6147_v35  ;;  %v2890_v44 = vmax.f32 %v1919_v3, 0.0  ;;  %v6540_v51 = vmul.f32 %v6145_v34, %v2887_v29 }
 0x12a   :  { %v1924_v40 = vpop.f32.mrb[39].mxu1  ;;  %v1923_v32 = vadd.f32 %v1922_v11, %v6147_v35  ;;  %v1848_v42 = vadd.f32 %v1847_v17, %v6147_v35  ;;  %v6532_v11 = vmul.f32 %v6161_v59, %v2948_v20  ;;  %v6546_v16 = vmul.f32 %v6145_v34, %v2888_v54 }
 0x12b   :  { %v1925_v45 = vadd.f32 %v1924_v40, %v6147_v35  ;;  %v2951_v41 = vmax.f32 %v1846_v37, 0.0 }
 0x12c   :  { %v1993_v62 = vpop.f32.mrb[40].mxu0  ;;  %v2953_v40 = vmax.f32 %v1923_v32, 0.0  ;;  %v2952_v7 = vmax.f32 %v1848_v42, 0.0 }
 0x12d   :  { %v2070_v33 = vpop.f32.mrb[40].mxu1  ;;  %v1995_v52 = vpop.f32.mrb[41].mxu0  ;;  %v1994_v30 = vadd.f32 %v1993_v62, %v6143_v4  ;;  %v6543_v62 = vmul.f32 %v6145_v34, %v2889_v27  ;;  %v2954_v49 = vmax.f32 %v1925_v45, 0.0  ;;  %v6557_v42 = vmul.f32 %v6161_v59, %v2951_v41 }
 0x12e   :  { %v2072_v55 = vpop.f32.mrb[41].mxu1  ;;  %v1996_v53 = vadd.f32 %v1995_v52, %v6143_v4  ;;  %v2071_v46 = vadd.f32 %v2070_v33, %v6143_v4  ;;  %v6549_v52 = vmul.f32 %v6145_v34, %v2890_v44  ;;  %v6560_v44 = vmul.f32 %v6161_v59, %v2953_v40 }
 0x12f   :  { %v2073_v33 = vadd.f32 %v2072_v55, %v6143_v4  ;;  %v2891_v6 = vmax.f32 %v1994_v30, 0.0  ;;  %v6573_v40 = vmul.f32 %v6161_v59, %v2954_v49 }
 0x130   :  { %v1999_v17 = vpop.f32.mrb[42].mxu0  ;;  %v2892_v27 = vmax.f32 %v1996_v53, 0.0  ;;  %v2893_v5 = vmax.f32 %v2071_v46, 0.0  ;;  %v6565_v53 = vmul.f32 %v6161_v59, %v2952_v7 }
 0x131   :  { %v2076_v3 = vpop.f32.mrb[42].mxu1  ;;  %v2001_v23 = vpop.f32.mrb[43].mxu0  ;;  %v2000_v29 = vadd.f32 %v1999_v17, %v6147_v35  ;;  %v6570_v41 = vmul.f32 %v6145_v34, %v2891_v6  ;;  %7617 = vst [vmem:[#allocation50_spill] sm:$0xff] %v6573_v40 }
 0x132   :  { %v2078_v20 = vpop.f32.mrb[43].mxu1  ;;  %v2077_v37 = vadd.f32 %v2076_v3, %v6147_v35  ;;  %v2002_v32 = vadd.f32 %v2001_v23, %v6147_v35  ;;  %7615 = vst [vmem:[#allocation48_spill] sm:$0xff] %v6565_v53  ;;  %v2894_v23 = vmax.f32 %v2073_v33, 0.0  ;;  %v6576_v39 = vmul.f32 %v6145_v34, %v2892_v27 }
 0x133   :  { %v2079_v54 = vadd.f32 %v2078_v20, %v6147_v35  ;;  %7616 = vst [vmem:[#allocation49_spill] sm:$0xff] %v6570_v41  ;;  %v2955_v20 = vmax.f32 %v2000_v29, 0.0  ;;  %v6579_v7 = vmul.f32 %v6145_v34, %v2893_v5 }
 0x134   :  { %v2147_v61 = vpop.f32.mrb[44].mxu0  ;;  %v6584_v29 = vmul.f32 %v6145_v34, %v2894_v23 }
 0x135   :  { %v2224_v57 = vpop.f32.mrb[44].mxu1  ;;  %v2148_v55 = vadd.f32 %v2147_v61, %v6143_v4  ;;  %v2149_v30 = vpop.f32.mrb[45].mxu0  ;;  %v2957_v61 = vmax.f32 %v2077_v37, 0.0  ;;  %v2958_v33 = vmax.f32 %v2079_v54, 0.0  ;;  %v6588_v5 = vmul.f32 %v6161_v59, %v2955_v20 }
 0x136   :  { %v2225_v45 = vadd.f32 %v2224_v57, %v6143_v4  ;;  %v2226_v17 = vpop.f32.mrb[45].mxu1  ;;  %v2150_v46 = vadd.f32 %v2149_v30, %v6143_v4  ;;  %v2956_v57 = vmax.f32 %v2002_v32, 0.0 }
 0x137   :  { %v2227_v3 = vadd.f32 %v2226_v17, %v6143_v4  ;;  %v2895_v53 = vmax.f32 %v2148_v55, 0.0  ;;  %7618 = vst [vmem:[#allocation51_spill] sm:$0xff] %v6588_v5  ;;  %v6591_v54 = vmul.f32 %v6161_v59, %v2957_v61  ;;  %v6600_v23 = vmul.f32 %v6161_v59, %v2958_v33 }
 0x138   :  { %v2153_v56 = vpop.f32.mrb[46].mxu0  ;;  %v2897_v6 = vmax.f32 %v2225_v45, 0.0  ;;  %v2896_v37 = vmax.f32 %v2150_v46, 0.0  ;;  %v6597_v45 = vmul.f32 %v6161_v59, %v2956_v57 }
 0x139   :  { %v2230_v30 = vpop.f32.mrb[46].mxu1  ;;  %v2154_v17 = vadd.f32 %v2153_v56, %v6147_v35  ;;  %v2155_v41 = vpop.f32.mrb[47].mxu0  ;;  %v2898_v32 = vmax.f32 %v2227_v3, 0.0  ;;  %7619 = vst [vmem:[#allocation52_spill] sm:$0xff] %v6591_v54  ;;  %7621 = vst [vmem:[#allocation54_spill] sm:$0xff] %v6600_v23  ;;  %v6603_v20 = vmul.f32 %v6145_v34, %v2895_v53 }
 0x13a   :  { %v2231_v49 = vadd.f32 %v2230_v30, %v6147_v35  ;;  %v2232_v40 = vpop.f32.mrb[47].mxu1  ;;  %v2156_v27 = vadd.f32 %v2155_v41, %v6147_v35  ;;  %7620 = vst [vmem:[#allocation53_spill] sm:$0xff] %v6597_v45  ;;  %v6606_v61 = vmul.f32 %v6145_v34, %v2897_v6  ;;  %v6611_v45 = vmul.f32 %v6145_v34, %v2896_v37 }
 0x13b   :  { %v2959_v55 = vmax.f32 %v2154_v17, 0.0  ;;  %v6594_v56 = vadd.f32 %v2232_v40, %v6147_v35  ;;  %7622 = vst [vmem:[#allocation55_spill] sm:$0xff] %v6603_v20  ;;  %v6614_v33 = vmul.f32 %v6145_v34, %v2898_v32 }
 0x13c   :  { %v2960_v46 = vmax.f32 %v2156_v27, 0.0  ;;  %v2961_v30 = vmax.f32 %v2231_v49, 0.0  ;;  %v2301_v41 = vpop.f32.mrb[48].mxu0  ;;  %7623 = vst [vmem:[#allocation56_spill] sm:$0xff] %v6606_v61  ;;  %7624 = vst [vmem:[#allocation57_spill] sm:$0xff] %v6611_v45 }
 0x13d   :  { %v2378_v3 = vpop.f32.mrb[48].mxu1  ;;  %v2302_v17 = vadd.f32 %v2301_v41, %v6143_v4  ;;  %v2303_v54 = vpop.f32.mrb[49].mxu0  ;;  %7625 = vst [vmem:[#allocation58_spill] sm:$0xff] %v6614_v33  ;;  %v6619_v27 = vmul.f32 %v6161_v59, %v2959_v55 }
 0x13e   :  { %v2379_v40 = vadd.f32 %v2378_v3, %v6143_v4  ;;  %v2380_v57 = vpop.f32.mrb[49].mxu1  ;;  %v2304_v49 = vadd.f32 %v2303_v54, %v6143_v4  ;;  %v6623_v3 = vmul.f32 %v6161_v59, %v2960_v46  ;;  %v6626_v37 = vmul.f32 %v6161_v59, %v2961_v30 }
 0x13f   :  { %v2381_v53 = vadd.f32 %v2380_v57, %v6143_v4  ;;  %7626 = vst [vmem:[#allocation59_spill] sm:$0xff] %v6619_v27  ;;  %v2899_v41 = vmax.f32 %v2302_v17, 0.0 }
 0x140   :  { %v2901_v61 = vmax.f32 %v2379_v40, 0.0  ;;  %7627 = vst [vmem:[#allocation60_spill] sm:$0xff] %v6623_v3  ;;  %7628 = vst [vmem:[#allocation61_spill] sm:$0xff] %v6626_v37  ;;  %v2900_v45 = vmax.f32 %v2304_v49, 0.0  ;;  %v2307_v33 = vpop.f32.mrb[50].mxu0 }
 0x141   :  { %v2902_v32 = vmax.f32 %v2381_v53, 0.0  ;;  %v2384_v20 = vpop.f32.mrb[50].mxu1  ;;  %v3039_v54 = vmul.f32 %v6145_v34, %v2899_v41  ;;  %v2308_v55 = vadd.f32 %v2307_v33, %v6147_v35  ;;  %v2309_v17 = vpop.f32.mrb[51].mxu0 }
 0x142   :  { %v3041_v57 = vmul.f32 %v6145_v34, %v2901_v61  ;;  %v2385_v6 = vadd.f32 %v2384_v20, %v6147_v35  ;;  %v2386_v40 = vpop.f32.mrb[51].mxu1  ;;  %v3040_v46 = vmul.f32 %v6145_v34, %v2900_v45  ;;  %v2310_v30 = vadd.f32 %v2309_v17, %v6147_v35 }
 0x143   :  { %v3042_v3 = vmul.f32 %v6145_v34, %v2902_v32  ;;  %v2387_v49 = vadd.f32 %v2386_v40, %v6147_v35  ;;  %v3151_v53 = vmax.f32 %v6509_v38, %v3039_v54  ;;  %v2963_v37 = vmax.f32 %v2308_v55, 0.0 }
 0x144   :  { %v3153_v41 = vmax.f32 %v6515_v48, %v3041_v57  ;;  %v2965_v61 = vmax.f32 %v2385_v6, 0.0  ;;  %v3152_v33 = vmax.f32 %v6512_v36, %v3040_v46  ;;  %v2964_v27 = vmax.f32 %v2310_v30, 0.0  ;;  %v2455_v5 = vpop.f32.mrb[52].mxu0 }
 0x145   :  { %v3154_v20 = vmax.f32 %v6520_v28, %v3042_v3  ;;  %v2966_v23 = vmax.f32 %v2387_v49, 0.0  ;;  %v2532_v45 = vpop.f32.mrb[52].mxu1  ;;  %v7629_v32 = vmax.f32 %v6167_v8, %v6284_v0  ;;  %v7630_v38 = vmax.f32 %v6164_v2, %v6287_v1  ;;  %v2457_v6 = vpop.f32.mrb[53].mxu0 }
 0x146   :  { %v3103_v48 = vmul.f32 %v6161_v59, %v2963_v37  ;;  %v3105_v36 = vmul.f32 %v6161_v59, %v2965_v61  ;;  %v2534_v28 = vpop.f32.mrb[53].mxu1  ;;  %v7631_v3 = vmax.f32 %v6173_v13, %v6292_v15  ;;  %v7632_v8 = vmax.f32 %v6170_v9, %v6295_v21 }
 0x147   :  { %v6643_v17 = vmax.f32 %v7629_v32, %v3151_v53  ;;  %v6648_v54 = vmax.f32 %v7630_v38, %v3153_v41  ;;  %v3104_v2 = vmul.f32 %v6161_v59, %v2964_v27  ;;  %v3106_v1 = vmul.f32 %v6161_v59, %v2966_v23 }
 0x148   :  { %v6655_v57 = vmax.f32 %v7631_v3, %v3152_v33  ;;  %v6660_v0 = vmax.f32 %v7632_v8, %v3154_v20  ;;  %v3167_v37 = vmax.f32 %v6524_v47, %v3103_v48  ;;  %v3169_v55 = vmax.f32 %v6527_v50, %v3105_v36  ;;  %v2461_v30 = vpop.f32.mrb[54].mxu0 }
 0x149   :  { %v2456_v40 = vadd.f32 %v2455_v5, %v6143_v4  ;;  %v2533_v46 = vadd.f32 %v2532_v45, %v6143_v4  ;;  %v3168_v13 = vmax.f32 %v6532_v11, %v3104_v2  ;;  %v3170_v15 = vmax.f32 %v6535_v63, %v3106_v1  ;;  %v2538_v27 = vpop.f32.mrb[54].mxu1  ;;  %v2463_v53 = vpop.f32.mrb[55].mxu0 }
 0x14a   :  { %v2458_v9 = vadd.f32 %v2457_v6, %v6143_v4  ;;  %v2535_v21 = vadd.f32 %v2534_v28, %v6143_v4  ;;  %v7633_v23 = vmax.f32 %v6181_v18, %v6308_v58  ;;  %v7634_v50 = vmax.f32 %v6176_v14, %v6311_v60  ;;  %v2540_v63 = vpop.f32.mrb[55].mxu1 }
 0x14b   :  { %v2903_v49 = vmax.f32 %v2456_v40, 0.0  ;;  %v2905_v11 = vmax.f32 %v2533_v46, 0.0  ;;  %v7635_v41 = vmax.f32 %v6189_v24, %v6316_v12  ;;  %v7636_v33 = vmax.f32 %v6184_v19, %v6319_v22  ;;  %v6704_v46 = vpop.permute.xlu0 %3219 }
 0x14c   :  { %v6675_v47 = vmax.f32 %v7633_v23, %v3167_v37  ;;  %v6680_v5 = vmax.f32 %v7634_v50, %v3169_v55  ;;  %v2904_v58 = vmax.f32 %v2458_v9, 0.0  ;;  %v2906_v20 = vmax.f32 %v2535_v21, 0.0  ;;  %v2609_v22 = vpop.f32.mrb[56].mxu0  ;;  %v7642_v23 = vld [vmem:[#allocation23_spill] sm:$0xff] }
 0x14d   :  { %v6685_v61 = vmax.f32 %v7635_v41, %v3168_v13  ;;  %v6690_v18 = vmax.f32 %v7636_v33, %v3170_v15  ;;  %v3043_v14 = vmul.f32 %v6145_v34, %v2903_v49  ;;  %v3045_v60 = vmul.f32 %v6145_v34, %v2905_v11  ;;  %v2686_v48 = vpop.f32.mrb[56].mxu1  ;;  %v2611_v8 = vpop.f32.mrb[57].mxu0 }
 0x14e   :  { %v2462_v45 = vadd.f32 %v2461_v30, %v6147_v35  ;;  %v2539_v32 = vadd.f32 %v2538_v27, %v6147_v35  ;;  %v3044_v38 = vmul.f32 %v6145_v34, %v2904_v58  ;;  %v3046_v24 = vmul.f32 %v6145_v34, %v2906_v20  ;;  %v2688_v2 = vpop.f32.mrb[57].mxu1  ;;  %v7641_v27 = vld [vmem:[#allocation5_spill] sm:$0xff] }
 0x14f   :  { %v2464_v12 = vadd.f32 %v2463_v53, %v6147_v35  ;;  %v2541_v19 = vadd.f32 %v2540_v63, %v6147_v35  ;;  %v3155_v36 = vmax.f32 %v6540_v51, %v3043_v14  ;;  %v3157_v6 = vmax.f32 %v6543_v62, %v3045_v60  ;;  %v7645_v14 = vld [vmem:[#allocation48_spill] sm:$0xff] }
 0x150   :  { %v2967_v28 = vmax.f32 %v2462_v45, 0.0  ;;  %v2969_v3 = vmax.f32 %v2539_v32, 0.0  ;;  %v3156_v1 = vmax.f32 %v6546_v16, %v3044_v38  ;;  %v3158_v37 = vmax.f32 %v6549_v52, %v3046_v24  ;;  %v7639_v16 = vld [vmem:[#allocation22_spill] sm:$0xff]  ;;  %v2615_v11 = vpop.f32.mrb[58].mxu0  ;;  %v6740_v38 = vpop.permute.xlu1 %3224 }
 0x151   :  { %v2968_v55 = vmax.f32 %v2464_v12, 0.0  ;;  %v2970_v40 = vmax.f32 %v2541_v19, 0.0  ;;  %v7637_v13 = vmax.f32 %v6192_v25, %v6332_v10  ;;  %v7638_v51 = vmax.f32 %v6195_v26, %v6335_v43  ;;  %v2692_v26 = vpop.f32.mrb[58].mxu1  ;;  %v2617_v33 = vpop.f32.mrb[59].mxu0  ;;  %v7646_v45 = vld [vmem:[#allocation50_spill] sm:$0xff]  ;;  %v7648_v12 = vld [vmem:[#allocation24_spill] sm:$0xff] }
 0x152   :  { %v3107_v9 = vmul.f32 %v6161_v59, %v2967_v28  ;;  %v3109_v21 = vmul.f32 %v6161_v59, %v2969_v3  ;;  %v7640_v30 = vmax.f32 %v6200_v31, %v7639_v16  ;;  %v7643_v50 = vmax.f32 %v7641_v27, %v7642_v23  ;;  %v2694_v58 = vpop.f32.mrb[59].mxu1  ;;  %v7647_v24 = vld [vmem:[#allocation6_spill] sm:$0xff] }
 0x153   :  { %v3187_v15 = vmax.f32 %v7637_v13, %v3155_v36  ;;  %v3189_v62 = vmax.f32 %v7638_v51, %v3157_v6  ;;  %v3108_v25 = vmul.f32 %v6161_v59, %v2968_v55  ;;  %v3110_v10 = vmul.f32 %v6161_v59, %v2970_v40  ;;  %v7651_v6 = vld [vmem:[#allocation25_spill] sm:$0xff]  ;;  %v7654_v55 = vld [vmem:[#allocation26_spill] sm:$0xff] }
 0x154   :  { %v3188_v52 = vmax.f32 %v7640_v30, %v3156_v1  ;;  %v6720_v49 = vmax.f32 %v7643_v50, %v3158_v37  ;;  %v7644_v43 = vmax.f32 %v6594_v56, 0.0  ;;  %v3171_v31 = vmax.f32 %v6557_v42, %v3107_v9  ;;  %v7650_v42 = vld [vmem:[#allocation7_spill] sm:$0xff]  ;;  %v7653_v37 = vld [vmem:[#allocation8_spill] sm:$0xff]  ;;  %v2763_v16 = vpop.f32.mrb[60].mxu0 }
 0x155   :  { %v6730_v63 = vadd.f32 %v6704_v46, %v3187_v15  ;;  %v3173_v41 = vmax.f32 %v6560_v44, %v3109_v21  ;;  %v6735_v20 = vadd.f32 %v6704_v46, %v3189_v62  ;;  %v3172_v60 = vmax.f32 %v7645_v14, %v3108_v25  ;;  %v7656_v15 = vld [vmem:[#allocation9_spill] sm:$0xff]  ;;  %v2840_v30 = vpop.f32.mrb[60].mxu1  ;;  %v2765_v50 = vpop.f32.mrb[61].mxu0 }
 0x156   :  { %v6727_v53 = vmul.f32 %v6161_v59, %v7644_v43  ;;  %v3174_v32 = vmax.f32 %v7646_v45, %v3110_v10  ;;  %v2610_v56 = vadd.f32 %v2609_v22, %v6143_v4  ;;  %v7649_v19 = vmax.f32 %v7647_v24, %v7648_v12  ;;  %v7657_v22 = vld [vmem:[#allocation27_spill] sm:$0xff]  ;;  %v2842_v25 = vpop.f32.mrb[61].mxu1  ;;  %v7659_v45 = vld [vmem:[#allocation49_spill] sm:$0xff] }
 0x157   :  { %v7652_v44 = vmax.f32 %v7650_v42, %v7651_v6  ;;  %v2687_v3 = vadd.f32 %v2686_v48, %v6143_v4  ;;  %v2612_v1 = vadd.f32 %v2611_v8, %v6143_v4  ;;  %v7655_v40 = vmax.f32 %v7653_v37, %v7654_v55 }
 0x158   :  { %v3203_v36 = vmax.f32 %v7649_v19, %v3171_v31  ;;  %v7658_v51 = vmax.f32 %v7656_v15, %v7657_v22  ;;  %v2907_v9 = vmax.f32 %v2610_v56, 0.0  ;;  %v2689_v21 = vadd.f32 %v2688_v2, %v6143_v4  ;;  %v2769_v19 = vpop.f32.mrb[62].mxu0  ;;  %v7663_v15 = vld [vmem:[#allocation11_spill] sm:$0xff]  ;;  %v7664_v22 = vld [vmem:[#allocation29_spill] sm:$0xff] }
 0x159   :  { %v3205_v28 = vmax.f32 %v7652_v44, %v3173_v41  ;;  %v3204_v13 = vmax.f32 %v7655_v40, %v3172_v60  ;;  %v6760_v27 = vadd.f32 %v6704_v46, %v3188_v52  ;;  %v2909_v8 = vmax.f32 %v2687_v3, 0.0  ;;  %v2771_v44 = vpop.f32.mrb[63].mxu0  ;;  %v7661_v3 = vld [vmem:[#allocation28_spill] sm:$0xff] }
 0x15a   :  { %v6756_v62 = vmax.f32 %v7658_v51, %v3174_v32  ;;  %v6763_v48 = vadd.f32 %v6740_v38, %v3203_v36  ;;  %v2908_v23 = vmax.f32 %v2612_v1, 0.0  ;;  %v3047_v43 = vmul.f32 %v6145_v34, %v2907_v9  ;;  %v2846_v36 = vpop.f32.mrb[62].mxu1  ;;  %v7667_v9 = vld [vmem:[#allocation30_spill] sm:$0xff] }
 0x15b   :  { %v6766_v10 = vadd.f32 %v6740_v38, %v3205_v28  ;;  %v2910_v31 = vmax.f32 %v2689_v21, 0.0  ;;  %v2616_v2 = vadd.f32 %v2615_v11, %v6147_v35  ;;  %v3049_v41 = vmul.f32 %v6145_v34, %v2909_v8  ;;  %v6782_v28 = vpop.f32.mrb[63].mxu1 }
 0x15c   :  { %v3048_v52 = vmul.f32 %v6145_v34, %v2908_v23  ;;  %v2693_v14 = vadd.f32 %v2692_v26, %v6147_v35  ;;  %v3228_v60 = vadd.f32 %v6704_v46, %v6655_v57  ;;  %v3159_v32 = vmax.f32 %v7659_v45, %v3047_v43  ;;  %v7660_v57 = vld [vmem:[#allocation10_spill] sm:$0xff] }
 0x15d   :  { %v3050_v56 = vmul.f32 %v6145_v34, %v2910_v31  ;;  %v2971_v24 = vmax.f32 %v2616_v2, 0.0  ;;  %v3244_v12 = vadd.f32 %v6740_v38, %v6685_v61  ;;  %v3161_v11 = vmax.f32 %v6579_v7, %v3049_v41  ;;  %v7669_v31 = vld [vmem:[#allocation13_spill] sm:$0xff]  ;;  %v7670_v2 = vld [vmem:[#allocation31_spill] sm:$0xff] }
 0x15e   :  { %v3160_v42 = vmax.f32 %v6576_v39, %v3048_v52  ;;  %v2973_v6 = vmax.f32 %v2693_v14, 0.0  ;;  %v2618_v26 = vadd.f32 %v2617_v33, %v6147_v35  ;;  %v7662_v1 = vmax.f32 %v7660_v57, %v7661_v3  ;;  %v7666_v39 = vld [vmem:[#allocation12_spill] sm:$0xff]  ;;  %v7672_v52 = vld [vmem:[#allocation51_spill] sm:$0xff] }
 0x15f   :  { %v3162_v55 = vmax.f32 %v6584_v29, %v3050_v56  ;;  %v3111_v61 = vmul.f32 %v6161_v59, %v2971_v24  ;;  %v4940_v40 = vpack.c.bf16 %v3244_v12, %v3228_v60  ;;  %v7665_v7 = vmax.f32 %v7663_v15, %v7664_v22  ;;  %v7673_v56 = vld [vmem:[#allocation52_spill] sm:$0xff]  ;;  %v7674_v12 = vld [vmem:[#allocation14_spill] sm:$0xff]  ;;  %v7677_v3 = vld [vmem:[#allocation15_spill] sm:$0xff] }
 0x160   :  { %v3191_v37 = vmax.f32 %v7662_v1, %v3159_v32  ;;  %v7668_v21 = vmax.f32 %v7666_v39, %v7667_v9  ;;  %v3113_v8 = vmul.f32 %v6161_v59, %v2973_v6  ;;  %v2972_v23 = vmax.f32 %v2618_v26, 0.0  ;;  %v7678_v1 = vld [vmem:[#allocation33_spill] sm:$0xff] }
 0x161   :  { %v3193_v51 = vmax.f32 %v7665_v7, %v3161_v11  ;;  %v3248_v43 = vadd.f32 %v6740_v38, %v3204_v13  ;;  %v7671_v41 = vmax.f32 %v7669_v31, %v7670_v2  ;;  %v3175_v14 = vmax.f32 %v7672_v52, %v3111_v61  ;;  %4941 = vmatprep.subr.bf16.mxu0 %v4940_v40  ;;  %v7675_v11 = vld [vmem:[#allocation32_spill] sm:$0xff]  ;;  %v7680_v61 = vld [vmem:[#allocation53_spill] sm:$0xff] }
 0x162   :  { %v3192_v33 = vmax.f32 %v7668_v21, %v3160_v42  ;;  %v2695_v60 = vadd.f32 %v2694_v58, %v6147_v35  ;;  %v6805_v45 = vadd.f32 %v6704_v46, %v3191_v37  ;;  %v3177_v24 = vmax.f32 %v7673_v56, %v3113_v8  ;;  %v7681_v21 = vld [vmem:[#allocation16_spill] sm:$0xff]  ;;  %v7682_v8 = vld [vmem:[#allocation34_spill] sm:$0xff] }
 0x163   :  { %v6800_v29 = vmax.f32 %v7671_v41, %v3162_v55  ;;  %v6808_v32 = vadd.f32 %v6704_v46, %v3193_v51  ;;  %v3112_v13 = vmul.f32 %v6161_v59, %v2972_v23  ;;  %v7676_v42 = vmax.f32 %v7674_v12, %v7675_v11  ;;  %v7684_v41 = vld [vmem:[#allocation54_spill] sm:$0xff] }
 0x164   :  { %v2974_v26 = vmax.f32 %v2695_v60, 0.0  ;;  %v3227_v57 = vadd.f32 %v6704_v46, %v6643_v17  ;;  %v3243_v58 = vadd.f32 %v6740_v38, %v6675_v47  ;;  %v7679_v37 = vmax.f32 %v7677_v3, %v7678_v1 }
 0x165   :  { %v3207_v6 = vmax.f32 %v7676_v42, %v3175_v14  ;;  %v3176_v15 = vmax.f32 %v7680_v61, %v3112_v13  ;;  %v3229_v22 = vadd.f32 %v6704_v46, %v6648_v54  ;;  %v3245_v7 = vadd.f32 %v6740_v38, %v6680_v5  ;;  %v7685_v13 = vld [vmem:[#allocation17_spill] sm:$0xff] }
 0x166   :  { %v3209_v55 = vmax.f32 %v7679_v37, %v3177_v24  ;;  %v6828_v51 = vadd.f32 %v6704_v46, %v3192_v33  ;;  %v3114_v17 = vmul.f32 %v6161_v59, %v2974_v26  ;;  %v4942_v39 = vpack.c.bf16 %v3243_v58, %v3227_v57  ;;  %v7688_v58 = vld [vmem:[#allocation55_spill] sm:$0xff]  ;;  %v7689_v37 = vld [vmem:[#allocation56_spill] sm:$0xff] }
 0x167   :  { %v2764_v47 = vadd.f32 %v2763_v16, %v6143_v4  ;;  %v6833_v9 = vadd.f32 %v6740_v38, %v3207_v6  ;;  %v7683_v23 = vmax.f32 %v7681_v21, %v7682_v8  ;;  %v4944_v2 = vpack.c.bf16 %v3245_v7, %v3229_v22  ;;  %v7694_v8 = vld [vmem:[#allocation58_spill] sm:$0xff] }
 0x168   :  { %v2841_v54 = vadd.f32 %v2840_v30, %v6143_v4  ;;  %v3178_v5 = vmax.f32 %v7684_v41, %v3114_v17  ;;  %4943 = vmatpush1.bf16.msra.mxu0 %v4942_v39  ;;  %v2766_v52 = vadd.f32 %v2765_v50, %v6143_v4  ;;  %v2843_v14 = vadd.f32 %v2842_v25, %v6143_v4  ;;  %v7686_v30 = vld [vmem:[#allocation35_spill] sm:$0xff]  ;;  %v7690_v17 = vld [vmem:[#allocation18_spill] sm:$0xff] }
 0x169   :  { %v3208_v31 = vmax.f32 %v7683_v23, %v3176_v15  ;;  %v2911_v33 = vmax.f32 %v2764_v47, 0.0  ;;  %4945 = vmatprep.subr.bf16.mxu0 %v4944_v2  ;;  %v3230_v56 = vadd.f32 %v6704_v46, %v6660_v0  ;;  %v3246_v24 = vadd.f32 %v6740_v38, %v6690_v18  ;;  %v7693_v47 = vld [vmem:[#allocation57_spill] sm:$0xff] }
 0x16a   :  { %v2913_v60 = vmax.f32 %v2841_v54, 0.0  ;;  %v7687_v12 = vmax.f32 %v7685_v13, %v7686_v30  ;;  %v2912_v6 = vmax.f32 %v2766_v52, 0.0  ;;  %v2914_v50 = vmax.f32 %v2843_v14, 0.0  ;;  %v7699_v52 = vld [vmem:[#allocation38_spill] sm:$0xff] }
 0x16b   :  { %v3252_v16 = vadd.f32 %v6740_v38, %v3208_v31  ;;  %v3051_v42 = vmul.f32 %v6145_v34, %v2911_v33  ;;  %v4948_v25 = vpack.c.bf16 %v3246_v24, %v3230_v56  ;;  %v2770_v26 = vadd.f32 %v2769_v19, %v6147_v35  ;;  %v7691_v19 = vld [vmem:[#allocation36_spill] sm:$0xff]  ;;  %v7701_v56 = vld [vmem:[#allocation21_spill] sm:$0xff]  ;;  %v7702_v24 = vld [vmem:[#allocation39_spill] sm:$0xff] }
 0x16c   :  { %v3210_v11 = vmax.f32 %v7687_v12, %v3178_v5  ;;  %v3053_v4 = vmul.f32 %v6145_v34, %v2913_v60  ;;  %v2847_v57 = vadd.f32 %v2846_v36, %v6147_v35  ;;  %v3052_v3 = vmul.f32 %v6145_v34, %v2912_v6  ;;  %4947 = vmatpush1.bf16.msra.mxu0 %v4940_v40  ;;  %v7696_v40 = vld [vmem:[#allocation37_spill] sm:$0xff]  ;;  %v7698_v33 = vld [vmem:[#allocation20_spill] sm:$0xff] }
 0x16d   :  { %v3163_v0 = vmax.f32 %v7688_v58, %v3051_v42  ;;  %v3054_v18 = vmul.f32 %v6145_v34, %v2914_v50  ;;  %v4952_v1 = vpack.c.bf16 %v3248_v43, %v6760_v27  ;;  %4949 = vmatprep.subr.bf16.mxu0 %v4948_v25  ;;  %v2975_v15 = vmax.f32 %v2770_v26, 0.0  ;;  %v7695_v27 = vld [vmem:[#allocation19_spill] sm:$0xff]  ;;  %v7705_v42 = vld [vmem:[#allocation61_spill] sm:$0xff]  ;;  %v7707_v58 = vld [vmem:[#allocation42_spill] sm:$0xff] }
 0x16e   :  { %v3165_v61 = vmax.f32 %v7689_v37, %v3053_v4  ;;  %v2977_v22 = vmax.f32 %v2847_v57, 0.0  ;;  %v2772_v7 = vadd.f32 %v2771_v44, %v6147_v35  ;;  %v7692_v39 = vmax.f32 %v7690_v17, %v7691_v19  ;;  %v7706_v57 = vld [vmem:[#allocation40_spill] sm:$0xff]  ;;  %v7710_v37 = vld [vmem:[#allocation43_spill] sm:$0xff]  ;;  %v7714_v17 = vld [vmem:[#allocation46_spill] sm:$0xff] }
 0x16f   :  { %v3164_v21 = vmax.f32 %v7693_v47, %v3052_v3  ;;  %v3166_v23 = vmax.f32 %v7694_v8, %v3054_v18  ;;  %4977 = vmatprep.subr.bf16.mxu1 %v4952_v1  ;;  %v2849_v34 = vadd.f32 %v6782_v28, %v6147_v35  ;;  %v7697_v43 = vmax.f32 %v7695_v27, %v7696_v40  ;;  %v7704_v28 = vld [vmem:[#allocation59_spill] sm:$0xff]  ;;  %v7709_v18 = vld [vmem:[#allocation41_spill] sm:$0xff] }
 0x170   :  { %v3195_v36 = vmax.f32 %v7692_v39, %v3163_v0  ;;  %v3115_v54 = vmul.f32 %v6161_v59, %v2975_v15  ;;  %v3117_v44 = vmul.f32 %v6161_v59, %v2977_v22  ;;  %v2976_v41 = vmax.f32 %v2772_v7, 0.0  ;;  %4951 = vmatpush1.bf16.msra.mxu0 %v4944_v2  ;;  %v7713_v7 = vld [vmem:[#allocation44_spill] sm:$0xff] }
 0x171   :  { %v3197_v31 = vmax.f32 %v7697_v43, %v3165_v61  ;;  %v3253_v5 = vadd.f32 %v6740_v38, %v3209_v55  ;;  %v7700_v14 = vmax.f32 %v7698_v33, %v7699_v52  ;;  %v7703_v13 = vmax.f32 %v7701_v56, %v7702_v24  ;;  %4953 = vmatprep.subr.bf16.mxu0 %v4952_v1  ;;  %v3284_v33 = vpop.permute.xlu0 %3283  ;;  %v3289_v52 = vpop.permute.xlu1 %3288 }
 0x172   :  { %v2978_v35 = vmax.f32 %v2849_v34, 0.0  ;;  %v3179_v12 = vmax.f32 %v7704_v28, %v3115_v54  ;;  %v3181_v6 = vmax.f32 %v7705_v42, %v3117_v44  ;;  %v3116_v50 = vmul.f32 %v6161_v59, %v2976_v41  ;;  %v3263_v44 = vld [vmem:[%s7511_s5 + $0x20] sm:$0xff]  ;;  %v3266_v41 = vld [vmem:[%s7511_s5 + $0x38] sm:$0xff] }
 0x173   :  { %v3196_v60 = vmax.f32 %v7700_v14, %v3164_v21  ;;  %v3198_v30 = vmax.f32 %v7703_v13, %v3166_v23  ;;  %v4954_v4 = vpack.c.bf16 %v6763_v48, %v6730_v63  ;;  %v4956_v25 = vpack.c.bf16 %v6766_v10, %v6735_v20  ;;  %v7712_v48 = vld [vmem:[#allocation60_spill] sm:$0xff] }
 0x174   :  { %v3118_v55 = vmul.f32 %v6161_v59, %v2978_v35  ;;  %v3234_v26 = vadd.f32 %v6704_v46, %v6720_v49  ;;  %v3250_v2 = vadd.f32 %v6740_v38, %v6756_v62  ;;  %v7708_v0 = vmax.f32 %v7706_v57, %v7707_v58 }
 0x175   :  { %v7711_v61 = vmax.f32 %v7709_v18, %v7710_v37  ;;  %v3180_v15 = vmax.f32 %v7712_v48, %v3116_v50  ;;  %4979 = vmatpush1.bf16.msra.mxu1 %v4954_v4  ;;  %v4964_v59 = vpack.c.bf16 %v3252_v16, %v6828_v51  ;;  %4955 = vmatpush1.bf16.msra.mxu0 %v4954_v4  ;;  %v7716_v51 = vld [vmem:[#allocation45_spill] sm:$0xff]  ;;  %v7717_v16 = vld [vmem:[#allocation47_spill] sm:$0xff]  ;;  %v3274_v14 = vpop.permute.xlu0 %3273  ;;  %v3279_v35 = vpop.permute.xlu1 %3278 }
 0x176   :  { %v3211_v3 = vmax.f32 %v7708_v0, %v3179_v12  ;;  %v3182_v20 = vmax.f32 %v6727_v53, %v3118_v55  ;;  %4981 = vmatprep.subr.bf16.mxu1 %v4956_v25  ;;  %v4960_v49 = vpack.c.bf16 %v3250_v2, %v3234_v26  ;;  %v4966_v62 = vpack.c.bf16 %v6833_v9, %v6805_v45 }
 0x177   :  { %v3213_v63 = vmax.f32 %v7711_v61, %v3181_v6  ;;  %v3239_v10 = vadd.f32 %v6704_v46, %v3195_v36  ;;  %v7715_v19 = vmax.f32 %v7713_v7, %v7714_v17  ;;  %4957 = vmatprep.subr.bf16.mxu0 %v4956_v25  ;;  %v4968_v47 = vpack.c.bf16 %v3253_v5, %v6808_v32  ;;  %v3265_v5 = vld [vmem:[%s7511_s5 + $0x30] sm:$0xff] }
 0x178   :  { %v3255_v22 = vadd.f32 %v6740_v38, %v3211_v3  ;;  %v7718_v53 = vmax.f32 %v7716_v51, %v7717_v16  ;;  %v3238_v8 = vadd.f32 %v6704_v46, %v6800_v29  ;;  %v3254_v45 = vadd.f32 %v6740_v38, %v3210_v11 }
 0x179   :  { %v3212_v39 = vmax.f32 %v7715_v19, %v3180_v15  ;;  %v3240_v9 = vadd.f32 %v6704_v46, %v3196_v60  ;;  %4983 = vmatpush1.bf16.msra.mxu1 %v4952_v1  ;;  %v3241_v34 = vadd.f32 %v6704_v46, %v3197_v31  ;;  %v3257_v27 = vadd.f32 %v6740_v38, %v3213_v63  ;;  %v3264_v31 = vld [vmem:[%s7511_s5 + $0x28] sm:$0xff] }
 0x17a   :  { %v3214_v21 = vmax.f32 %v7718_v53, %v3182_v20  ;;  %v5002_v23 = vpack.c.bf16 %v3255_v22, %v3239_v10  ;;  %4985 = vmatprep.subr.bf16.mxu1 %v4960_v49  ;;  %4959 = vmatpush1.bf16.msra.mxu0 %v4952_v1  ;;  %v4972_v32 = vpack.c.bf16 %v3254_v45, %v3238_v8  ;;  %v3261_v1 = vld [vmem:[%s7511_s5 + $0x10] sm:$0xff] }
 0x17b   :  { %v3256_v36 = vadd.f32 %v6740_v38, %v3212_v39  ;;  %v3242_v40 = vadd.f32 %v6704_v46, %v3198_v30  ;;  %4961 = vmatprep.subr.bf16.mxu0 %v4960_v49  ;;  %v5004_v11 = vpack.c.bf16 %v3257_v27, %v3241_v34  ;;  %v3259_v46 = vld [vmem:[%s7511_s5] sm:$0xff] }
 0x17c   :  { %v3258_v43 = vadd.f32 %v6740_v38, %v3214_v21  ;;  %v3262_v38 = vld [vmem:[%s7511_s5 + $0x18] sm:$0xff]  ;;  %s5304_s5 = smov 103  }
 0x17d   :  { %v5000_v29 = vpack.c.bf16 %v3256_v36, %v3240_v9  ;;  %4987 = vmatpush1.bf16.msra.mxu1 %v4956_v25 }
 0x17e   :  { %v5008_v54 = vpack.c.bf16 %v3258_v43, %v3242_v40  ;;  %4989 = vmatprep.subr.bf16.mxu1 %v4964_v59  ;;  %4963 = vmatpush1.bf16.msra.mxu0 %v4956_v25 }
 0x17f   :  { %4965 = vmatprep.subr.bf16.mxu0 %v4964_v59 }
 0x181   :  { %4991 = vmatpush1.bf16.msra.mxu1 %v4966_v62 }
 0x182   :  { %4993 = vmatprep.subr.bf16.mxu1 %v4968_v47  ;;  %4967 = vmatpush1.bf16.msra.mxu0 %v4966_v62 }
 0x183   :  { %4969 = vmatprep.subr.bf16.mxu0 %v4968_v47 }
 0x185   :  { %4995 = vmatpush1.bf16.msra.mxu1 %v4964_v59 }
 0x186   :  { %4997 = vmatprep.subr.bf16.mxu1 %v4972_v32  ;;  %4971 = vmatpush1.bf16.msra.mxu0 %v4964_v59 }
 0x187   :  { %4973 = vmatprep.subr.bf16.mxu0 %v4972_v32 }
 0x189   :  { %4999 = vmatpush1.bf16.msra.mxu1 %v4968_v47 }
 0x18a   :  { %5001 = vmatprep.subr.bf16.mxu1 %v5000_v29  ;;  %4975 = vmatpush1.bf16.msra.mxu0 %v4968_v47 }
 0x18d   :  { %5003 = vmatpush1.bf16.msra.mxu1 %v5002_v23  ;;  %3369 = vmatmul.mubr.f32.vlgmr.msra.gmra.mrb[64].mxu0 %v3259_v46 }
 0x18e   :  { %5005 = vmatprep.subr.bf16.mxu1 %v5004_v11  ;;  %4570 = vmatprep.mubr.msk.f32.mxu0 %vm7565_vm4, %v3262_v38 }
 0x191   :  { %5007 = vmatpush1.bf16.msra.mxu1 %v5000_v29  ;;  %3375 = vmatmul.mubr.f32.gmra.mrb[66].mxu0 %v3261_v1 }
 0x192   :  { %5009 = vmatprep.subr.bf16.mxu1 %v5008_v54  ;;  %4571 = vmatprep.mubr.msk.f32.mxu0 %vm7565_vm4, %v3264_v31 }
 0x195   :  { %5011 = vmatpush1.bf16.msra.mxu1 %v5004_v11  ;;  %3381 = vmatmul.mubr.f32.gmra.mrb[68].mxu0 %v3263_v44 }
 0x196   :  { %4572 = vmatprep.mubr.msk.f32.mxu0 %vm7565_vm4, %v3266_v41 }
 0x198   :  { %3458 = vmatmul.mubr.f32.vlgmr.msra.gmra.mrb[64].mxu1 %v3259_v46 }
 0x199   :  { %4574 = vmatprep.mubr.msk.f32.mxu1 %vm7565_vm4, %v3262_v38  ;;  %3387 = vmatmul.mubr.f32.gmra.mrb[70].mxu0 %v3265_v5 }
 0x19c   :  { %3464 = vmatmul.mubr.f32.gmra.mrb[66].mxu1 %v3261_v1 }
 0x19d   :  { %4575 = vmatprep.mubr.msk.f32.mxu1 %vm7565_vm4, %v3264_v31 }
 0x1a0   :  { %3470 = vmatmul.mubr.f32.gmra.mrb[68].mxu1 %v3263_v44 }
 0x1a1   :  { %4576 = vmatprep.mubr.msk.f32.mxu1 %vm7565_vm4, %v3266_v41  ;;  %vm3589_vm4 = vcmask 998400  }
 0x1a4   :  { %3476 = vmatmul.mubr.f32.gmra.mrb[70].mxu1 %v3265_v5 }
 0x260   :  { %v3370_v60 = vpop.f32.mrb[64].mxu0 }
 0x261   :  { %v3371_v56 = vadd.f32 %v3370_v60, %v3274_v14  ;;  %v3372_v24 = vpop.f32.mrb[65].mxu0 }
 0x262   :  { %v3373_v13 = vadd.f32 %v3372_v24, %v3274_v14 }
 0x263   :  { %v3482_v30 = vmax.f32 %v3371_v56, 0.0 }
 0x264   :  { %v3483_v28 = vmax.f32 %v3373_v13, 0.0  ;;  %v3376_v12 = vpop.f32.mrb[66].mxu0 }
 0x265   :  { %v3377_v42 = vadd.f32 %v3376_v12, %v3279_v35  ;;  %v3378_v6 = vpop.f32.mrb[67].mxu0 }
 0x266   :  { %v3498_v50 = vmax.f32 %v3482_v30, %v3483_v28  ;;  %v3379_v4 = vadd.f32 %v3378_v6, %v3279_v35 }
 0x267   :  { %v3486_v55 = vmax.f32 %v3377_v42, 0.0 }
 0x268   :  { %v3487_v25 = vmax.f32 %v3379_v4, 0.0  ;;  %v3382_v26 = vpop.f32.mrb[68].mxu0 }
 0x269   :  { %v3383_v2 = vadd.f32 %v3382_v26, %v3284_v33  ;;  %v3384_v57 = vpop.f32.mrb[69].mxu0 }
 0x26a   :  { %v3499_v58 = vmax.f32 %v3486_v55, %v3487_v25  ;;  %v3385_v0 = vadd.f32 %v3384_v57, %v3284_v33  ;;  %v3876_v57 = vld [vmem:[%s7513_s7 + $0x88] sm:$0xff] }
 0x26b   :  { %v3490_v3 = vmax.f32 %v3383_v2, 0.0  ;;  %v3459_v18 = vpop.f32.mrb[64].mxu1  ;;  %v3875_v2 = vld [vmem:[%s7513_s7 + $0x80] sm:$0xff] }
 0x26c   :  { %v3460_v37 = vadd.f32 %v3459_v18, %v3274_v14  ;;  %v3491_v61 = vmax.f32 %v3385_v0, 0.0  ;;  %v3461_v63 = vpop.f32.mrb[65].mxu1  ;;  %v3388_v48 = vpop.f32.mrb[70].mxu0  ;;  %v3859_v18 = vld [vmem:[%s7513_s7] sm:$0xff] }
 0x26d   :  { %v3462_v15 = vadd.f32 %v3461_v63, %v3274_v14  ;;  %v3389_v59 = vadd.f32 %v3388_v48, %v3289_v52  ;;  %v3390_v20 = vpop.f32.mrb[71].mxu0  ;;  %v3877_v63 = vld [vmem:[%s7513_s7 + $0x90] sm:$0xff]  ;;  %v3878_v48 = vld [vmem:[%s7513_s7 + $0x98] sm:$0xff] }
 0x26e   :  { %v3484_v49 = vmax.f32 %v3460_v37, 0.0  ;;  %v3500_v62 = vmax.f32 %v3490_v3, %v3491_v61  ;;  %v3391_v10 = vadd.f32 %v3390_v20, %v3289_v52  ;;  %v3860_v37 = vld [vmem:[%s7513_s7 + $0x8] sm:$0xff]  ;;  %v3861_v20 = vld [vmem:[%s7513_s7 + $0x10] sm:$0xff] }
 0x26f   :  { %v3485_v22 = vmax.f32 %v3462_v15, 0.0  ;;  %v3494_v7 = vmax.f32 %v3389_v59, 0.0  ;;  %v3465_v17 = vpop.f32.mrb[66].mxu1  ;;  %v5014_v61 = vpack.c.bf16 %v3860_v37, %v3859_v18  ;;  %v5016_v59 = vpack.c.bf16 %v3878_v48, %v3877_v63  ;;  %v3873_v18 = vld [vmem:[%s7513_s7 + $0x70] sm:$0xff]  ;;  %v3874_v37 = vld [vmem:[%s7513_s7 + $0x78] sm:$0xff] }
 0x270   :  { %v3466_v19 = vadd.f32 %v3465_v17, %v3279_v35  ;;  %v3495_v39 = vmax.f32 %v3391_v10, 0.0  ;;  %v3467_v47 = vpop.f32.mrb[67].mxu1  ;;  %v5042_v63 = vpack.c.bf16 %v3874_v37, %v3873_v18 }
 0x271   :  { %v3502_v51 = vmax.f32 %v3484_v49, %v3485_v22  ;;  %v3468_v16 = vadd.f32 %v3467_v47, %v3279_v35  ;;  %v3862_v49 = vld [vmem:[%s7513_s7 + $0x18] sm:$0xff]  ;;  %v3879_v22 = vld [vmem:[%s7513_s7 + $0xa0] sm:$0xff]  ;;  %v3864_v47 = vld [vmem:[%s7513_s7 + $0x28] sm:$0xff] }
 0x272   :  { %v3488_v53 = vmax.f32 %v3466_v19, 0.0  ;;  %v3501_v21 = vmax.f32 %v3494_v7, %v3495_v39  ;;  %v3880_v7 = vld [vmem:[%s7513_s7 + $0xa8] sm:$0xff]  ;;  %v3863_v39 = vld [vmem:[%s7513_s7 + $0x20] sm:$0xff] }
 0x273   :  { %v6947_v8 = vmax.f32 %v3498_v50, %v3502_v51  ;;  %v3489_v45 = vmax.f32 %v3468_v16, 0.0  ;;  %v3471_v9 = vpop.f32.mrb[68].mxu1  ;;  %v5020_v17 = vpack.c.bf16 %v3880_v7, %v3879_v22  ;;  %v5022_v51 = vpack.c.bf16 %v3864_v47, %v3863_v39  ;;  %v3881_v16 = vld [vmem:[%s7513_s7 + $0xb0] sm:$0xff]  ;;  %v3907_v22 = vld [vmem:[%s7513_s7 + $0x180] sm:$0xff]  ;;  %v3908_v7 = vld [vmem:[%s7513_s7 + $0x188] sm:$0xff] }
 0x274   :  { %v3472_v36 = vadd.f32 %v3471_v9, %v3284_v33  ;;  %v3473_v23 = vpop.f32.mrb[69].mxu1  ;;  %v3866_v9 = vld [vmem:[%s7513_s7 + $0x38] sm:$0xff]  ;;  %v3892_v39 = vld [vmem:[%s7513_s7 + $0x108] sm:$0xff]  ;;  %v3909_v47 = vld [vmem:[%s7513_s7 + $0x190] sm:$0xff] }
 0x275   :  { %v3503_v34 = vmax.f32 %v3488_v53, %v3489_v45  ;;  %v3474_v27 = vadd.f32 %v3473_v23, %v3284_v33  ;;  %v3882_v53 = vld [vmem:[%s7513_s7 + $0xb8] sm:$0xff]  ;;  %v3865_v45 = vld [vmem:[%s7513_s7 + $0x30] sm:$0xff]  ;;  %v3531_v23 = vrot.slane %v6947_v8, 6 }
 0x276   :  { %v3492_v32 = vmax.f32 %v3472_v36, 0.0  ;;  %v3527_v36 = vrot.slane %v6947_v8, 5 }
 0x277   :  { %v6949_v40 = vmax.f32 %v3499_v58, %v3503_v34  ;;  %v3493_v43 = vmax.f32 %v3474_v27, 0.0  ;;  %v3477_v29 = vpop.f32.mrb[70].mxu1  ;;  %v5012_v58 = vpack.c.bf16 %v3876_v57, %v3875_v2  ;;  %v5026_v34 = vpack.c.bf16 %v3866_v9, %v3865_v45  ;;  %v3883_v27 = vld [vmem:[%s7513_s7 + $0xc0] sm:$0xff]  ;;  %v3889_v2 = vld [vmem:[%s7513_s7 + $0xf0] sm:$0xff]  ;;  %v3890_v57 = vld [vmem:[%s7513_s7 + $0xf8] sm:$0xff] }
 0x278   :  { %v3478_v11 = vadd.f32 %v3477_v29, %v3289_v52  ;;  %v3479_v54 = vpop.f32.mrb[71].mxu1  ;;  %v3893_v9 = vld [vmem:[%s7513_s7 + $0x110] sm:$0xff] }
 0x279   :  { %v3504_v46 = vmax.f32 %v3492_v32, %v3493_v43  ;;  %v3480_v38 = vadd.f32 %v3479_v54, %v3289_v52  ;;  %5013 = vmatprep.subr.bf16.mxu0 %v5012_v58  ;;  %v3884_v32 = vld [vmem:[%s7513_s7 + $0xc8] sm:$0xff]  ;;  %v3535_v43 = vrot.slane %v6947_v8, 7 }
 0x27a   :  { %v3496_v1 = vmax.f32 %v3478_v11, 0.0  ;;  %5015 = vmatpush3.bf16.msra.mxu0 %v5014_v61  ;;  %v5028_v29 = vpack.c.bf16 %v3884_v32, %v3883_v27  ;;  %v3867_v11 = vld [vmem:[%s7513_s7 + $0x40] sm:$0xff]  ;;  %v3868_v54 = vld [vmem:[%s7513_s7 + $0x48] sm:$0xff] }
 0x27b   :  { %v6951_v31 = vmax.f32 %v3500_v62, %v3504_v46  ;;  %v3497_v44 = vmax.f32 %v3480_v38, 0.0  ;;  %v5018_v62 = vpack.c.bf16 %v3862_v49, %v3861_v20  ;;  %5017 = vmatprep.subr.bf16.mxu0 %v5016_v59  ;;  %v5202_v46 = vpack.i.bf16 %v3527_v36, %v3531_v23 }
 0x27c   :  { %v3511_v38 = vrot.slane %v6947_v8, 1  ;;  %v3555_v59 = vrot.slane %v6949_v40, 4  ;;  %v3559_v49 = vrot.slane %v6949_v40, 5 }
 0x27d   :  { %v3505_v41 = vmax.f32 %v3496_v1, %v3497_v44  ;;  %v5157_v5 = vpack.i.bf16 %v6947_v8, %v6951_v31  ;;  %v3602_v14 = vrot.slane %v6951_v31, 1  ;;  %v3606_v33 = vrot.slane %v6951_v31, 2 }
 0x27e   :  { %v3610_v60 = vrot.slane %v6951_v31, 3  ;;  %v3614_v24 = vrot.slane %v6951_v31, 4  ;;  %v3618_v13 = vrot.slane %v6951_v31, 5  ;;  %v3622_v35 = vrot.slane %v6951_v31, 6  ;;  %5019 = vmatpush3.bf16.msra.mxu0 %v5018_v62 }
 0x27f   :  { %v6958_v56 = vmax.f32 %v3501_v21, %v3505_v41  ;;  %5158 = vrot.lane.b32.xlu0 %v5157_v5, %s5304_s5  ;;  %v5162_v52 = vpack.i.bf16 %v3602_v14, %v3606_v33  ;;  %v3626_v42 = vrot.slane %v6951_v31, 7  ;;  %5021 = vmatprep.subr.bf16.mxu0 %v5020_v17  ;;  %v5024_v21 = vpack.c.bf16 %v3882_v53, %v3881_v16  ;;  %v3885_v41 = vld [vmem:[%s7513_s7 + $0xd0] sm:$0xff]  ;;  %v3886_v5 = vld [vmem:[%s7513_s7 + $0xd8] sm:$0xff]  ;;  %v3891_v17 = vld [vmem:[%s7513_s7 + $0x100] sm:$0xff] }
 0x280   :  { %v5167_v30 = vpack.i.bf16 %v3606_v33, %v3610_v60  ;;  %v5172_v28 = vpack.i.bf16 %v3614_v24, %v3618_v13  ;;  %v5177_v12 = vpack.i.bf16 %v3618_v13, %v3622_v35  ;;  %v5182_v6 = vpack.i.bf16 %v3610_v60, %v3614_v24  ;;  %v3869_v24 = vld [vmem:[%s7513_s7 + $0x50] sm:$0xff]  ;;  %v3870_v13 = vld [vmem:[%s7513_s7 + $0x58] sm:$0xff] }
 0x281   :  { %5163 = vrot.lane.b32.xlu1 %v5162_v52, %s5305_s24  ;;  %v5187_v50 = vpack.i.bf16 %v3622_v35, %v3626_v42  ;;  %v3638_v4 = vrot.slane %v6958_v56, 2  ;;  %v5192_v55 = vpack.i.bf16 %v3626_v42, %v6958_v56  ;;  %v3646_v25 = vrot.slane %v6958_v56, 4  ;;  %v3888_v42 = vld [vmem:[%s7513_s7 + $0xe8] sm:$0xff] }
 0x282   :  { %v3642_v26 = vrot.slane %v6958_v56, 3  ;;  %v3650_v0 = vrot.slane %v6958_v56, 5  ;;  %v3634_v3 = vrot.slane %v6958_v56, 1  ;;  %v3654_v10 = vrot.slane %v6958_v56, 6  ;;  %5023 = vmatpush3.bf16.msra.mxu0 %v5022_v51  ;;  %v3910_v51 = vld [vmem:[%s7513_s7 + $0x198] sm:$0xff] }
 0x283   :  { %5168 = vrot.lane.b32.xlu0 %v5167_v30, %s5306_s25  ;;  %v3658_v19 = vrot.slane %v6958_v56, 7  ;;  %5025 = vmatprep.subr.bf16.mxu0 %v5024_v21  ;;  %v3515_v1 = vrot.slane %v6947_v8, 2  ;;  %v5030_v44 = vpack.c.bf16 %v3868_v54, %v3867_v11  ;;  %v5207_v33 = vpack.i.bf16 %v3531_v23, %v3535_v43  ;;  %v3887_v30 = vld [vmem:[%s7513_s7 + $0xe0] sm:$0xff]  ;;  %v3913_v54 = vld [vmem:[%s7513_s7 + $0x1b0] sm:$0xff] }
 0x284   :  { %v5197_v15 = vpack.i.bf16 %v6958_v56, %v3634_v3  ;;  %v5032_v60 = vpack.c.bf16 %v3886_v5, %v3885_v41  ;;  %v3519_v52 = vrot.slane %v6947_v8, 3  ;;  %v5217_v35 = vpack.i.bf16 %v3535_v43, %v6949_v40  ;;  %v3911_v23 = vld [vmem:[%s7513_s7 + $0x1a0] sm:$0xff]  ;;  %v3897_v41 = vld [vmem:[%s7513_s7 + $0x130] sm:$0xff]  ;;  %v3898_v5 = vld [vmem:[%s7513_s7 + $0x138] sm:$0xff] }
 0x285   :  { %5173 = vrot.lane.b32.xlu1 %v5172_v28, %s5307_s26  ;;  %v5212_v56 = vpack.i.bf16 %v3511_v38, %v3515_v1  ;;  %v3543_v28 = vrot.slane %v6949_v40, 1  ;;  %v5252_v16 = vpack.i.bf16 %v3555_v59, %v3559_v49  ;;  %v3567_v53 = vrot.slane %v6949_v40, 7  ;;  %v3895_v43 = vld [vmem:[%s7513_s7 + $0x120] sm:$0xff] }
 0x286   :  { %5027 = vmatpush3.bf16.msra.mxu0 %v5026_v34  ;;  %v5046_v21 = vpack.c.bf16 %v3892_v39, %v3891_v17  ;;  %v5048_v45 = vpack.c.bf16 %v3910_v51, %v3909_v47  ;;  %v3912_v34 = vld [vmem:[%s7513_s7 + $0x1a8] sm:$0xff]  ;;  %v3922_v17 = vld [vmem:[%s7513_s7 + $0x1f8] sm:$0xff] }
 0x287   :  { %5178 = vrot.lane.b32.xlu0 %v5177_v12, %s5308_s27  ;;  %5029 = vmatprep.subr.bf16.mxu0 %v5028_v29  ;;  %v5034_v12 = vpack.c.bf16 %v3870_v13, %v3869_v24  ;;  %v5227_v58 = vpack.i.bf16 %v6949_v40, %v3543_v28  ;;  %v5052_v32 = vpack.c.bf16 %v3912_v34, %v3911_v23  ;;  %v3896_v29 = vld [vmem:[%s7513_s7 + $0x128] sm:$0xff]  ;;  %v3899_v24 = vld [vmem:[%s7513_s7 + $0x140] sm:$0xff]  ;;  %v3906_v47 = vld [vmem:[%s7513_s7 + $0x178] sm:$0xff] }
 0x288   :  { %v3900_v13 = vld [vmem:[%s7513_s7 + $0x148] sm:$0xff] }
 0x289   :  { %5183 = vrot.lane.b32.xlu1 %v5182_v6, %s5309_s28  ;;  %v3871_v6 = vld [vmem:[%s7513_s7 + $0x60] sm:$0xff] }
 0x28a   :  { %5031 = vmatpush3.bf16.msra.mxu0 %v5030_v44 }
 0x28b   :  { %5188 = vrot.lane.b32.xlu0 %v5187_v50, %s5310_s29  ;;  %5033 = vmatprep.subr.bf16.mxu0 %v5032_v60  ;;  %v3872_v50 = vld [vmem:[%s7513_s7 + $0x68] sm:$0xff] }
 0x28c   :  { %v3916_v60 = vld [vmem:[%s7513_s7 + $0x1c8] sm:$0xff] }
 0x28d   :  { %3785 = vrot.lane.b32.xlu1 %v3638_v4, %s5311_s30 }
 0x28e   :  { %5035 = vmatpush3.bf16.msra.mxu0 %v5034_v12 }
 0x28f   :  { %5193 = vrot.lane.b32.xlu0 %v5192_v55, %s5312_s0  ;;  %v5222_v55 = vpack.i.bf16 %v3515_v1, %v3519_v52  ;;  %v5054_v1 = vpack.c.bf16 %v3896_v29, %v3895_v43 }
 0x291   :  { %3791 = vrot.lane.b32.xlu1 %v3646_v25, %s5313_s6 }
 0x293   :  { %3788 = vrot.lane.b32.xlu0 %v3642_v26, %s5314_s14 }
 0x295   :  { %3643 = vrot.lane.b32.xlu1 %v3642_v26, %s5313_s6  ;;  %v5038_v26 = vpack.c.bf16 %v3872_v50, %v3871_v6  ;;  %v3902_v6 = vld [vmem:[%s7513_s7 + $0x158] sm:$0xff]  ;;  %v3919_v50 = vld [vmem:[%s7513_s7 + $0x1e0] sm:$0xff] }
 0x297   :  { %3639 = vrot.lane.b32.xlu0 %v3638_v4, %s5314_s14  ;;  %v5036_v4 = vpack.c.bf16 %v3888_v42, %v3887_v30  ;;  %v3917_v30 = vld [vmem:[%s7513_s7 + $0x1d0] sm:$0xff] }
 0x298   :  { %v3901_v42 = vld [vmem:[%s7513_s7 + $0x150] sm:$0xff] }
 0x299   :  { %3794 = vrot.lane.b32.xlu1 %v3650_v0, %s5315_s16  ;;  %5037 = vmatprep.subr.bf16.mxu0 %v5036_v4  ;;  %v3920_v4 = vld [vmem:[%s7513_s7 + $0x1e8] sm:$0xff] }
 0x29a   :  { %5039 = vmatpush3.bf16.msra.mxu0 %v5038_v26 }
 0x29b   :  { %3647 = vrot.lane.b32.xlu0 %v3646_v25, %s5315_s16  ;;  %v3523_v25 = vrot.slane %v6947_v8, 4 }
 0x29d   :  { %5198 = vrot.lane.b32.xlu1 %v5197_v15, %s5316_s15  ;;  %v5232_v61 = vpack.i.bf16 %v3519_v52, %v3523_v25  ;;  %v3551_v15 = vrot.slane %v6949_v40, 3 }
 0x29f   :  { %3797 = vrot.lane.b32.xlu0 %v3654_v10, %s5317_s21  ;;  %v5247_v62 = vpack.i.bf16 %v3551_v15, %v3555_v59 }
 0x2a1   :  { %3651 = vrot.lane.b32.xlu1 %v3650_v0, %s5317_s21  ;;  %v3547_v0 = vrot.slane %v6949_v40, 2 }
 0x2a3   :  { %3800 = vrot.lane.b32.xlu0 %v3658_v19, %s5318_s2  ;;  %v5237_v48 = vpack.i.bf16 %v3543_v28, %v3547_v0  ;;  %v5242_v20 = vpack.i.bf16 %v3551_v15, %v3547_v0  ;;  %v5062_v28 = vpack.c.bf16 %v3900_v13, %v3899_v24 }
 0x2a5   :  { %3635 = vrot.lane.b32.xlu1 %v3634_v3, %s5311_s30  ;;  %v5040_v3 = vpack.c.bf16 %v3890_v57, %v3889_v2 }
 0x2a7   :  { %3655 = vrot.lane.b32.xlu0 %v3654_v10, %s5318_s2  ;;  %5041 = vmatprep.subr.bf16.mxu0 %v5040_v3  ;;  %v3563_v10 = vrot.slane %v6949_v40, 6 }
 0x2a8   :  { %5043 = vmatpush3.bf16.msra.mxu0 %v5042_v63  ;;  %v3904_v63 = vld [vmem:[%s7513_s7 + $0x168] sm:$0xff] }
 0x2a9   :  { %3659 = vrot.lane.b32.xlu1 %v3658_v19, %s5319_s17  ;;  %v5044_v19 = vpack.c.bf16 %v3908_v7, %v3907_v22  ;;  %v5257_v40 = vpack.i.bf16 %v3559_v49, %v3563_v10  ;;  %v5262_v11 = vpack.i.bf16 %v3563_v10, %v3567_v53  ;;  %v3940_v49 = vld [vmem:[%s7513_s7 + $0x288] sm:$0xff]  ;;  %v3921_v7 = vld [vmem:[%s7513_s7 + $0x1f0] sm:$0xff] }
 0x2ab   :  { %3709 = vrot.lane.b32.xlu0 %v3527_v36, %s5307_s26  ;;  %v3894_v36 = vld [vmem:[%s7513_s7 + $0x118] sm:$0xff]  ;;  %5045 = vmatprep.subr.bf16.mxu1 %v5044_v19  ;;  %v3905_v19 = vld [vmem:[%s7513_s7 + $0x170] sm:$0xff] }
 0x2ac   :  { %5047 = vmatpush3.bf16.msra.mxu1 %v5046_v21  ;;  %v5050_v27 = vpack.c.bf16 %v3894_v36, %v3893_v9 }
 0x2ad   :  { %5203 = vrot.lane.b32.xlu1 %v5202_v46, %s5308_s27  ;;  %5049 = vmatprep.subr.bf16.mxu1 %v5048_v45  ;;  %v3914_v46 = vld [vmem:[%s7513_s7 + $0x1b8] sm:$0xff] }
 0x2ae   :  { %v5056_v44 = vpack.c.bf16 %v3914_v46, %v3913_v54 }
 0x2af   :  { %5208 = vrot.lane.b32.xlu0 %v5207_v33, %s5310_s29  ;;  %v3915_v33 = vld [vmem:[%s7513_s7 + $0x1c0] sm:$0xff] }
 0x2b0   :  { %5051 = vmatpush3.bf16.msra.mxu1 %v5050_v27  ;;  %v5060_v52 = vpack.c.bf16 %v3916_v60, %v3915_v33 }
 0x2b1   :  { %5213 = vrot.lane.b32.xlu1 %v5212_v56, %s5305_s24  ;;  %5053 = vmatprep.subr.bf16.mxu1 %v5052_v32  ;;  %v5058_v56 = vpack.c.bf16 %v3898_v5, %v3897_v41 }
 0x2b3   :  { %5218 = vrot.lane.b32.xlu0 %v5217_v35, %s5312_s0  ;;  %v3918_v35 = vld [vmem:[%s7513_s7 + $0x1d8] sm:$0xff] }
 0x2b4   :  { %5055 = vmatpush3.bf16.msra.mxu1 %v5054_v1  ;;  %v5064_v12 = vpack.c.bf16 %v3918_v35, %v3917_v30 }
 0x2b5   :  { %5223 = vrot.lane.b32.xlu1 %v5222_v55, %s5306_s25  ;;  %5057 = vmatprep.subr.bf16.mxu1 %v5056_v44  ;;  %v5066_v55 = vpack.c.bf16 %v3902_v6, %v3901_v42  ;;  %s5323_s25 = smov [#allocation2]  }
 0x2b7   :  { %5228 = vrot.lane.b32.xlu0 %v5227_v58, %s5316_s15 }
 0x2b8   :  { %5059 = vmatpush3.bf16.msra.mxu1 %v5058_v56 }
 0x2b9   :  { %5233 = vrot.lane.b32.xlu1 %v5232_v61, %s5309_s28  ;;  %5061 = vmatprep.subr.bf16.mxu1 %v5060_v52  ;;  %v3903_v61 = vld [vmem:[%s7513_s7 + $0x160] sm:$0xff] }
 0x2bb   :  { %5238 = vrot.lane.b32.xlu0 %v5237_v48, %s5311_s30  ;;  %v3939_v48 = vld [vmem:[%s7513_s7 + $0x280] sm:$0xff] }
 0x2bc   :  { %5063 = vmatpush3.bf16.msra.mxu1 %v5062_v28  ;;  %v5076_v22 = vpack.c.bf16 %v3940_v49, %v3939_v48 }
 0x2bd   :  { %3524 = vrot.lane.b32.xlu1 %v3523_v25, %s5307_s26  ;;  %5065 = vmatprep.subr.bf16.mxu1 %v5064_v12  ;;  %v5068_v25 = vpack.c.bf16 %v3920_v4, %v3919_v50 }
 0x2be   :  { %5077 = vmatprep.subr.bf16.mxu0 %v5076_v22 }
 0x2bf   :  { %5243 = vrot.lane.b32.xlu0 %v5242_v20, %s5314_s14 }
 0x2c0   :  { %5067 = vmatpush3.bf16.msra.mxu1 %v5066_v55 }
 0x2c1   :  { %5248 = vrot.lane.b32.xlu1 %v5247_v62, %s5313_s6  ;;  %5069 = vmatprep.subr.bf16.mxu1 %v5068_v25  ;;  %v5321_v25 = vmov 0.0|0.0  }
 0x2c3   :  { %5253 = vrot.lane.b32.xlu0 %v5252_v16, %s5315_s16 }
 0x2c5   :  { %5258 = vrot.lane.b32.xlu1 %v5257_v40, %s5317_s21 }
 0x2c7   :  { %5263 = vrot.lane.b32.xlu0 %v5262_v11, %s5318_s2 }
 0x2cb   :  { %3568 = vrot.lane.b32.xlu0 %v3567_v53, %s5319_s17  ;;  %v5074_v53 = vpack.c.bf16 %v3906_v47, %v3905_v19  ;;  %s5320_s17 = smov 16  }
 0x2f1   :  { %v7204_v26 = vpop.permute.xlu0 %5158 }
 0x2f2   :  { %v5160_v2 = vunpack.i.l.bf16 %v7204_v26 }
 0x2f3   :  { %v5164_v57 = vpop.permute.xlu1 %5163 }
 0x2f4   :  { %v5166_v0 = vunpack.i.h.bf16 %v5164_v57  ;;  %v5165_v3 = vunpack.i.l.bf16 %v5164_v57  ;;  %v3803_v18 = vsel %vm3571_vm5, %v5160_v2, %v3602_v14  ;;  %v5070_v14 = vpack.c.bf16 %v3904_v63, %v3903_v61 }
 0x2f5   :  { %v5169_v58 = vpop.permute.xlu0 %5168 }
 0x2f6   :  { %v5171_v15 = vunpack.i.h.bf16 %v5169_v58  ;;  %v5170_v59 = vunpack.i.l.bf16 %v5169_v58  ;;  %v3662_v62 = vsel %vm3571_vm5, %v6951_v31, %v5166_v0  ;;  %v3804_v10 = vsel %vm3573_vm6, %v3803_v18, %v5165_v3  ;;  %5071 = vmatpush3.bf16.msra.mxu1 %v5070_v14 }
 0x2f7   :  { %v7210_v37 = vpop.permute.xlu1 %5173  ;;  %v5072_v31 = vpack.c.bf16 %v3922_v17, %v3921_v7 }
 0x2f8   :  { %v3663_v21 = vsel %vm3573_vm6, %v3662_v62, %v5171_v15  ;;  %v3805_v45 = vsel %vm3575_vm7, %v3804_v10, %v5170_v59  ;;  %v5176_v9 = vunpack.i.h.bf16 %v7210_v37  ;;  %v5175_v36 = vunpack.i.l.bf16 %v7210_v37 }
 0x2f9   :  { %v7221_v20 = vpop.permute.xlu0 %5178  ;;  %5073 = vmatprep.subr.bf16.mxu1 %v5072_v31 }
 0x2fa   :  { %v5181_v34 = vunpack.i.h.bf16 %v7221_v20  ;;  %5075 = vmatpush3.bf16.msra.mxu1 %v5074_v53  ;;  %v5180_v56 = vunpack.i.l.bf16 %v7221_v20 }
 0x2fb   :  { %v5184_v39 = vpop.permute.xlu1 %5183  ;;  %5108 = vmatprep.subr.bf16.mxu1 %v5321_v25 }
 0x2fc   :  { %v5186_v51 = vunpack.i.h.bf16 %v5184_v39  ;;  %v5185_v16 = vunpack.i.l.bf16 %v5184_v39  ;;  %v3808_v6 = vsel %vm3581_vm11, %v5175_v36, %v5180_v56 }
 0x2fd   :  { %v5189_v23 = vpop.permute.xlu0 %5188 }
 0x2fe   :  { %v3664_v40 = vsel %vm3575_vm7, %v3663_v21, %v5186_v51  ;;  %v3806_v27 = vsel %vm3577_vm8, %v3805_v45, %v5185_v16  ;;  %v5190_v24 = vunpack.i.l.bf16 %v5189_v23  ;;  %v5191_v30 = vunpack.i.h.bf16 %v5189_v23 }
 0x2ff   :  { %v3786_v32 = vpop.permute.xlu1 %3785  ;;  %v3665_v43 = vsel %vm3577_vm8, %v3664_v40, %v5176_v9  ;;  %v3807_v29 = vsel %vm3579_vm9, %v3806_v27, %v5175_v36  ;;  %v5161_v45 = vunpack.i.h.bf16 %v7204_v26 }
 0x300   :  { %v3666_v11 = vsel %vm3579_vm9, %v3665_v43, %v5181_v34  ;;  %v3809_v2 = vsel %vm3583_vm12, %v3808_v6, %v5190_v24  ;;  %v3667_v58 = vsel %vm3581_vm11, %v5181_v34, %v5191_v30 }
 0x301   :  { %v5194_v54 = vpop.permute.xlu0 %5193  ;;  %v5267_v46 = vpack.i.bf16 %v3666_v11, %v3807_v29  ;;  %v3742_v11 = vsel %vm3571_vm5, %v5161_v45, %v3511_v38 }
 0x302   :  { %v5195_v35 = vunpack.i.l.bf16 %v5194_v54  ;;  %v5196_v12 = vunpack.i.h.bf16 %v5194_v54 }
 0x303   :  { %v3792_v1 = vpop.permute.xlu1 %3791  ;;  %5268 = vrot.lane.b32.xlu1 %v5267_v46, %s5320_s17 }
 0x304   :  { %v3810_v0 = vsel %vm3585_vm13, %v3809_v2, %v5195_v35  ;;  %v3668_v37 = vsel %vm3583_vm12, %v3667_v58, %v5196_v12  ;;  %v3924_v58 = vld [vmem:[%s7513_s7 + $0x208] sm:$0xff] }
 0x305   :  { %v3789_v44 = vpop.permute.xlu0 %3788 }
 0x306   :  { %v3813_v13 = vsel %vm3591_vm10, %v3786_v32, %v3789_v44 }
 0x307   :  { %v3644_v41 = vpop.permute.xlu1 %3643  ;;  %v3814_v50 = vsel %vm3593_vm14, %v3813_v13, %v3792_v1 }
 0x309   :  { %v3640_v5 = vpop.permute.xlu0 %3639 }
 0x30a   :  { %v3672_v20 = vsel %vm3591_vm10, %v3640_v5, %v3644_v41 }
 0x30b   :  { %v3795_v33 = vpop.permute.xlu1 %3794 }
 0x30c   :  { %v3815_v57 = vsel %vm3595_vm15, %v3814_v50, %v3795_v33 }
 0x30d   :  { %v3648_v60 = vpop.permute.xlu0 %3647 }
 0x30e   :  { %v3673_v10 = vsel %vm3593_vm14, %v3672_v20, %v3648_v60 }
 0x30f   :  { %v5199_v52 = vpop.permute.xlu1 %5198 }
 0x310   :  { %v5200_v42 = vunpack.i.l.bf16 %v5199_v52  ;;  %v5201_v4 = vunpack.i.h.bf16 %v5199_v52 }
 0x311   :  { %v3798_v28 = vpop.permute.xlu0 %3797 }
 0x312   :  { %v3816_v3 = vsel %vm3597_vm1, %v3815_v57, %v3798_v28  ;;  %v3811_v63 = vsel %vm3587_vm2, %v3810_v0, %v5200_v42  ;;  %v3669_v15 = vsel %vm3585_vm13, %v3668_v37, %v5201_v4  ;;  %v3923_v57 = vld [vmem:[%s7513_s7 + $0x200] sm:$0xff] }
 0x313   :  { %v3652_v55 = vpop.permute.xlu1 %3651  ;;  %v3812_v62 = vsel %vm3589_vm4, %v3811_v63, %v3786_v32 }
 0x314   :  { %v3674_v7 = vsel %vm3595_vm15, %v3673_v10, %v3652_v55 }
 0x315   :  { %v3801_v18 = vpop.permute.xlu0 %3800 }
 0x316   :  { %v3817_v61 = vsel %vm3599_vm3, %v3816_v3, %v3801_v18 }
 0x317   :  { %v3636_v48 = vpop.permute.xlu1 %3635  ;;  %3825 = vrot.lane.b32.xlu0 %v3817_v61, %s5320_s17 }
 0x318   :  { %v3670_v59 = vsel %vm3587_vm2, %v3669_v15, %v3636_v48  ;;  %v3941_v15 = vld [vmem:[%s7513_s7 + $0x290] sm:$0xff] }
 0x319   :  { %v3671_v14 = vsel %vm3589_vm4, %v3670_v59, %v3640_v5  ;;  %v3656_v49 = vpop.permute.xlu0 %3655  ;;  %v3942_v59 = vld [vmem:[%s7513_s7 + $0x298] sm:$0xff] }
 0x31a   :  { %v5272_v22 = vpack.i.bf16 %v3671_v14, %v3812_v62  ;;  %v3675_v19 = vsel %vm3597_vm1, %v3674_v7, %v3656_v49  ;;  %v5078_v62 = vpack.c.bf16 %v3924_v58, %v3923_v57  ;;  %v3949_v57 = vld [vmem:[%s7513_s7 + $0x2d0] sm:$0xff]  ;;  %v3950_v58 = vld [vmem:[%s7513_s7 + $0x2d8] sm:$0xff] }
 0x31b   :  { %v3660_v17 = vpop.permute.xlu1 %3659  ;;  %3827 = vrot.lane.b32.xlu0 %v3801_v18, %s5320_s17 }
 0x31c   :  { %5273 = vrot.lane.b32.xlu1 %v5272_v22, %s5320_s17  ;;  %v3676_v47 = vsel %vm3599_vm3, %v3675_v19, %v3660_v17  ;;  %v3925_v19 = vld [vmem:[%s7513_s7 + $0x210] sm:$0xff] }
 0x31d   :  { %v3710_v39 = vpop.permute.xlu0 %3709 }
 0x31f   :  { %v5204_v31 = vpop.permute.xlu1 %5203 }
 0x320   :  { %3684 = vrot.lane.b32.xlu1 %v3676_v47, %s5320_s17  ;;  %v5205_v53 = vunpack.i.l.bf16 %v5204_v31  ;;  %v5206_v54 = vunpack.i.h.bf16 %v5204_v31 }
 0x321   :  { %v5209_v51 = vpop.permute.xlu0 %5208 }
 0x322   :  { %v5210_v9 = vunpack.i.l.bf16 %v5209_v51  ;;  %v3747_v23 = vsel %vm3581_vm11, %v3710_v39, %v5205_v53  ;;  %v5211_v46 = vunpack.i.h.bf16 %v5209_v51 }
 0x323   :  { %v5214_v16 = vpop.permute.xlu1 %5213 }
 0x324   :  { %3686 = vrot.lane.b32.xlu1 %v3660_v17, %s5320_s17  ;;  %v5216_v34 = vunpack.i.h.bf16 %v5214_v16  ;;  %v5215_v40 = vunpack.i.l.bf16 %v5214_v16  ;;  %v3748_v1 = vsel %vm3583_vm12, %v3747_v23, %v5210_v9  ;;  %v3582_v4 = vsel %vm3581_vm11, %v5206_v54, %v5211_v46  ;;  %v3944_v23 = vld [vmem:[%s7513_s7 + $0x2a8] sm:$0xff]  ;;  %v3927_v46 = vld [vmem:[%s7513_s7 + $0x220] sm:$0xff]  ;;  %s4433_s17 = sshll.u32 %s5323_s25, 4  ;;  %s4434_s17 = int_to_ptr.vmem [resolvable:$true] %s4433_s17 }
 0x325   :  { %v5219_v21 = vpop.permute.xlu0 %5218  ;;  %v5080_v16 = vpack.c.bf16 %v3942_v59, %v3941_v15  ;;  %v3935_v59 = vld [vmem:[%s7513_s7 + $0x260] sm:$0xff]  ;;  %p5282_p1 = scmp.lt.s32.totalorder %s4434_s17, %s4434_s17 }
 0x326   :  { %v5220_v27 = vunpack.i.l.bf16 %v5219_v21  ;;  %v3572_v41 = vsel %vm3571_vm5, %v6947_v8, %v5216_v34  ;;  %v3743_v5 = vsel %vm3573_vm6, %v3742_v11, %v5215_v40  ;;  %v5221_v56 = vunpack.i.h.bf16 %v5219_v21 }
 0x327   :  { %v5224_v36 = vpop.permute.xlu1 %5223 }
 0x328   :  { %v5226_v32 = vunpack.i.h.bf16 %v5224_v36  ;;  %v5225_v43 = vunpack.i.l.bf16 %v5224_v36  ;;  %v3749_v52 = vsel %vm3585_vm13, %v3748_v1, %v5220_v27  ;;  %v3584_v0 = vsel %vm3583_vm12, %v3582_v4, %v5221_v56  ;;  %v3943_v36 = vld [vmem:[%s7513_s7 + $0x2a0] sm:$0xff]  ;;  %v3928_v1 = vld [vmem:[%s7513_s7 + $0x228] sm:$0xff] }
 0x329   :  { %v5229_v29 = vpop.permute.xlu0 %5228  ;;  %vm3966_vm12 = vcmask 261120  }
 0x32a   :  { %v5230_v44 = vunpack.i.l.bf16 %v5229_v29  ;;  %v3744_v24 = vsel %vm3575_vm7, %v3743_v5, %v5225_v43  ;;  %v3574_v38 = vsel %vm3573_vm6, %v3572_v41, %v5226_v32  ;;  %v5231_v30 = vunpack.i.h.bf16 %v5229_v29 }
 0x32b   :  { %v5234_v26 = vpop.permute.xlu1 %5233  ;;  %vm5322_vm6 = vmmov 0  }
 0x32c   :  { %v5236_v33 = vunpack.i.h.bf16 %v5234_v26  ;;  %v5235_v60 = vunpack.i.l.bf16 %v5234_v26  ;;  %v3750_v8 = vsel %vm3587_vm2, %v3749_v52, %v5230_v44  ;;  %v3586_v37 = vsel %vm3585_vm13, %v3584_v0, %v5231_v30 }
 0x32d   :  { %v5239_v13 = vpop.permute.xlu0 %5238 }
 0x32e   :  { %v3745_v35 = vsel %vm3577_vm8, %v3744_v24, %v5235_v60  ;;  %v5240_v28 = vunpack.i.l.bf16 %v5239_v13  ;;  %v3576_v12 = vsel %vm3575_vm7, %v3574_v38, %v5236_v33  ;;  %v5241_v6 = vunpack.i.h.bf16 %v5239_v13  ;;  %v3945_v33 = vld [vmem:[%s7513_s7 + $0x2b0] sm:$0xff]  ;;  %v3946_v60 = vld [vmem:[%s7513_s7 + $0x2b8] sm:$0xff] }
 0x32f   :  { %v3746_v42 = vsel %vm3579_vm9, %v3745_v35, %v3710_v39  ;;  %v3525_v50 = vpop.permute.xlu1 %3524  ;;  %v3926_v39 = vld [vmem:[%s7513_s7 + $0x218] sm:$0xff]  ;;  %v5086_v24 = vpack.c.bf16 %v3928_v1, %v3927_v46  ;;  %v5088_v30 = vpack.c.bf16 %v3946_v60, %v3945_v33  ;;  %v3929_v35 = vld [vmem:[%s7513_s7 + $0x230] sm:$0xff] }
 0x330   :  { %v3751_v55 = vsel %vm3589_vm4, %v3750_v8, %v5240_v28  ;;  %v3578_v2 = vsel %vm3577_vm8, %v3576_v12, %v3525_v50  ;;  %v3838_v3 = vrot.slane %v3746_v42, 7  ;;  %v3588_v14 = vsel %vm3587_vm2, %v3586_v37, %v5241_v6  ;;  %v3947_v8 = vld [vmem:[%s7513_s7 + $0x2c0] sm:$0xff]  ;;  %v3948_v42 = vld [vmem:[%s7513_s7 + $0x2c8] sm:$0xff]  ;;  %v3934_v37 = vld [vmem:[%s7513_s7 + $0x258] sm:$0xff] }
 0x331   :  { %v5244_v18 = vpop.permute.xlu0 %5243  ;;  %v3580_v61 = vsel %vm3579_vm9, %v3578_v2, %v5206_v54  ;;  %v3839_v49 = vrot.slane %v3751_v55, 7  ;;  %v5082_v40 = vpack.c.bf16 %v3926_v39, %v3925_v19  ;;  %v5084_v54 = vpack.c.bf16 %v3944_v23, %v3943_v36  ;;  %v3931_v55 = vld [vmem:[%s7513_s7 + $0x240] sm:$0xff]  ;;  %v3932_v2 = vld [vmem:[%s7513_s7 + $0x248] sm:$0xff]  ;;  %v3957_v36 = vld [vmem:[%s7513_s7 + $0x310] sm:$0xff] }
 0x332   :  { %v5246_v63 = vunpack.i.h.bf16 %v5244_v18  ;;  %v5245_v48 = vunpack.i.l.bf16 %v5244_v18  ;;  %v3852_v51 = vsel %vm194_vm0, %v3580_v61, %v3838_v3  ;;  %v5092_v4 = vpack.c.bf16 %v3948_v42, %v3947_v8  ;;  %v3933_v18 = vld [vmem:[%s7513_s7 + $0x250] sm:$0xff]  ;;  %v3951_v61 = vld [vmem:[%s7513_s7 + $0x2e0] sm:$0xff]  ;;  %v3958_v23 = vld [vmem:[%s7513_s7 + $0x318] sm:$0xff] }
 0x333   :  { %v5249_v20 = vpop.permute.xlu1 %5248  ;;  %v5094_v0 = vpack.c.bf16 %v3932_v2, %v3931_v55  ;;  %v5096_v3 = vpack.c.bf16 %v3950_v58, %v3949_v57  ;;  %v4254_v8 = vld [vmem:[%s7515_s9 + $0x18] sm:$0xff] }
 0x334   :  { %v3752_v10 = vsel %vm3591_vm10, %v5240_v28, %v5246_v63  ;;  %v5251_v22 = vunpack.i.h.bf16 %v5249_v20  ;;  %v5250_v7 = vunpack.i.l.bf16 %v5249_v20  ;;  %v3590_v17 = vsel %vm3589_vm4, %v3588_v14, %v5245_v48  ;;  %v3930_v28 = vld [vmem:[%s7513_s7 + $0x238] sm:$0xff]  ;;  %v3952_v63 = vld [vmem:[%s7513_s7 + $0x2e8] sm:$0xff]  ;;  %v3953_v14 = vld [vmem:[%s7513_s7 + $0x2f0] sm:$0xff] }
 0x335   :  { %v5254_v31 = vpop.permute.xlu0 %5253  ;;  %v3853_v47 = vsel %vm194_vm0, %v3590_v17, %v3839_v49  ;;  %v5090_v50 = vpack.c.bf16 %v3930_v28, %v3929_v35  ;;  %v5100_v15 = vpack.c.bf16 %v3952_v63, %v3951_v61  ;;  %v3936_v20 = vld [vmem:[%s7513_s7 + $0x268] sm:$0xff]  ;;  %v3954_v49 = vld [vmem:[%s7513_s7 + $0x2f8] sm:$0xff]  ;;  %vm7719_vm4 = vcmask 130048   ;;  %v4253_v28 = vld [vmem:[%s7515_s9 + $0x10] sm:$0xff] }
 0x336   :  { %v3592_v53 = vsel %vm3591_vm10, %v5245_v48, %v5251_v22  ;;  %v3753_v21 = vsel %vm3593_vm14, %v3752_v10, %v5250_v7  ;;  %v5256_v45 = vunpack.i.h.bf16 %v5254_v31  ;;  %v5255_v9 = vunpack.i.l.bf16 %v5254_v31  ;;  %4034 = vmatprep.mubr.f32.mxu0 %v3853_v47  ;;  %v3937_v22 = vld [vmem:[%s7513_s7 + $0x270] sm:$0xff]  ;;  %v3938_v7 = vld [vmem:[%s7513_s7 + $0x278] sm:$0xff]  ;;  %v3955_v47 = vld [vmem:[%s7513_s7 + $0x300] sm:$0xff] }
 0x337   :  { %v5259_v34 = vpop.permute.xlu1 %5258  ;;  %4035 = vmatmul.mubr.f32.vlgmr.msra.gmra.mrb[72].mxu0 %v3852_v51  ;;  %v5098_v48 = vpack.c.bf16 %v3934_v37, %v3933_v18  ;;  %v5104_v10 = vpack.c.bf16 %v3954_v49, %v3953_v14  ;;  %v5106_v17 = vpack.c.bf16 %v3938_v7, %v3937_v22  ;;  %v3956_v51 = vld [vmem:[%s7513_s7 + $0x308] sm:$0xff]  ;;  %vm7720_vm5 = vmmov %vm7719_vm4  ;;  %v5118_v42 = vpack.c.bf16 %v4254_v8, %v4253_v28  ;;  %v4258_v2 = vld [vmem:[%s7515_s9 + $0x38] sm:$0xff] }
 0x338   :  { %v3594_v27 = vsel %vm3593_vm14, %v3592_v53, %v5256_v45  ;;  %v3754_v32 = vsel %vm3595_vm15, %v3753_v21, %v5255_v9  ;;  %v5261_v43 = vunpack.i.h.bf16 %v5259_v34  ;;  %v5260_v29 = vunpack.i.l.bf16 %v5259_v34  ;;  %5079 = vmatpush3.bf16.msra.mxu0 %v5078_v62  ;;  %vm7722_vm7 = vmmov %vm7719_vm4  ;;  %v4252_v35 = vld [vmem:[%s7515_s9 + $0x8] sm:$0xff]  ;;  %v4577_v18 = vld [vmem:[%s7514_s8] ss:$0 sm:$0xff] }
 0x339   :  { %v7334_v11 = vpop.permute.xlu0 %5263  ;;  %5081 = vmatprep.subr.bf16.mxu0 %v5080_v16  ;;  %v5102_v62 = vpack.c.bf16 %v3936_v20, %v3935_v59  ;;  %v5109_v45 = vpack.c.bf16 %v3956_v51, %v3955_v47  ;;  %v5112_v34 = vpack.c.bf16 %v3958_v23, %v3957_v36  ;;  %vm7723_vm8 = vmmov %vm7719_vm4  ;;  %v4341_v22 = vld [vmem:[%s7517_s11] sm:$0xff]  ;;  %v4342_v7 = vld [vmem:[%s7517_s11 + $0x8] sm:$0xff]  ;;  %vm4425_vm14 = vcmask 74752  }
 0x33a   :  { %v3755_v44 = vsel %vm3597_vm1, %v3754_v32, %v5260_v29  ;;  %v5266_v26 = vunpack.i.h.bf16 %v7334_v11  ;;  %v5265_v41 = vunpack.i.l.bf16 %v7334_v11  ;;  %v3596_v5 = vsel %vm3595_vm15, %v3594_v27, %v5261_v43  ;;  %vm7724_vm9 = vmmov %vm7719_vm4  ;;  %v4344_v47 = vld [vmem:[%s7517_s11 + $0x18] sm:$0xff] }
 0x33b   :  { %vm7725_vm10 = vmmov %vm7719_vm4 }
 0x33c   :  { %v3756_v56 = vsel %vm3599_vm3, %v3755_v44, %v5265_v41  ;;  %v3598_v52 = vsel %vm3597_vm1, %v3596_v5, %v5266_v26  ;;  %5083 = vmatpush3.bf16.msra.mxu0 %v5082_v40  ;;  %v7721_v40 = vmov 0.0   ;;  %vm7726_vm11 = vmmov %vm7719_vm4 }
 0x33d   :  { %v3840_v13 = vrot.slane %v3756_v56, 7  ;;  %v3569_v38 = vpop.permute.xlu0 %3568  ;;  %5085 = vmatprep.subr.bf16.mxu0 %v5084_v54  ;;  %vm7727_vm13 = vmmov %vm7719_vm4 }
 0x33e   :  { %v3600_v12 = vsel %vm3599_vm3, %v3598_v52, %v3569_v38 }
 0x33f   :  { %v3854_v6 = vsel %vm194_vm0, %v3600_v12, %v3840_v13 }
 0x340   :  { %5087 = vmatpush3.bf16.msra.mxu0 %v5086_v24 }
 0x341   :  { %5089 = vmatprep.subr.bf16.mxu0 %v5088_v30  ;;  %v4251_v30 = vld [vmem:[%s7515_s9] sm:$0xff] }
 0x342   :  { %v5115_v12 = vpack.c.bf16 %v4252_v35, %v4251_v30 }
 0x344   :  { %5091 = vmatpush3.bf16.msra.mxu0 %v5090_v50  ;;  %v4256_v50 = vld [vmem:[%s7515_s9 + $0x28] sm:$0xff] }
 0x345   :  { %5093 = vmatprep.subr.bf16.mxu0 %v5092_v4  ;;  %v4257_v4 = vld [vmem:[%s7515_s9 + $0x30] sm:$0xff] }
 0x346   :  { %v5124_v57 = vpack.c.bf16 %v4258_v2, %v4257_v4 }
 0x348   :  { %5095 = vmatpush3.bf16.msra.mxu0 %v5094_v0 }
 0x349   :  { %5097 = vmatprep.subr.bf16.mxu0 %v5096_v3 }
 0x34c   :  { %5099 = vmatpush3.bf16.msra.mxu0 %v5098_v48 }
 0x34d   :  { %5101 = vmatprep.subr.bf16.mxu0 %v5100_v15 }
 0x350   :  { %5103 = vmatpush3.bf16.msra.mxu0 %v5102_v62 }
 0x351   :  { %5105 = vmatprep.subr.bf16.mxu0 %v5104_v10 }
 0x354   :  { %5107 = vmatpush3.bf16.msra.mxu0 %v5106_v17 }
 0x375   :  { %v5269_v19 = vpop.permute.xlu1 %5268 }
 0x376   :  { %v5271_v39 = vunpack.i.h.bf16 %v5269_v19  ;;  %v5270_v31 = vunpack.i.l.bf16 %v5269_v19  ;;  %v5127_v19 = vpack.c.bf16 %v4342_v7, %v4341_v22 }
 0x378   :  { %v3833_v16 = vsel %vm7719_vm4, %v5265_v41, %v5270_v31  ;;  %v3695_v21 = vsel %vm7720_vm5, %v3569_v38, %v5271_v39 }
 0x379   :  { %v3841_v53 = vrot.slane %v3833_v16, 7  ;;  %v4579_v16 = vld [vmem:[%s7516_s10] ss:$0 sm:$0xff] }
 0x37b   :  { %v3855_v9 = vsel %vm194_vm0, %v3695_v21, %v3841_v53 }
 0x37c   :  { %4104 = vmatprep.mubr.f32.mxu1 %v3855_v9 }
 0x37d   :  { %4105 = vmatmul.mubr.f32.vlgmr.msra.gmra.mrb[72].mxu1 %v3854_v6  ;;  %v4255_v6 = vld [vmem:[%s7515_s9 + $0x20] sm:$0xff] }
 0x37e   :  { %5110 = vmatpush3.bf16.msra.mxu1 %v5109_v45  ;;  %4715 = vmatprep.mubr.msk.f32.mxu1 %vm5322_vm6, %v7721_v40  ;;  %v5121_v55 = vpack.c.bf16 %v4256_v50, %v4255_v6 }
 0x37f   :  { %5111 = vmatprep.subr.bf16.mxu1 %v5321_v25 }
 0x382   :  { %5113 = vmatpush3.bf16.msra.mxu1 %v5112_v34 }
 0x383   :  { %5114 = vmatprep.subr.bf16.mxu1 %v5321_v25 }
 0x389   :  { %v3826_v27 = vpop.permute.xlu0 %3825 }
 0x38d   :  { %v3828_v11 = vpop.permute.xlu0 %3827 }
 0x38e   :  { %v5274_v32 = vpop.permute.xlu1 %5273  ;;  %v3831_v41 = vsel %vm7724_vm9, %v3826_v27, %v3828_v11 }
 0x38f   :  { %v5276_v43 = vunpack.i.h.bf16 %v5274_v32  ;;  %v5275_v29 = vunpack.i.l.bf16 %v5274_v32  ;;  %v3844_v52 = vrot.slane %v3831_v41, 7 }
 0x391   :  { %v3829_v54 = vsel %vm7722_vm7, %v5270_v31, %v5275_v29  ;;  %v3830_v46 = vsel %vm7723_vm8, %v5275_v29, %v3826_v27  ;;  %v3688_v33 = vsel %vm7726_vm11, %v5271_v39, %v5276_v43  ;;  %v4343_v31 = vld [vmem:[%s7517_s11 + $0x10] sm:$0xff]  ;;  %s5277_s11 = scalar_lea.vmem %s4434_s17, 32 }
 0x392   :  { %v3842_v1 = vrot.slane %v3829_v54, 7  ;;  %v3685_v44 = vpop.permute.xlu1 %3684  ;;  %v3843_v26 = vrot.slane %v3830_v46, 7  ;;  %v5130_v51 = vpack.c.bf16 %v4344_v47, %v4343_v31  ;;  %p5278_p0 = scmp.ne.s32.totalorder %s4434_s17, %s5277_s11  ;;  %p5283_p2 = scmp.lt.s32.totalorder %s5277_s11, %s5277_s11 }
 0x393   :  { %v3689_v5 = vsel %vm7725_vm10, %v5276_v43, %v3685_v44 }
 0x394   :  { %v3857_v60 = vsel %vm194_vm0, %v3689_v5, %v3843_v26  ;;  %v3856_v56 = vsel %vm194_vm0, %v3688_v33, %v3842_v1  ;;  %p5284_p3 = por %p5283_p2, %p5282_p1 }
 0x395   :  { %4174 = vmatprep.mubr.f32.mxu0 %v3857_v60 }
 0x396   :  { %v3687_v24 = vpop.permute.xlu1 %3686  ;;  %4175 = vmatmul.mubr.f32.vlgmr.msra.gmra.mrb[74].mxu0 %v3856_v56  ;;  %p5285_p4 = pnand %p5284_p3, %p5278_p0 }
 0x397   :  { %v3690_v13 = vsel %vm7727_vm13, %v3685_v44, %v3687_v24 }
 0x398   :  { %v3858_v38 = vsel %vm194_vm0, %v3690_v13, %v3844_v52  ;;  %vm4266_vm0 = vcmask 523264  }
 0x399   :  { %4716 = vmatmul.mubr.msk.f32.vlgmr.msra.gmra.mrb[74].mxu1 %vm3966_vm12, %v3858_v38 }
 0x39a   :  { %4734 = vmatprep.mubr.msk.f32.mxu1 %vm5322_vm6, %v7721_v40  ;;  %5116 = vmatpush3.bf16.msra.mxu1 %v5115_v12 }
 0x39b   :  { %5117 = vmatprep.subr.bf16.mxu1 %v5321_v25 }
 0x39e   :  { %5119 = vmatpush3.bf16.msra.mxu1 %v5118_v42 }
 0x39f   :  { %5120 = vmatprep.subr.bf16.mxu1 %v5321_v25 }
 0x3a2   :  { %5122 = vmatpush3.bf16.msra.mxu1 %v5121_v55 }
 0x3a3   :  { %5123 = vmatprep.subr.bf16.mxu1 %v5321_v25 }
 0x3a6   :  { %5125 = vmatpush3.bf16.msra.mxu1 %v5124_v57 }
 0x3a7   :  { %5126 = vmatprep.subr.bf16.mxu1 %v5321_v25 }
 0x40a   :  { %v4615_v58 = vpop.f32.mrb[72].mxu0 }
 0x40b   :  { %v4616_v0 = vpop.f32.mrb[73].mxu0 }
 0x40c   :  { %v4617_v3 = vadd.f32 %v4616_v0, %v4615_v58 }
 0x40e   :  { %v4037_v63 = vadd.f32 %v4617_v3, %v4577_v18 }
 0x450   :  { %v4650_v37 = vpop.f32.mrb[72].mxu1 }
 0x451   :  { %v4651_v61 = vpop.f32.mrb[73].mxu1 }
 0x452   :  { %v4652_v48 = vadd.f32 %v4651_v61, %v4650_v37 }
 0x454   :  { %v4107_v15 = vadd.f32 %v4652_v48, %v4037_v63 }
 0x469   :  { %v4685_v59 = vpop.f32.mrb[74].mxu0 }
 0x46a   :  { %v4686_v20 = vpop.f32.mrb[75].mxu0 }
 0x46b   :  { %v4687_v14 = vadd.f32 %v4686_v20, %v4685_v59 }
 0x46c   :  { %v4246_v49 = vpop.f32.mrb[74].mxu1 }
 0x46d   :  { %v4177_v62 = vadd.f32 %v4687_v14, %v4107_v15  ;;  %v4717_v10 = vpop.f32.mrb[75].mxu1 }
 0x46f   :  { %v4247_v17 = vadd.f32 %v4246_v49, %v4177_v62 }
 0x471   :  { %v4250_v39 = vmax.f32 %v4247_v17, 0.0 }
 0x473   :  { %4735 = vmatmul.mubr.msk.f32.vlgmr.msra.gmra.mrb[76].mxu1 %vm4266_vm0, %v4250_v39 }
 0x474   :  { %5128 = vmatpush3.bf16.msra.mxu1 %v5127_v19  ;;  %4745 = vmatprep.mubr.msk.f32.mxu1 %vm5322_vm6, %v7721_v40 }
 0x475   :  { %5129 = vmatprep.subr.bf16.mxu1 %v5321_v25  ;;  %v4581_v25 = vld [vmem:[%s7518_s12] ss:$0 sm:$0xff] }
 0x478   :  { %5131 = vmatpush3.bf16.msra.mxu1 %v5130_v51 }
 0x546   :  { %v4336_v53 = vpop.f32.mrb[76].mxu1 }
 0x547   :  { %v4337_v21 = vadd.f32 %v4579_v16, %v4336_v53  ;;  %v4736_v45 = vpop.f32.mrb[77].mxu1 }
 0x549   :  { %v4340_v9 = vmax.f32 %v4337_v21, 0.0 }
 0x54b   :  { %4746 = vmatmul.mubr.msk.f32.vlgmr.msra.gmra.mrb[78].mxu1 %vm3966_vm12, %v4340_v9 }
 0x61e   :  { %v4421_v36 = vpop.f32.mrb[78].mxu1 }
 0x61f   :  { %v4422_v23 = vadd.f32 %v4581_v25, %v4421_v36  ;;  %v4747_v34 = vpop.f32.mrb[79].mxu1 }
 0x621   :  { %4426 = vst.msk [vmem:[#allocation2] sm:$0x3] %vm4425_vm14, %v4422_v23 }
 0x622   :  { %5288 = shalt.err (!%p5285_p4)
}
 0x623   :  { %s5289_s15 = scalar_lea.hbm %s7519_s13, 32 }
 0x624   :  { %p5290_p5 = scmp.ne.s32.totalorder %s7519_s13, %s5289_s15  ;;  %p5293_p6 = scmp.lt.u32.totalorder %s5289_s15, %s7519_s13 }
 0x626   :  { %p5295_p7 = pnand %p5293_p6, %p5290_p5 }
 0x628   :  { %5298 = shalt.err (!%p5295_p7)
}
 0x629   :  { %4436 = dma.vmem_to_hbm [thread:$0]  %s4434_s17, 32, %s7519_s13, [#allocation3]  }
 0x62a   :  { %5299 = dma.done.wait [#allocation3], 32  }
 0x62b   :  { %5300 = vsyncadd [#allocation3], 4294967264 }
 0x62c   :  { %4440 = vsyncpa [#allocation3], 1 }

</bundles_post_ra>
